<compile_context>
chip_gen: v6e
topology: v6e:2x2x1
jax: 0.10.0
libtpu: 0.0.40
codegen_flags: <defaults>
</compile_context>

<pallas_src>
import functools
import math

import jax
import jax.numpy as jnp
from jax import lax
from jax.experimental import pallas as pl
from jax.experimental.pallas import tpu as pltpu

# ----------------------------- configuration -----------------------------
INPUT_SIZE = 32
FEAT_SIZE = 128          # small but lane-dense (128 lanes); module default 256
N_HEADS = 4
DH = FEAT_SIZE // N_HEADS
N_CLASSES = 2
N_BLOCKS = 1
TABLE_SIZE = [4, 6, 8, 10]
TABLE_MAX = max(TABLE_SIZE)          # 10
MLP_RATIO = 4
LN_EPS = 1e-5                        # PyTorch nn.LayerNorm default

# rows of the packed "vecs" parameter array (all length-FEAT_SIZE vectors)
(ROW_B1, ROW_LN1_G, ROW_LN1_B, ROW_BPROJ, ROW_LN2_G, ROW_LN2_B,
 ROW_BM2, ROW_LNF_G, ROW_LNF_B) = range(9)
NUM_VEC_ROWS = 16                    # padded to a multiple of 8 sublanes


# ----------------------------- shared helpers -----------------------------
def _layernorm(x, g, b):
    mu = jnp.mean(x, axis=-1, keepdims=True)
    var = jnp.mean(jnp.square(x - mu), axis=-1, keepdims=True)
    return (x - mu) * lax.rsqrt(var + LN_EPS) * g + b


def _gelu_exact(x):
    # nn.GELU() default = exact erf GELU
    return 0.5 * x * (1.0 + lax.erf(x * (1.0 / math.sqrt(2.0))))


# ------------------------------- kernel P --------------------------------
# fc1 + ReLU + LayerNorm1 + fused QKV projection (per-head bf16 slabs)
def prologue_kernel(x_ref, w1_ref, wqkv_ref, vecs_ref,
                    h_ref, q_ref, k_ref, v_ref):
    bf = jnp.bfloat16
    b1 = vecs_ref[ROW_B1:ROW_B1 + 1, :]
    g1 = vecs_ref[ROW_LN1_G:ROW_LN1_G + 1, :]
    be1 = vecs_ref[ROW_LN1_B:ROW_LN1_B + 1, :]

    x = x_ref[...].astype(bf)
    h = jnp.maximum(
        jnp.dot(x, w1_ref[...], preferred_element_type=jnp.float32) + b1, 0.0)
    h_ref[...] = h
    xn = _layernorm(h, g1, be1).astype(bf)

    # single lane-dense 128 -> 384 QKV projection, done once per token block
    qkv = jnp.dot(xn, wqkv_ref[...],
                  preferred_element_type=jnp.float32).astype(bf)

    F_ = FEAT_SIZE
    for hd in range(N_HEADS):                       # static unroll, H = 4
        q_ref[hd] = qkv[:, hd * DH:(hd + 1) * DH]
        k_ref[hd] = qkv[:, F_ + hd * DH:F_ + (hd + 1) * DH]
        v_ref[hd] = qkv[:, 2 * F_ + hd * DH:2 * F_ + (hd + 1) * DH]


# ------------------------------- kernel A --------------------------------
# streamed per-head attention: scores + precomputed bias + softmax + proj
def attn_kernel(q_ref, k_ref, v_ref, bias_ref, wproj_ref, attn_ref, proj_ref):
    bf = jnp.bfloat16
    scale = 1.0 / math.sqrt(DH)

    q = q_ref[0]                                            # (tq, Dh)     bf16
    k = k_ref[0]                                            # (n_pad, Dh)  bf16
    v = v_ref[0]                                            # (n_pad, Dh)  bf16

    scores = lax.dot_general(
        q, k, (((1,), (1,)), ((), ())),
        preferred_element_type=jnp.float32) * scale         # (tq, n_pad) f32
    scores = scores + bias_ref[0].astype(jnp.float32)       # streamed bias add

    m = jnp.max(scores, axis=-1, keepdims=True)
    e = jnp.exp(scores - m)
    denom = jnp.sum(e, axis=-1, keepdims=True)
    p = (e * pl.reciprocal(denom, approx=True)).astype(bf)
    attn_ref[0] = p                                         # bf16, lane-dense

    ctx = jnp.dot(p, v, preferred_element_type=jnp.float32)  # (tq, Dh)
    contrib = jnp.dot(ctx.astype(bf), wproj_ref[0],
                      preferred_element_type=jnp.float32)    # (tq, F)

    @pl.when(pl.program_id(1) == 0)
    def _():
        proj_ref[...] = jnp.zeros_like(proj_ref)

    proj_ref[...] += contrib


# ------------------------------- kernel E --------------------------------
# residual + MLP + masked partial pooled sum (fully parallel over blocks)
def epilogue_kernel(h_ref, proj_ref, vecs_ref, wm1_ref, bm1_ref, wm2_ref,
                    part_ref, *, n_real):
    bf = jnp.bfloat16
    qi = pl.program_id(0)
    tq = h_ref.shape[0]

    bproj = vecs_ref[ROW_BPROJ:ROW_BPROJ + 1, :]
    g2 = vecs_ref[ROW_LN2_G:ROW_LN2_G + 1, :]
    be2 = vecs_ref[ROW_LN2_B:ROW_LN2_B + 1, :]
    bm2 = vecs_ref[ROW_BM2:ROW_BM2 + 1, :]

    h2 = h_ref[...] + proj_ref[...] + bproj                 # residual 1
    x2n = _layernorm(h2, g2, be2).astype(bf)
    mlp = _gelu_exact(
        jnp.dot(x2n, wm1_ref[...], preferred_element_type=jnp.float32)
        + bm1_ref[...])
    mlp = jnp.dot(mlp.astype(bf), wm2_ref[...],
                  preferred_element_type=jnp.float32) + bm2
    h3 = h2 + mlp                                           # residual 2

    row_ids = qi * tq + lax.broadcasted_iota(jnp.int32, (tq, 1), 0)
    part = jnp.sum(jnp.where(row_ids < n_real, h3, 0.0),
                   axis=0, keepdims=True)                   # (1, F)
    # write into an 8-row sublane-aligned slot; rows 1..7 stay zero
    out_rows = lax.broadcasted_iota(jnp.int32, (8, h3.shape[1]), 0)
    part_ref[...] = jnp.where(out_rows == 0, part, 0.0)


# ----------------------------- tiling helpers -----------------------------
def _pick_block(n_pad):
    for c in (512, 256, 128):
        if n_pad % c == 0:
            return c
    return 128


def _attn_tile_and_vmem(n_pad):
    """q-block size + vmem limit for kernel A, per chip generation."""
    def working_set(tq):
        return (2 * tq * n_pad * 2          # bias in, double-buffered bf16
                + 2 * tq * n_pad * 2        # attn out, double-buffered bf16
                + 3 * tq * n_pad * 4        # f32 scores / e / p temporaries
                + 2 * 2 * n_pad * 128 * 2   # K + V tiles (lane-padded) bf16
                + 2 * tq * FEAT_SIZE * 4    # resident proj accumulator
                + (2 << 20))                # weights / q tile / slack
    try:   # physical VMEM: 128 MiB on v5e/v6e, 64 MiB per core on v7x
        phys = int(getattr(pltpu.get_tpu_info(), "vmem_capacity_bytes", 0))
    except Exception:
        phys = 0
    if phys:
        budget = max(32 << 20, min(phys - (8 << 20), 112 << 20))
    else:
        budget = 48 << 20                   # safe on every generation
    tq = 256 if (n_pad % 256 == 0 and working_set(256) <= budget) else 128
    vmem_limit = int(min(budget, max(32 << 20, working_set(tq) + (8 << 20))))
    return tq, vmem_limit


# ----------------------------- JAX glue code ------------------------------
def lbmil_forward(x, params):
    N = x.shape[0]
    F_ = FEAT_SIZE
    H = N_HEADS
    Dh = DH
    Hd = F_ * MLP_RATIO
    T = TABLE_MAX
    bf = jnp.bfloat16

    xfeat = x[:, :INPUT_SIZE]
    x_pos = jnp.round(x[:, -2] - jnp.min(x[:, -2]))
    y_pos = jnp.round(x[:, -1] - jnp.min(x[:, -1]))

    # pad tokens to a multiple of 128 (lane-dense attention rows/cols)
    n_pad = ((N + 127) // 128) * 128
    pad = n_pad - N
    BIG = 1.0e4            # padded tokens land far outside every table_size
    xfeat_p = jnp.pad(xfeat, ((0, pad), (0, 0)))
    x_pos_p = jnp.pad(x_pos, (0, pad), constant_values=BIG)
    y_pos_p = jnp.pad(y_pos, (0, pad), constant_values=BIG)

    # --- relative-position bias, built once in XLA (matches the reference:
    #     -100 for out-of-table / per-head-invalid distances, table value
    #     otherwise); padded keys also receive -100.
    xd = jnp.abs(x_pos_p[:, None] - x_pos_p[None, :]).astype(jnp.int32)
    yd = jnp.abs(y_pos_p[:, None] - y_pos_p[None, :]).astype(jnp.int32)
    in_tab = (xd < T) & (yd < T)
    flat = jnp.where(in_tab, xd * T + yd, 0)
    a_idx = jnp.arange(T)[:, None]
    b_idx = jnp.arange(T)[None, :]
    ts = jnp.asarray(TABLE_SIZE)[:, None, None]
    head_valid = (a_idx[None, :, :] < ts) & (b_idx[None, :, :] < ts)
    eff_tab = jnp.where(head_valid, params["bias_table"][0], -100.0)
    eff_tab = eff_tab.reshape(H, T * T)
    bias_all = jnp.where(in_tab[None, :, :], eff_tab[:, flat],
                         -100.0).astype(bf)                  # (H, n_pad, n_pad)

    # bf16 weights, f32 small params
    w1 = params["w1"].astype(bf)
    wqkv = jnp.concatenate(
        [jnp.transpose(w, (1, 0, 2)).reshape(F_, F_)
         for w in (params["wq"], params["wk"], params["wv"])],
        axis=1).astype(bf)                                   # (F, 3F)
    wproj = params["wproj"].astype(bf)
    wm1 = params["wm1"].astype(bf)
    wm2 = params["wm2"].astype(bf)
    vecs = params["vecs"]
    bm1 = params["bm1"]

    tq_pe = _pick_block(n_pad)          # streaming kernels: big blocks
    n_tb_pe = n_pad // tq_pe
    tq_a, vmem_limit = _attn_tile_and_vmem(n_pad)
    n_tb_a = n_pad // tq_a

    # ---------------- kernel P: fc1 + ReLU + LN1 + QKV ----------------
    h_f32, q_bf, k_bf, v_bf = pl.pallas_call(
        prologue_kernel,
        grid=(n_tb_pe,),
        in_specs=[
            pl.BlockSpec((tq_pe, INPUT_SIZE), lambda i: (i, 0)),
            pl.BlockSpec((INPUT_SIZE, F_), lambda i: (0, 0)),
            pl.BlockSpec((F_, 3 * F_), lambda i: (0, 0)),
            pl.BlockSpec((NUM_VEC_ROWS, F_), lambda i: (0, 0)),
        ],
        out_specs=(
            pl.BlockSpec((tq_pe, F_), lambda i: (i, 0)),
            pl.BlockSpec((H, tq_pe, Dh), lambda i: (0, i, 0)),
            pl.BlockSpec((H, tq_pe, Dh), lambda i: (0, i, 0)),
            pl.BlockSpec((H, tq_pe, Dh), lambda i: (0, i, 0)),
        ),
        out_shape=(
            jax.ShapeDtypeStruct((n_pad, F_), jnp.float32),
            jax.ShapeDtypeStruct((H, n_pad, Dh), bf),
            jax.ShapeDtypeStruct((H, n_pad, Dh), bf),
            jax.ShapeDtypeStruct((H, n_pad, Dh), bf),
        ),
        compiler_params=pltpu.CompilerParams(
            dimension_semantics=("parallel",)),
    )(xfeat_p, w1, wqkv, vecs)

    # ---------------- kernel A: multi-head attention ----------------
    attn_full, proj = pl.pallas_call(
        attn_kernel,
        grid=(n_tb_a, H),
        in_specs=[
            pl.BlockSpec((1, tq_a, Dh), lambda qi, hh: (hh, qi, 0)),     # q
            pl.BlockSpec((1, n_pad, Dh), lambda qi, hh: (hh, 0, 0)),     # k
            pl.BlockSpec((1, n_pad, Dh), lambda qi, hh: (hh, 0, 0)),     # v
            pl.BlockSpec((1, tq_a, n_pad), lambda qi, hh: (hh, qi, 0)),  # bias
            pl.BlockSpec((1, Dh, F_), lambda qi, hh: (hh, 0, 0)),        # wproj
        ],
        out_specs=(
            pl.BlockSpec((1, tq_a, n_pad), lambda qi, hh: (hh, qi, 0)),  # attn
            pl.BlockSpec((tq_a, F_), lambda qi, hh: (qi, 0)),            # proj
        ),
        out_shape=(
            jax.ShapeDtypeStruct((H, n_pad, n_pad), bf),                 # bf16 map
            jax.ShapeDtypeStruct((n_pad, F_), jnp.float32),
        ),
        compiler_params=pltpu.CompilerParams(
            dimension_semantics=("parallel", "arbitrary"),
            vmem_limit_bytes=vmem_limit),
    )(q_bf, k_bf, v_bf, bias_all, wproj)

    # ---------------- kernel E: residual + MLP + partial pooled sums ----------
    partials = pl.pallas_call(
        functools.partial(epilogue_kernel, n_real=N),
        grid=(n_tb_pe,),
        in_specs=[
            pl.BlockSpec((tq_pe, F_), lambda i: (i, 0)),                 # h
            pl.BlockSpec((tq_pe, F_), lambda i: (i, 0)),                 # proj
            pl.BlockSpec((NUM_VEC_ROWS, F_), lambda i: (0, 0)),          # vecs
            pl.BlockSpec((F_, Hd), lambda i: (0, 0)),                    # wm1
            pl.BlockSpec((1, Hd), lambda i: (0, 0)),                     # bm1
            pl.BlockSpec((Hd, F_), lambda i: (0, 0)),                    # wm2
        ],
        out_specs=pl.BlockSpec((8, F_), lambda i: (i, 0)),
        out_shape=jax.ShapeDtypeStruct((n_tb_pe * 8, F_), jnp.float32),
        compiler_params=pltpu.CompilerParams(
            dimension_semantics=("parallel",)),
    )(h_f32, proj, vecs, wm1, bm1, wm2)

    # tiny mean + final LN + classifier in XLA (negligible work)
    pooled = jnp.sum(partials, axis=0, keepdims=True) / jnp.float32(N)   # (1, F)
    gf = vecs[ROW_LNF_G:ROW_LNF_G + 1, :]
    bef = vecs[ROW_LNF_B:ROW_LNF_B + 1, :]
    hp = _layernorm(pooled, gf, bef)
    logits = jnp.dot(hp, params["w2"],
                     preferred_element_type=jnp.float32) + params["b2"]

    # slice off the padded rows/cols (cheap for small pad; consumers that can
    # handle the padded map could skip this copy entirely)
    attn = attn_full[:, :N, :N][None]                        # (1, H, N, N)
    Y_hat = jnp.argmax(logits, axis=-1)
    Y_prob = jax.nn.softmax(logits, axis=-1)
    return logits, Y_hat, Y_prob, attn


# --------------------------- deterministic init ---------------------------
def init_params(key):
    F_ = FEAT_SIZE
    Dh = F_ // N_HEADS
    Hd = F_ * MLP_RATIO
    ks = jax.random.split(key, 9)

    def w(k, shape, scale=0.02):
        return (scale * jax.random.normal(k, shape)).astype(jnp.float32)

    vecs = jnp.zeros((NUM_VEC_ROWS, F_), jnp.float32)
    vecs = vecs.at[ROW_LN1_G].set(1.0)
    vecs = vecs.at[ROW_LN2_G].set(1.0)
    vecs = vecs.at[ROW_LNF_G].set(1.0)

    return dict(
        w1=w(ks[0], (INPUT_SIZE, F_)),
        wq=w(ks[1], (N_HEADS, F_, Dh)),            # qkv_bias=False
        wk=w(ks[2], (N_HEADS, F_, Dh)),
        wv=w(ks[3], (N_HEADS, F_, Dh)),
        wproj=w(ks[4], (N_HEADS, Dh, F_)),
        wm1=w(ks[5], (F_, Hd)),
        bm1=jnp.zeros((1, Hd), jnp.float32),
        wm2=w(ks[6], (Hd, F_)),
        w2=w(ks[7], (F_, N_CLASSES)),
        b2=jnp.zeros((1, N_CLASSES), jnp.float32),
        vecs=vecs,
        # small non-zero values so the bias-table gather is exercised
        bias_table=w(ks[8], (N_BLOCKS, N_HEADS, TABLE_MAX, TABLE_MAX)),
    )


if __name__ == "__main__":
    key = jax.random.PRNGKey(0)
    kp, kf, kpos = jax.random.split(key, 3)
    params = init_params(kp)

    N = 96  # not a multiple of 128 -> exercises the padding / masking path
    feats = jax.random.normal(kf, (N, INPUT_SIZE), jnp.float32)
    pos = jax.random.randint(kpos, (N, 2), 0, 12).astype(jnp.float32)
    x = jnp.concatenate([feats, pos], axis=1)      # (N, input_size + 2)

    fwd = jax.jit(lbmil_forward)
    logits, Y_hat, Y_prob, attn = fwd(x, params)
    jax.block_until_ready((logits, Y_hat, Y_prob, attn))

    assert logits.shape == (1, N_CLASSES)
    assert Y_hat.shape == (1,)
    assert Y_prob.shape == (1, N_CLASSES)
    assert attn.shape == (1, N_HEADS, N, N)
    # softmax rows must sum to ~1 (bf16 map + approx reciprocal + bf16 matmuls)
    row_sums = jnp.sum(attn.astype(jnp.float32), axis=-1)
    assert bool(jnp.all(jnp.abs(row_sums - 1.0) < 2e-2))
    assert bool(jnp.all(jnp.isfinite(logits)))
    assert bool(jnp.all(jnp.isfinite(row_sums)))
    print("KERNEL_OK")
</pallas_src>

<mosaic_0001>
module attributes {stable_mosaic.version = 11 : i64} {
  func.func @prologue_kernel(%arg0: i32, %arg1: memref<128x32xf32, #tpu.memory_space<vmem>>, %arg2: memref<32x128xbf16, #tpu.memory_space<vmem>>, %arg3: memref<128x384xbf16, #tpu.memory_space<vmem>>, %arg4: memref<16x128xf32, #tpu.memory_space<vmem>>, %arg5: memref<128x128xf32, #tpu.memory_space<vmem>>, %arg6: memref<4x128x32xbf16, #tpu.memory_space<vmem>>, %arg7: memref<4x128x32xbf16, #tpu.memory_space<vmem>>, %arg8: memref<4x128x32xbf16, #tpu.memory_space<vmem>>) attributes {dimension_semantics = [#tpu.dimension_semantics<parallel>], iteration_bounds = array<i64: 1>, scalar_prefetch = 0 : i64, scratch_operands = 0 : i64, tpu.core_type = #tpu.core_type<tc>, window_params = [{transform_indices = @transform_0, window_bounds = array<i64: 128, 32>}, {pipeline_mode = #tpu.pipeline_mode<synchronous>, transform_indices = @transform_1, window_bounds = array<i64: 32, 128>}, {pipeline_mode = #tpu.pipeline_mode<synchronous>, transform_indices = @transform_2, window_bounds = array<i64: 128, 384>}, {pipeline_mode = #tpu.pipeline_mode<synchronous>, transform_indices = @transform_3, window_bounds = array<i64: 16, 128>}, {transform_indices = @transform_4, window_bounds = array<i64: 128, 128>}, {transform_indices = @transform_5, window_bounds = array<i64: 4, 128, 32>}, {transform_indices = @transform_6, window_bounds = array<i64: 4, 128, 32>}, {transform_indices = @transform_7, window_bounds = array<i64: 4, 128, 32>}]} {
    %c0 = arith.constant 0 : index
    %c0_0 = arith.constant 0 : index
    %0 = vector.load %arg4[%c0, %c0_0] : memref<16x128xf32, #tpu.memory_space<vmem>>, vector<1x128xf32>
    %c1 = arith.constant 1 : index
    %c0_1 = arith.constant 0 : index
    %1 = vector.load %arg4[%c1, %c0_1] : memref<16x128xf32, #tpu.memory_space<vmem>>, vector<1x128xf32>
    %c2 = arith.constant 2 : index
    %c0_2 = arith.constant 0 : index
    %2 = vector.load %arg4[%c2, %c0_2] : memref<16x128xf32, #tpu.memory_space<vmem>>, vector<1x128xf32>
    %c0_3 = arith.constant 0 : index
    %c0_4 = arith.constant 0 : index
    %3 = vector.load %arg1[%c0_3, %c0_4] : memref<128x32xf32, #tpu.memory_space<vmem>>, vector<128x32xf32>
    %4 = arith.truncf %3 : vector<128x32xf32> to vector<128x32xbf16>
    %c0_5 = arith.constant 0 : index
    %c0_6 = arith.constant 0 : index
    %5 = vector.load %arg2[%c0_5, %c0_6] : memref<32x128xbf16, #tpu.memory_space<vmem>>, vector<32x128xbf16>
    %cst = arith.constant dense<0.000000e+00> : vector<128x128xf32>
    %6 = tpu.matmul %4, %5, %cst {dimension_numbers = #tpu.dot_dimension_numbers<[1], [0], [0], [1], [0, 0, 1, 1], [], []>} : vector<128x32xbf16>, vector<32x128xbf16>, vector<128x128xf32> -> vector<128x128xf32>
    %7 = vector.broadcast %0 : vector<1x128xf32> to vector<128x128xf32>
    %8 = arith.addf %6, %7 : vector<128x128xf32>
    %cst_7 = arith.constant 0.000000e+00 : f32
    %9 = vector.broadcast %cst_7 : f32 to vector<128x128xf32>
    %10 = arith.maximumf %8, %9 : vector<128x128xf32>
    %c0_8 = arith.constant 0 : index
    %c0_9 = arith.constant 0 : index
    %11 = vector.load %arg5[%c0_8, %c0_9] : memref<128x128xf32, #tpu.memory_space<vmem>>, vector<128x128xf32>
    tpu.vector_store %arg5[%c0_8, %c0_9], %10 {strides = array<i32>} : memref<128x128xf32, #tpu.memory_space<vmem>>, vector<128x128xf32>,
    %cst_10 = arith.constant dense<0.000000e+00> : vector<128xf32>
    %12 = vector.multi_reduction <add>, %10, %cst_10 [1] : vector<128x128xf32> to vector<128xf32>
    %13 = vector.shape_cast %12 : vector<128xf32> to vector<128x1xf32>
    %cst_11 = arith.constant 1.280000e+02 : f32
    %14 = vector.broadcast %cst_11 : f32 to vector<128x1xf32>
    %15 = arith.divf %13, %14 : vector<128x1xf32>
    %16 = vector.broadcast %15 : vector<128x1xf32> to vector<128x128xf32>
    %17 = arith.subf %10, %16 : vector<128x128xf32>
    %18 = arith.mulf %17, %17 : vector<128x128xf32>
    %cst_12 = arith.constant dense<0.000000e+00> : vector<128xf32>
    %19 = vector.multi_reduction <add>, %18, %cst_12 [1] : vector<128x128xf32> to vector<128xf32>
    %20 = vector.shape_cast %19 : vector<128xf32> to vector<128x1xf32>
    %cst_13 = arith.constant 1.280000e+02 : f32
    %21 = vector.broadcast %cst_13 : f32 to vector<128x1xf32>
    %22 = arith.divf %20, %21 : vector<128x1xf32>
    %23 = vector.broadcast %15 : vector<128x1xf32> to vector<128x128xf32>
    %24 = arith.subf %10, %23 : vector<128x128xf32>
    %cst_14 = arith.constant 9.99999974E-6 : f32
    %25 = vector.broadcast %cst_14 : f32 to vector<128x1xf32>
    %26 = arith.addf %22, %25 : vector<128x1xf32>
    %27 = math.rsqrt %26 : vector<128x1xf32>
    %28 = vector.broadcast %27 : vector<128x1xf32> to vector<128x128xf32>
    %29 = arith.mulf %24, %28 : vector<128x128xf32>
    %30 = vector.broadcast %1 : vector<1x128xf32> to vector<128x128xf32>
    %31 = arith.mulf %29, %30 : vector<128x128xf32>
    %32 = vector.broadcast %2 : vector<1x128xf32> to vector<128x128xf32>
    %33 = arith.addf %31, %32 : vector<128x128xf32>
    %34 = arith.truncf %33 : vector<128x128xf32> to vector<128x128xbf16>
    %c0_15 = arith.constant 0 : index
    %c0_16 = arith.constant 0 : index
    %35 = vector.load %arg3[%c0_15, %c0_16] : memref<128x384xbf16, #tpu.memory_space<vmem>>, vector<128x384xbf16>
    %cst_17 = arith.constant dense<0.000000e+00> : vector<128x384xf32>
    %36 = tpu.matmul %34, %35, %cst_17 {dimension_numbers = #tpu.dot_dimension_numbers<[1], [0], [0], [1], [0, 0, 1, 1], [], []>} : vector<128x128xbf16>, vector<128x384xbf16>, vector<128x384xf32> -> vector<128x384xf32>
    %37 = arith.truncf %36 : vector<128x384xf32> to vector<128x384xbf16>
    %38 = vector.extract_strided_slice %37 {offsets = [0, 0], sizes = [128, 32], strides = [1, 1]} : vector<128x384xbf16> to vector<128x32xbf16>
    %c0_18 = arith.constant 0 : index
    %c0_19 = arith.constant 0 : index
    %c0_20 = arith.constant 0 : index
    %39 = vector.load %arg6[%c0_18, %c0_19, %c0_20] : memref<4x128x32xbf16, #tpu.memory_space<vmem>>, vector<1x128x32xbf16>
    %40 = vector.shape_cast %39 : vector<1x128x32xbf16> to vector<128x32xbf16>
    %41 = vector.shape_cast %38 : vector<128x32xbf16> to vector<1x128x32xbf16>
    tpu.vector_store %arg6[%c0_18, %c0_19, %c0_20], %41 {strides = array<i32>} : memref<4x128x32xbf16, #tpu.memory_space<vmem>>, vector<1x128x32xbf16>,
    %42 = vector.extract_strided_slice %37 {offsets = [0, 128], sizes = [128, 32], strides = [1, 1]} : vector<128x384xbf16> to vector<128x32xbf16>
    %c0_21 = arith.constant 0 : index
    %c0_22 = arith.constant 0 : index
    %c0_23 = arith.constant 0 : index
    %43 = vector.load %arg7[%c0_21, %c0_22, %c0_23] : memref<4x128x32xbf16, #tpu.memory_space<vmem>>, vector<1x128x32xbf16>
    %44 = vector.shape_cast %43 : vector<1x128x32xbf16> to vector<128x32xbf16>
    %45 = vector.shape_cast %42 : vector<128x32xbf16> to vector<1x128x32xbf16>
    tpu.vector_store %arg7[%c0_21, %c0_22, %c0_23], %45 {strides = array<i32>} : memref<4x128x32xbf16, #tpu.memory_space<vmem>>, vector<1x128x32xbf16>,
    %46 = vector.extract_strided_slice %37 {offsets = [0, 256], sizes = [128, 32], strides = [1, 1]} : vector<128x384xbf16> to vector<128x32xbf16>
    %c0_24 = arith.constant 0 : index
    %c0_25 = arith.constant 0 : index
    %c0_26 = arith.constant 0 : index
    %47 = vector.load %arg8[%c0_24, %c0_25, %c0_26] : memref<4x128x32xbf16, #tpu.memory_space<vmem>>, vector<1x128x32xbf16>
    %48 = vector.shape_cast %47 : vector<1x128x32xbf16> to vector<128x32xbf16>
    %49 = vector.shape_cast %46 : vector<128x32xbf16> to vector<1x128x32xbf16>
    tpu.vector_store %arg8[%c0_24, %c0_25, %c0_26], %49 {strides = array<i32>} : memref<4x128x32xbf16, #tpu.memory_space<vmem>>, vector<1x128x32xbf16>,
    %50 = vector.extract_strided_slice %37 {offsets = [0, 32], sizes = [128, 32], strides = [1, 1]} : vector<128x384xbf16> to vector<128x32xbf16>
    %c1_27 = arith.constant 1 : index
    %c0_28 = arith.constant 0 : index
    %c0_29 = arith.constant 0 : index
    %51 = vector.load %arg6[%c1_27, %c0_28, %c0_29] : memref<4x128x32xbf16, #tpu.memory_space<vmem>>, vector<1x128x32xbf16>
    %52 = vector.shape_cast %51 : vector<1x128x32xbf16> to vector<128x32xbf16>
    %53 = vector.shape_cast %50 : vector<128x32xbf16> to vector<1x128x32xbf16>
    tpu.vector_store %arg6[%c1_27, %c0_28, %c0_29], %53 {strides = array<i32>} : memref<4x128x32xbf16, #tpu.memory_space<vmem>>, vector<1x128x32xbf16>,
    %54 = vector.extract_strided_slice %37 {offsets = [0, 160], sizes = [128, 32], strides = [1, 1]} : vector<128x384xbf16> to vector<128x32xbf16>
    %c1_30 = arith.constant 1 : index
    %c0_31 = arith.constant 0 : index
    %c0_32 = arith.constant 0 : index
    %55 = vector.load %arg7[%c1_30, %c0_31, %c0_32] : memref<4x128x32xbf16, #tpu.memory_space<vmem>>, vector<1x128x32xbf16>
    %56 = vector.shape_cast %55 : vector<1x128x32xbf16> to vector<128x32xbf16>
    %57 = vector.shape_cast %54 : vector<128x32xbf16> to vector<1x128x32xbf16>
    tpu.vector_store %arg7[%c1_30, %c0_31, %c0_32], %57 {strides = array<i32>} : memref<4x128x32xbf16, #tpu.memory_space<vmem>>, vector<1x128x32xbf16>,
    %58 = vector.extract_strided_slice %37 {offsets = [0, 288], sizes = [128, 32], strides = [1, 1]} : vector<128x384xbf16> to vector<128x32xbf16>
    %c1_33 = arith.constant 1 : index
    %c0_34 = arith.constant 0 : index
    %c0_35 = arith.constant 0 : index
    %59 = vector.load %arg8[%c1_33, %c0_34, %c0_35] : memref<4x128x32xbf16, #tpu.memory_space<vmem>>, vector<1x128x32xbf16>
    %60 = vector.shape_cast %59 : vector<1x128x32xbf16> to vector<128x32xbf16>
    %61 = vector.shape_cast %58 : vector<128x32xbf16> to vector<1x128x32xbf16>
    tpu.vector_store %arg8[%c1_33, %c0_34, %c0_35], %61 {strides = array<i32>} : memref<4x128x32xbf16, #tpu.memory_space<vmem>>, vector<1x128x32xbf16>,
    %62 = vector.extract_strided_slice %37 {offsets = [0, 64], sizes = [128, 32], strides = [1, 1]} : vector<128x384xbf16> to vector<128x32xbf16>
    %c2_36 = arith.constant 2 : index
    %c0_37 = arith.constant 0 : index
    %c0_38 = arith.constant 0 : index
    %63 = vector.load %arg6[%c2_36, %c0_37, %c0_38] : memref<4x128x32xbf16, #tpu.memory_space<vmem>>, vector<1x128x32xbf16>
    %64 = vector.shape_cast %63 : vector<1x128x32xbf16> to vector<128x32xbf16>
    %65 = vector.shape_cast %62 : vector<128x32xbf16> to vector<1x128x32xbf16>
    tpu.vector_store %arg6[%c2_36, %c0_37, %c0_38], %65 {strides = array<i32>} : memref<4x128x32xbf16, #tpu.memory_space<vmem>>, vector<1x128x32xbf16>,
    %66 = vector.extract_strided_slice %37 {offsets = [0, 192], sizes = [128, 32], strides = [1, 1]} : vector<128x384xbf16> to vector<128x32xbf16>
    %c2_39 = arith.constant 2 : index
    %c0_40 = arith.constant 0 : index
    %c0_41 = arith.constant 0 : index
    %67 = vector.load %arg7[%c2_39, %c0_40, %c0_41] : memref<4x128x32xbf16, #tpu.memory_space<vmem>>, vector<1x128x32xbf16>
    %68 = vector.shape_cast %67 : vector<1x128x32xbf16> to vector<128x32xbf16>
    %69 = vector.shape_cast %66 : vector<128x32xbf16> to vector<1x128x32xbf16>
    tpu.vector_store %arg7[%c2_39, %c0_40, %c0_41], %69 {strides = array<i32>} : memref<4x128x32xbf16, #tpu.memory_space<vmem>>, vector<1x128x32xbf16>,
    %70 = vector.extract_strided_slice %37 {offsets = [0, 320], sizes = [128, 32], strides = [1, 1]} : vector<128x384xbf16> to vector<128x32xbf16>
    %c2_42 = arith.constant 2 : index
    %c0_43 = arith.constant 0 : index
    %c0_44 = arith.constant 0 : index
    %71 = vector.load %arg8[%c2_42, %c0_43, %c0_44] : memref<4x128x32xbf16, #tpu.memory_space<vmem>>, vector<1x128x32xbf16>
    %72 = vector.shape_cast %71 : vector<1x128x32xbf16> to vector<128x32xbf16>
    %73 = vector.shape_cast %70 : vector<128x32xbf16> to vector<1x128x32xbf16>
    tpu.vector_store %arg8[%c2_42, %c0_43, %c0_44], %73 {strides = array<i32>} : memref<4x128x32xbf16, #tpu.memory_space<vmem>>, vector<1x128x32xbf16>,
    %74 = vector.extract_strided_slice %37 {offsets = [0, 96], sizes = [128, 32], strides = [1, 1]} : vector<128x384xbf16> to vector<128x32xbf16>
    %c3 = arith.constant 3 : index
    %c0_45 = arith.constant 0 : index
    %c0_46 = arith.constant 0 : index
    %75 = vector.load %arg6[%c3, %c0_45, %c0_46] : memref<4x128x32xbf16, #tpu.memory_space<vmem>>, vector<1x128x32xbf16>
    %76 = vector.shape_cast %75 : vector<1x128x32xbf16> to vector<128x32xbf16>
    %77 = vector.shape_cast %74 : vector<128x32xbf16> to vector<1x128x32xbf16>
    tpu.vector_store %arg6[%c3, %c0_45, %c0_46], %77 {strides = array<i32>} : memref<4x128x32xbf16, #tpu.memory_space<vmem>>, vector<1x128x32xbf16>,
    %78 = vector.extract_strided_slice %37 {offsets = [0, 224], sizes = [128, 32], strides = [1, 1]} : vector<128x384xbf16> to vector<128x32xbf16>
    %c3_47 = arith.constant 3 : index
    %c0_48 = arith.constant 0 : index
    %c0_49 = arith.constant 0 : index
    %79 = vector.load %arg7[%c3_47, %c0_48, %c0_49] : memref<4x128x32xbf16, #tpu.memory_space<vmem>>, vector<1x128x32xbf16>
    %80 = vector.shape_cast %79 : vector<1x128x32xbf16> to vector<128x32xbf16>
    %81 = vector.shape_cast %78 : vector<128x32xbf16> to vector<1x128x32xbf16>
    tpu.vector_store %arg7[%c3_47, %c0_48, %c0_49], %81 {strides = array<i32>} : memref<4x128x32xbf16, #tpu.memory_space<vmem>>, vector<1x128x32xbf16>,
    %82 = vector.extract_strided_slice %37 {offsets = [0, 352], sizes = [128, 32], strides = [1, 1]} : vector<128x384xbf16> to vector<128x32xbf16>
    %c3_50 = arith.constant 3 : index
    %c0_51 = arith.constant 0 : index
    %c0_52 = arith.constant 0 : index
    %83 = vector.load %arg8[%c3_50, %c0_51, %c0_52] : memref<4x128x32xbf16, #tpu.memory_space<vmem>>, vector<1x128x32xbf16>
    %84 = vector.shape_cast %83 : vector<1x128x32xbf16> to vector<128x32xbf16>
    %85 = vector.shape_cast %82 : vector<128x32xbf16> to vector<1x128x32xbf16>
    tpu.vector_store %arg8[%c3_50, %c0_51, %c0_52], %85 {strides = array<i32>} : memref<4x128x32xbf16, #tpu.memory_space<vmem>>, vector<1x128x32xbf16>,
    return
  }
  func.func @transform_0(%arg0: i32) -> (i32, i32) {
    %c0_i32 = arith.constant 0 : i32
    %c0_i32_0 = arith.constant 0 : i32
    return %arg0, %c0_i32 : i32, i32
  }
  func.func @transform_1(%arg0: i32) -> (i32, i32) {
    %c0_i32 = arith.constant 0 : i32
    %c0_i32_0 = arith.constant 0 : i32
    %c0_i32_1 = arith.constant 0 : i32
    return %c0_i32, %c0_i32_0 : i32, i32
  }
  func.func @transform_2(%arg0: i32) -> (i32, i32) {
    %c0_i32 = arith.constant 0 : i32
    %c0_i32_0 = arith.constant 0 : i32
    %c0_i32_1 = arith.constant 0 : i32
    return %c0_i32, %c0_i32_0 : i32, i32
  }
  func.func @transform_3(%arg0: i32) -> (i32, i32) {
    %c0_i32 = arith.constant 0 : i32
    %c0_i32_0 = arith.constant 0 : i32
    %c0_i32_1 = arith.constant 0 : i32
    return %c0_i32, %c0_i32_0 : i32, i32
  }
  func.func @transform_4(%arg0: i32) -> (i32, i32) {
    %c0_i32 = arith.constant 0 : i32
    %c0_i32_0 = arith.constant 0 : i32
    return %arg0, %c0_i32 : i32, i32
  }
  func.func @transform_5(%arg0: i32) -> (i32, i32, i32) {
    %c0_i32 = arith.constant 0 : i32
    %c0_i32_0 = arith.constant 0 : i32
    %c0_i32_1 = arith.constant 0 : i32
    return %c0_i32, %arg0, %c0_i32_0 : i32, i32, i32
  }
  func.func @transform_6(%arg0: i32) -> (i32, i32, i32) {
    %c0_i32 = arith.constant 0 : i32
    %c0_i32_0 = arith.constant 0 : i32
    %c0_i32_1 = arith.constant 0 : i32
    return %c0_i32, %arg0, %c0_i32_0 : i32, i32, i32
  }
  func.func @transform_7(%arg0: i32) -> (i32, i32, i32) {
    %c0_i32 = arith.constant 0 : i32
    %c0_i32_0 = arith.constant 0 : i32
    %c0_i32_1 = arith.constant 0 : i32
    return %c0_i32, %arg0, %c0_i32_0 : i32, i32, i32
  }
}

module attributes {stable_mosaic.version = 11 : i64} {
  func.func @attn_kernel(%arg0: i32, %arg1: i32, %arg2: memref<1x128x32xbf16, #tpu.memory_space<vmem>>, %arg3: memref<1x128x32xbf16, #tpu.memory_space<vmem>>, %arg4: memref<1x128x32xbf16, #tpu.memory_space<vmem>>, %arg5: memref<1x128x128xbf16, #tpu.memory_space<vmem>>, %arg6: memref<1x32x128xbf16, #tpu.memory_space<vmem>>, %arg7: memref<1x128x128xbf16, #tpu.memory_space<vmem>>, %arg8: memref<128x128xf32, #tpu.memory_space<vmem>>) attributes {dimension_semantics = [#tpu.dimension_semantics<parallel>, #tpu.dimension_semantics<arbitrary>], iteration_bounds = array<i64: 1, 4>, scalar_prefetch = 0 : i64, scratch_operands = 0 : i64, tpu.core_type = #tpu.core_type<tc>, window_params = [{transform_indices = @transform_0, window_bounds = array<i64: 1, 128, 32>}, {transform_indices = @transform_1, window_bounds = array<i64: 1, 128, 32>}, {transform_indices = @transform_2, window_bounds = array<i64: 1, 128, 32>}, {transform_indices = @transform_3, window_bounds = array<i64: 1, 128, 128>}, {transform_indices = @transform_4, window_bounds = array<i64: 1, 32, 128>}, {transform_indices = @transform_5, window_bounds = array<i64: 1, 128, 128>}, {transform_indices = @transform_6, window_bounds = array<i64: 128, 128>}]} {
    %c0 = arith.constant 0 : index
    %c0_0 = arith.constant 0 : index
    %c0_1 = arith.constant 0 : index
    %0 = vector.load %arg2[%c0, %c0_0, %c0_1] : memref<1x128x32xbf16, #tpu.memory_space<vmem>>, vector<1x128x32xbf16>
    %1 = vector.shape_cast %0 : vector<1x128x32xbf16> to vector<128x32xbf16>
    %c0_2 = arith.constant 0 : index
    %c0_3 = arith.constant 0 : index
    %c0_4 = arith.constant 0 : index
    %2 = vector.load %arg3[%c0_2, %c0_3, %c0_4] : memref<1x128x32xbf16, #tpu.memory_space<vmem>>, vector<1x128x32xbf16>
    %3 = vector.shape_cast %2 : vector<1x128x32xbf16> to vector<128x32xbf16>
    %c0_5 = arith.constant 0 : index
    %c0_6 = arith.constant 0 : index
    %c0_7 = arith.constant 0 : index
    %4 = vector.load %arg4[%c0_5, %c0_6, %c0_7] : memref<1x128x32xbf16, #tpu.memory_space<vmem>>, vector<1x128x32xbf16>
    %5 = vector.shape_cast %4 : vector<1x128x32xbf16> to vector<128x32xbf16>
    %cst = arith.constant dense<0.000000e+00> : vector<128x128xf32>
    %6 = tpu.matmul %1, %3, %cst {dimension_numbers = #tpu.dot_dimension_numbers<[1], [1], [0], [0], [0, 0, 1, 0], [], []>} : vector<128x32xbf16>, vector<128x32xbf16>, vector<128x128xf32> -> vector<128x128xf32>
    %cst_8 = arith.constant 0.176776692 : f32
    %7 = vector.broadcast %cst_8 : f32 to vector<128x128xf32>
    %8 = arith.mulf %6, %7 : vector<128x128xf32>
    %c0_9 = arith.constant 0 : index
    %c0_10 = arith.constant 0 : index
    %c0_11 = arith.constant 0 : index
    %9 = vector.load %arg5[%c0_9, %c0_10, %c0_11] : memref<1x128x128xbf16, #tpu.memory_space<vmem>>, vector<1x128x128xbf16>
    %10 = vector.shape_cast %9 : vector<1x128x128xbf16> to vector<128x128xbf16>
    %11 = arith.extf %10 : vector<128x128xbf16> to vector<128x128xf32>
    %12 = arith.addf %8, %11 : vector<128x128xf32>
    %cst_12 = arith.constant dense<0xFF800000> : vector<128xf32>
    %13 = vector.multi_reduction <maximumf>, %12, %cst_12 [1] : vector<128x128xf32> to vector<128xf32>
    %14 = vector.shape_cast %13 : vector<128xf32> to vector<128x1xf32>
    %15 = vector.broadcast %14 : vector<128x1xf32> to vector<128x128xf32>
    %16 = arith.subf %12, %15 : vector<128x128xf32>
    %17 = math.exp %16 : vector<128x128xf32>
    %cst_13 = arith.constant dense<0.000000e+00> : vector<128xf32>
    %18 = vector.multi_reduction <add>, %17, %cst_13 [1] : vector<128x128xf32> to vector<128xf32>
    %19 = vector.shape_cast %18 : vector<128xf32> to vector<128x1xf32>
    %20 = tpu.reciprocal %19 {approx = true} : vector<128x1xf32> -> vector<128x1xf32>
    %21 = vector.broadcast %20 : vector<128x1xf32> to vector<128x128xf32>
    %22 = arith.mulf %17, %21 : vector<128x128xf32>
    %23 = arith.truncf %22 : vector<128x128xf32> to vector<128x128xbf16>
    %c0_14 = arith.constant 0 : index
    %c0_15 = arith.constant 0 : index
    %c0_16 = arith.constant 0 : index
    %24 = vector.load %arg7[%c0_14, %c0_15, %c0_16] : memref<1x128x128xbf16, #tpu.memory_space<vmem>>, vector<1x128x128xbf16>
    %25 = vector.shape_cast %24 : vector<1x128x128xbf16> to vector<128x128xbf16>
    %26 = vector.shape_cast %23 : vector<128x128xbf16> to vector<1x128x128xbf16>
    tpu.vector_store %arg7[%c0_14, %c0_15, %c0_16], %26 {strides = array<i32>} : memref<1x128x128xbf16, #tpu.memory_space<vmem>>, vector<1x128x128xbf16>,
    %cst_17 = arith.constant dense<0.000000e+00> : vector<128x32xf32>
    %27 = tpu.matmul %23, %5, %cst_17 {dimension_numbers = #tpu.dot_dimension_numbers<[1], [0], [0], [1], [0, 0, 1, 1], [], []>} : vector<128x128xbf16>, vector<128x32xbf16>, vector<128x32xf32> -> vector<128x32xf32>
    %28 = arith.truncf %27 : vector<128x32xf32> to vector<128x32xbf16>
    %c0_18 = arith.constant 0 : index
    %c0_19 = arith.constant 0 : index
    %c0_20 = arith.constant 0 : index
    %29 = vector.load %arg6[%c0_18, %c0_19, %c0_20] : memref<1x32x128xbf16, #tpu.memory_space<vmem>>, vector<1x32x128xbf16>
    %30 = vector.shape_cast %29 : vector<1x32x128xbf16> to vector<32x128xbf16>
    %cst_21 = arith.constant dense<0.000000e+00> : vector<128x128xf32>
    %31 = tpu.matmul %28, %30, %cst_21 {dimension_numbers = #tpu.dot_dimension_numbers<[1], [0], [0], [1], [0, 0, 1, 1], [], []>} : vector<128x32xbf16>, vector<32x128xbf16>, vector<128x128xf32> -> vector<128x128xf32>
    %c0_i32 = arith.constant 0 : i32
    %32 = arith.cmpi eq, %arg1, %c0_i32 : i32
    %33 = arith.extui %32 : i1 to i32
    %c0_i32_22 = arith.constant 0 : i32
    %34 = arith.cmpi ne, %33, %c0_i32_22 : i32
    scf.if %34 {
      %cst_27 = arith.constant 0.000000e+00 : f32
      %38 = vector.broadcast %cst_27 : f32 to vector<128x128xf32>
      %c0_28 = arith.constant 0 : index
      %c0_29 = arith.constant 0 : index
      %39 = vector.load %arg8[%c0_28, %c0_29] : memref<128x128xf32, #tpu.memory_space<vmem>>, vector<128x128xf32>
      tpu.vector_store %arg8[%c0_28, %c0_29], %38 {strides = array<i32>} : memref<128x128xf32, #tpu.memory_space<vmem>>, vector<128x128xf32>,
    } else {
    }
    %c0_23 = arith.constant 0 : index
    %c0_24 = arith.constant 0 : index
    %35 = vector.load %arg8[%c0_23, %c0_24] : memref<128x128xf32, #tpu.memory_space<vmem>>, vector<128x128xf32>
    %36 = arith.addf %35, %31 : vector<128x128xf32>
    %c0_25 = arith.constant 0 : index
    %c0_26 = arith.constant 0 : index
    %37 = vector.load %arg8[%c0_25, %c0_26] : memref<128x128xf32, #tpu.memory_space<vmem>>, vector<128x128xf32>
    tpu.vector_store %arg8[%c0_25, %c0_26], %36 {strides = array<i32>} : memref<128x128xf32, #tpu.memory_space<vmem>>, vector<128x128xf32>,
    return
  }
  func.func @transform_0(%arg0: i32, %arg1: i32) -> (i32, i32, i32) {
    %c0_i32 = arith.constant 0 : i32
    %c0_i32_0 = arith.constant 0 : i32
    return %arg1, %arg0, %c0_i32 : i32, i32, i32
  }
  func.func @transform_1(%arg0: i32, %arg1: i32) -> (i32, i32, i32) {
    %c0_i32 = arith.constant 0 : i32
    %c0_i32_0 = arith.constant 0 : i32
    %c0_i32_1 = arith.constant 0 : i32
    return %arg1, %c0_i32, %c0_i32_0 : i32, i32, i32
  }
  func.func @transform_2(%arg0: i32, %arg1: i32) -> (i32, i32, i32) {
    %c0_i32 = arith.constant 0 : i32
    %c0_i32_0 = arith.constant 0 : i32
    %c0_i32_1 = arith.constant 0 : i32
    return %arg1, %c0_i32, %c0_i32_0 : i32, i32, i32
  }
  func.func @transform_3(%arg0: i32, %arg1: i32) -> (i32, i32, i32) {
    %c0_i32 = arith.constant 0 : i32
    %c0_i32_0 = arith.constant 0 : i32
    return %arg1, %arg0, %c0_i32 : i32, i32, i32
  }
  func.func @transform_4(%arg0: i32, %arg1: i32) -> (i32, i32, i32) {
    %c0_i32 = arith.constant 0 : i32
    %c0_i32_0 = arith.constant 0 : i32
    %c0_i32_1 = arith.constant 0 : i32
    return %arg1, %c0_i32, %c0_i32_0 : i32, i32, i32
  }
  func.func @transform_5(%arg0: i32, %arg1: i32) -> (i32, i32, i32) {
    %c0_i32 = arith.constant 0 : i32
    %c0_i32_0 = arith.constant 0 : i32
    return %arg1, %arg0, %c0_i32 : i32, i32, i32
  }
  func.func @transform_6(%arg0: i32, %arg1: i32) -> (i32, i32) {
    %c0_i32 = arith.constant 0 : i32
    %c0_i32_0 = arith.constant 0 : i32
    return %arg0, %c0_i32 : i32, i32
  }
}

module attributes {stable_mosaic.version = 11 : i64} {
  func.func @epilogue_kernel(%arg0: i32, %arg1: memref<128x128xf32, #tpu.memory_space<vmem>>, %arg2: memref<128x128xf32, #tpu.memory_space<vmem>>, %arg3: memref<16x128xf32, #tpu.memory_space<vmem>>, %arg4: memref<128x512xbf16, #tpu.memory_space<vmem>>, %arg5: memref<1x512xf32, #tpu.memory_space<vmem>>, %arg6: memref<512x128xbf16, #tpu.memory_space<vmem>>, %arg7: memref<8x128xf32, #tpu.memory_space<vmem>>) attributes {dimension_semantics = [#tpu.dimension_semantics<parallel>], iteration_bounds = array<i64: 1>, scalar_prefetch = 0 : i64, scratch_operands = 0 : i64, tpu.core_type = #tpu.core_type<tc>, window_params = [{transform_indices = @transform_0, window_bounds = array<i64: 128, 128>}, {transform_indices = @transform_1, window_bounds = array<i64: 128, 128>}, {pipeline_mode = #tpu.pipeline_mode<synchronous>, transform_indices = @transform_2, window_bounds = array<i64: 16, 128>}, {pipeline_mode = #tpu.pipeline_mode<synchronous>, transform_indices = @transform_3, window_bounds = array<i64: 128, 512>}, {pipeline_mode = #tpu.pipeline_mode<synchronous>, transform_indices = @transform_4, window_bounds = array<i64: 1, 512>}, {pipeline_mode = #tpu.pipeline_mode<synchronous>, transform_indices = @transform_5, window_bounds = array<i64: 512, 128>}, {transform_indices = @transform_6, window_bounds = array<i64: 8, 128>}]} {
    %c3 = arith.constant 3 : index
    %c0 = arith.constant 0 : index
    %0 = vector.load %arg3[%c3, %c0] : memref<16x128xf32, #tpu.memory_space<vmem>>, vector<1x128xf32>
    %c4 = arith.constant 4 : index
    %c0_0 = arith.constant 0 : index
    %1 = vector.load %arg3[%c4, %c0_0] : memref<16x128xf32, #tpu.memory_space<vmem>>, vector<1x128xf32>
    %c5 = arith.constant 5 : index
    %c0_1 = arith.constant 0 : index
    %2 = vector.load %arg3[%c5, %c0_1] : memref<16x128xf32, #tpu.memory_space<vmem>>, vector<1x128xf32>
    %c6 = arith.constant 6 : index
    %c0_2 = arith.constant 0 : index
    %3 = vector.load %arg3[%c6, %c0_2] : memref<16x128xf32, #tpu.memory_space<vmem>>, vector<1x128xf32>
    %c0_3 = arith.constant 0 : index
    %c0_4 = arith.constant 0 : index
    %4 = vector.load %arg1[%c0_3, %c0_4] : memref<128x128xf32, #tpu.memory_space<vmem>>, vector<128x128xf32>
    %c0_5 = arith.constant 0 : index
    %c0_6 = arith.constant 0 : index
    %5 = vector.load %arg2[%c0_5, %c0_6] : memref<128x128xf32, #tpu.memory_space<vmem>>, vector<128x128xf32>
    %6 = arith.addf %4, %5 : vector<128x128xf32>
    %7 = vector.broadcast %0 : vector<1x128xf32> to vector<128x128xf32>
    %8 = arith.addf %6, %7 : vector<128x128xf32>
    %cst = arith.constant dense<0.000000e+00> : vector<128xf32>
    %9 = vector.multi_reduction <add>, %8, %cst [1] : vector<128x128xf32> to vector<128xf32>
    %10 = vector.shape_cast %9 : vector<128xf32> to vector<128x1xf32>
    %cst_7 = arith.constant 1.280000e+02 : f32
    %11 = vector.broadcast %cst_7 : f32 to vector<128x1xf32>
    %12 = arith.divf %10, %11 : vector<128x1xf32>
    %13 = vector.broadcast %12 : vector<128x1xf32> to vector<128x128xf32>
    %14 = arith.subf %8, %13 : vector<128x128xf32>
    %15 = arith.mulf %14, %14 : vector<128x128xf32>
    %cst_8 = arith.constant dense<0.000000e+00> : vector<128xf32>
    %16 = vector.multi_reduction <add>, %15, %cst_8 [1] : vector<128x128xf32> to vector<128xf32>
    %17 = vector.shape_cast %16 : vector<128xf32> to vector<128x1xf32>
    %cst_9 = arith.constant 1.280000e+02 : f32
    %18 = vector.broadcast %cst_9 : f32 to vector<128x1xf32>
    %19 = arith.divf %17, %18 : vector<128x1xf32>
    %20 = vector.broadcast %12 : vector<128x1xf32> to vector<128x128xf32>
    %21 = arith.subf %8, %20 : vector<128x128xf32>
    %cst_10 = arith.constant 9.99999974E-6 : f32
    %22 = vector.broadcast %cst_10 : f32 to vector<128x1xf32>
    %23 = arith.addf %19, %22 : vector<128x1xf32>
    %24 = math.rsqrt %23 : vector<128x1xf32>
    %25 = vector.broadcast %24 : vector<128x1xf32> to vector<128x128xf32>
    %26 = arith.mulf %21, %25 : vector<128x128xf32>
    %27 = vector.broadcast %1 : vector<1x128xf32> to vector<128x128xf32>
    %28 = arith.mulf %26, %27 : vector<128x128xf32>
    %29 = vector.broadcast %2 : vector<1x128xf32> to vector<128x128xf32>
    %30 = arith.addf %28, %29 : vector<128x128xf32>
    %31 = arith.truncf %30 : vector<128x128xf32> to vector<128x128xbf16>
    %c0_11 = arith.constant 0 : index
    %c0_12 = arith.constant 0 : index
    %32 = vector.load %arg4[%c0_11, %c0_12] : memref<128x512xbf16, #tpu.memory_space<vmem>>, vector<128x512xbf16>
    %cst_13 = arith.constant dense<0.000000e+00> : vector<128x512xf32>
    %33 = tpu.matmul %31, %32, %cst_13 {dimension_numbers = #tpu.dot_dimension_numbers<[1], [0], [0], [1], [0, 0, 1, 1], [], []>} : vector<128x128xbf16>, vector<128x512xbf16>, vector<128x512xf32> -> vector<128x512xf32>
    %c0_14 = arith.constant 0 : index
    %c0_15 = arith.constant 0 : index
    %34 = vector.load %arg5[%c0_14, %c0_15] : memref<1x512xf32, #tpu.memory_space<vmem>>, vector<1x512xf32>
    %35 = vector.broadcast %34 : vector<1x512xf32> to vector<128x512xf32>
    %36 = arith.addf %33, %35 : vector<128x512xf32>
    %cst_16 = arith.constant 5.000000e-01 : f32
    %37 = vector.broadcast %cst_16 : f32 to vector<128x512xf32>
    %38 = arith.mulf %37, %36 : vector<128x512xf32>
    %cst_17 = arith.constant 0.707106769 : f32
    %39 = vector.broadcast %cst_17 : f32 to vector<128x512xf32>
    %40 = arith.mulf %36, %39 : vector<128x512xf32>
    %41 = math.erf %40 : vector<128x512xf32>
    %cst_18 = arith.constant 1.000000e+00 : f32
    %42 = vector.broadcast %cst_18 : f32 to vector<128x512xf32>
    %43 = arith.addf %42, %41 : vector<128x512xf32>
    %44 = arith.mulf %38, %43 : vector<128x512xf32>
    %45 = arith.truncf %44 : vector<128x512xf32> to vector<128x512xbf16>
    %c0_19 = arith.constant 0 : index
    %c0_20 = arith.constant 0 : index
    %46 = vector.load %arg6[%c0_19, %c0_20] : memref<512x128xbf16, #tpu.memory_space<vmem>>, vector<512x128xbf16>
    %cst_21 = arith.constant dense<0.000000e+00> : vector<128x128xf32>
    %47 = tpu.matmul %45, %46, %cst_21 {dimension_numbers = #tpu.dot_dimension_numbers<[1], [0], [0], [1], [0, 0, 1, 1], [], []>} : vector<128x512xbf16>, vector<512x128xbf16>, vector<128x128xf32> -> vector<128x128xf32>
    %48 = vector.broadcast %3 : vector<1x128xf32> to vector<128x128xf32>
    %49 = arith.addf %47, %48 : vector<128x128xf32>
    %50 = arith.addf %8, %49 : vector<128x128xf32>
    %c128_i32 = arith.constant 128 : i32
    %51 = arith.muli %arg0, %c128_i32 : i32
    %52 = tpu.iota {dimensions = array<i32: 0>} : vector<128x1xi32>
    %53 = vector.broadcast %51 : i32 to vector<128x1xi32>
    %54 = arith.addi %53, %52 : vector<128x1xi32>
    %c96_i32 = arith.constant 96 : i32
    %55 = vector.broadcast %c96_i32 : i32 to vector<128x1xi32>
    %56 = arith.cmpi slt, %54, %55 : vector<128x1xi32>
    %cst_22 = arith.constant 0.000000e+00 : f32
    %57 = vector.shape_cast %56 : vector<128x1xi1> to vector<128x1xi1>
    %58 = vector.broadcast %57 : vector<128x1xi1> to vector<128x128xi1>
    %59 = vector.broadcast %cst_22 : f32 to vector<128x128xf32>
    %60 = arith.select %58, %50, %59 : vector<128x128xi1>, vector<128x128xf32>
    %cst_23 = arith.constant dense<0.000000e+00> : vector<128xf32>
    %61 = vector.multi_reduction <add>, %60, %cst_23 [0] : vector<128x128xf32> to vector<128xf32>
    %62 = vector.shape_cast %61 : vector<128xf32> to vector<1x128xf32>
    %63 = tpu.iota {dimensions = array<i32: 0>} : vector<8x128xi32>
    %c0_i32 = arith.constant 0 : i32
    %64 = vector.broadcast %c0_i32 : i32 to vector<8x128xi32>
    %65 = arith.cmpi eq, %63, %64 : vector<8x128xi32>
    %cst_24 = arith.constant 0.000000e+00 : f32
    %66 = vector.shape_cast %62 : vector<1x128xf32> to vector<1x128xf32>
    %67 = vector.broadcast %66 : vector<1x128xf32> to vector<8x128xf32>
    %68 = vector.broadcast %cst_24 : f32 to vector<8x128xf32>
    %69 = arith.select %65, %67, %68 : vector<8x128xi1>, vector<8x128xf32>
    %c0_25 = arith.constant 0 : index
    %c0_26 = arith.constant 0 : index
    %70 = vector.load %arg7[%c0_25, %c0_26] : memref<8x128xf32, #tpu.memory_space<vmem>>, vector<8x128xf32>
    tpu.vector_store %arg7[%c0_25, %c0_26], %69 {strides = array<i32>} : memref<8x128xf32, #tpu.memory_space<vmem>>, vector<8x128xf32>,
    return
  }
  func.func @transform_0(%arg0: i32) -> (i32, i32) {
    %c0_i32 = arith.constant 0 : i32
    %c0_i32_0 = arith.constant 0 : i32
    return %arg0, %c0_i32 : i32, i32
  }
  func.func @transform_1(%arg0: i32) -> (i32, i32) {
    %c0_i32 = arith.constant 0 : i32
    %c0_i32_0 = arith.constant 0 : i32
    return %arg0, %c0_i32 : i32, i32
  }
  func.func @transform_2(%arg0: i32) -> (i32, i32) {
    %c0_i32 = arith.constant 0 : i32
    %c0_i32_0 = arith.constant 0 : i32
    %c0_i32_1 = arith.constant 0 : i32
    return %c0_i32, %c0_i32_0 : i32, i32
  }
  func.func @transform_3(%arg0: i32) -> (i32, i32) {
    %c0_i32 = arith.constant 0 : i32
    %c0_i32_0 = arith.constant 0 : i32
    %c0_i32_1 = arith.constant 0 : i32
    return %c0_i32, %c0_i32_0 : i32, i32
  }
  func.func @transform_4(%arg0: i32) -> (i32, i32) {
    %c0_i32 = arith.constant 0 : i32
    %c0_i32_0 = arith.constant 0 : i32
    %c0_i32_1 = arith.constant 0 : i32
    return %c0_i32, %c0_i32_0 : i32, i32
  }
  func.func @transform_5(%arg0: i32) -> (i32, i32) {
    %c0_i32 = arith.constant 0 : i32
    %c0_i32_0 = arith.constant 0 : i32
    %c0_i32_1 = arith.constant 0 : i32
    return %c0_i32, %c0_i32_0 : i32, i32
  }
  func.func @transform_6(%arg0: i32) -> (i32, i32) {
    %c0_i32 = arith.constant 0 : i32
    %c0_i32_0 = arith.constant 0 : i32
    return %arg0, %c0_i32 : i32, i32
  }
}

</mosaic_0001>

<bundles_post_ra>
// kernel: lbmil_forward.4
= control target key start
LH: loop header
LB: loop body
LE: loop exit
PB: predicated region body
PF: predicated region fallthrough
CT: control target
= control target key end

     0   :  { %s1991_s21 = smov 0   ;;  %s1993_s22 = smov 0   ;;  %s2413_s0 = inlined_call_operand.vmem [shape: bf16[4,128,32], index: 0, kind: input, shape index: {}]   ;;  %s2414_s1 = inlined_call_operand.vmem [shape: bf16[4,128,32], index: 1, kind: input, shape index: {}]   ;;  %s2415_s2 = inlined_call_operand.vmem [shape: bf16[4,128,32], index: 2, kind: input, shape index: {}]   ;;  %s2416_s3 = inlined_call_operand.vmem [shape: bf16[4,128,128], index: 3, kind: input, shape index: {}]   ;;  %s2417_s4 = inlined_call_operand.vmem [shape: bf16[4,32,128], index: 4, kind: input, shape index: {}]   ;;  %s2418_s5 = inlined_call_operand.vmem [shape: bf16[4,128,128], index: 5, kind: output, shape index: {0}]   ;;  %s2419_s6 = inlined_call_operand.vmem [shape: f32[128,128], index: 6, kind: output, shape index: {1}]  }
   0x1   :  { %s1995_s23 = smov 0  }
   0x2 LB: > { %s26_s24 = sadd.s32 1, %s1949_s22  ;;  %p1498_p0 = scmp.ge.s32.totalorder %s1953_s23, 1  ;;  %s1953_s23 = sphi %s1995_s23, %s17_s23   ;;  %s1949_s22 = sphi %s1993_s22, %s2421_s22   ;;  %s1945_s21 = sphi %s1991_s21, %s2420_s21  }
   0x3   : > { %p27_p1 = scmp.ge.s32.totalorder %s26_s24, 4  ;;  %p283_p2 = scmp.lt.s32.totalorder %s1953_s23, 5 }
   0x5   : > { %s2423_s24 = smov (%p27_p1, %s26_s24), 0  ;;  %p284_p3 = pnand %p1498_p0, %p283_p2 }
   0x6   : > { %p351_p4 = scmp.lt.s32.totalorder (!%p284_p3), %s1945_s21, 3  ;;  %p1569_p5 = scmp.ne.s32.totalorder (!%p284_p3), %s1945_s21, 0 }
   0x7   : > { %287 = sbr.rel (%p284_p3) target bundleno = 1046 (0x416), region = 40 }
   0xc   : > { %s2013_s25 = scalar_select %p351_p4, %s1945_s21, 3  ;;  %vm530_vm0 = vcmask 261120  }
   0xe   : > { %s2016_s26 = sshll.u32 %s2013_s25, 6  ;;  %s1578_s15 = sshll.u32 %s2013_s25, 4 }
   0xf   : > { %s2022_s29 = scalar_lea.vmem %s2414_s1, %s2016_s26  ;;  %s2033_s8 = scalar_lea.vmem %s2413_s0, %s2016_s26 }
  0x10   : > { %v1841_v0 = vld [vmem:[%s2022_s29 + $0x38] sm:$0xff]   ;;  %v1842_v1 = vld [vmem:[%s2022_s29 + $0x30] sm:$0xff]   ;;  %v1843_v3 = vld [vmem:[%s2022_s29 + $0x28] sm:$0xff]   ;;  %s2074_s11 = scalar_lea.vmem %s2416_s3, %s2016_s26  ;;  %s2136_s14 = scalar_lea.vmem %s2415_s2, %s2016_s26 }
  0x11   : > { %1808 = vmatprep.subr.msk.bf16.mxu0 %vm530_vm0, %v1841_v0  ;;  %v577_v2 = vsel %vm530_vm0, %v1841_v0, 0  ;;  %v574_v4 = vsel %vm530_vm0, %v1842_v1, 0  ;;  %v1849_v5 = vld [vmem:[%s2033_s8] sm:$0xff]   ;;  %v571_v6 = vsel %vm530_vm0, %v1843_v3, 0  ;;  %v1845_v9 = vld [vmem:[%s2022_s29 + $0x18] sm:$0xff]   ;;  %v1846_v11 = vld [vmem:[%s2022_s29 + $0x10] sm:$0xff]   ;;  %s2214_s18 = scalar_lea.vmem %s2417_s4, %s1578_s15  ;;  %s2223_s25 = scalar_lea.vmem %s2418_s5, %s2016_s26 }
  0x12   : > { %1725 = vmatpush3.bf16.xpose.msra.mxu0 %v577_v2  ;;  %1740 = vmatprep.mubr.msk.bf16.mxu0 %vm530_vm0, %v1849_v5  ;;  %v1844_v7 = vld [vmem:[%s2022_s29 + $0x20] sm:$0xff]   ;;  %v565_v10 = vsel %vm530_vm0, %v1845_v9, 0  ;;  %v562_v12 = vsel %vm530_vm0, %v1846_v11, 0  ;;  %v1847_v13 = vld [vmem:[%s2022_s29 + $0x8] sm:$0xff]   ;;  %v1851_v18 = vld [vmem:[%s2033_s8 + $0x10] sm:$0xff]  }
  0x13   : > { %1809 = vmatprep.subr.msk.bf16.mxu0 %vm530_vm0, %v1842_v1  ;;  %v568_v8 = vsel %vm530_vm0, %v1844_v7, 0  ;;  %v559_v14 = vsel %vm530_vm0, %v1847_v13, 0  ;;  %v1848_v15 = vld [vmem:[%s2022_s29] sm:$0xff]   ;;  %v1850_v17 = vld [vmem:[%s2033_s8 + $0x8] sm:$0xff]   ;;  %v1852_v19 = vld [vmem:[%s2033_s8 + $0x18] sm:$0xff]  }
  0x14   : > { %v556_v16 = vsel %vm530_vm0, %v1848_v15, 0  ;;  %v1853_v20 = vld [vmem:[%s2033_s8 + $0x20] sm:$0xff]   ;;  %v1854_v21 = vld [vmem:[%s2033_s8 + $0x28] sm:$0xff]   ;;  %v1855_v22 = vld [vmem:[%s2033_s8 + $0x30] sm:$0xff]  }
  0x15   : > { %v1856_v23 = vld [vmem:[%s2033_s8 + $0x38] sm:$0xff]   ;;  %v1668_v24 = vld [vmem:[%s2074_s11 + $0x8] sm:$0xff]   ;;  %v1597_v25 = vld [vmem:[%s2074_s11] sm:$0xff]  }
  0x16   : > { %v1602_v26 = vunpack.c.l.bf16 %v1668_v24  ;;  %v1598_v29 = vunpack.c.l.bf16 %v1597_v25  ;;  %v1603_v33 = vunpack.c.h.bf16 %v1668_v24  ;;  %v1599_v37 = vunpack.c.h.bf16 %v1597_v25  ;;  %v1669_v39 = vld [vmem:[%s2074_s11 + $0x10] sm:$0xff]   ;;  %v1670_v46 = vld [vmem:[%s2074_s11 + $0x18] sm:$0xff]   ;;  %v1671_v54 = vld [vmem:[%s2074_s11 + $0x20] sm:$0xff]  }
  0x17   : > { %v1606_v44 = vunpack.c.l.bf16 %v1669_v39  ;;  %v1610_v51 = vunpack.c.l.bf16 %v1670_v46  ;;  %v1607_v52 = vunpack.c.h.bf16 %v1669_v39  ;;  %v1611_v57 = vunpack.c.h.bf16 %v1670_v46  ;;  %v1672_v62 = vld [vmem:[%s2074_s11 + $0x28] sm:$0xff]  }
  0x18   : > { %v1614_v61 = vunpack.c.l.bf16 %v1671_v54  ;;  %v1618_v2 = vunpack.c.l.bf16 %v1672_v62 }
  0x1a   : > { %1727 = vmatpush3.bf16.xpose.msra.mxu0 %v574_v4 }
  0x1b   : > { %1810 = vmatprep.subr.msk.bf16.mxu0 %vm530_vm0, %v1843_v3 }
  0x22   : > { %1729 = vmatpush3.bf16.xpose.msra.mxu0 %v571_v6  ;;  %v1615_v6 = vunpack.c.h.bf16 %v1671_v54 }
  0x23   : > { %1811 = vmatprep.subr.msk.bf16.mxu0 %vm530_vm0, %v1844_v7 }
  0x2a   : > { %1731 = vmatpush3.bf16.xpose.msra.mxu0 %v568_v8  ;;  %v1673_v8 = vld [vmem:[%s2074_s11 + $0x30] sm:$0xff]  }
  0x2b   : > { %1812 = vmatprep.subr.msk.bf16.mxu0 %vm530_vm0, %v1845_v9  ;;  %v1623_v24 = vunpack.c.h.bf16 %v1673_v8 }
  0x32   : > { %1733 = vmatpush3.bf16.xpose.msra.mxu0 %v565_v10 }
  0x33   : > { %1813 = vmatprep.subr.msk.bf16.mxu0 %vm530_vm0, %v1846_v11  ;;  %v1619_v11 = vunpack.c.h.bf16 %v1672_v62 }
  0x3a   : > { %1735 = vmatpush3.bf16.xpose.msra.mxu0 %v562_v12 }
  0x3b   : > { %1814 = vmatprep.subr.msk.bf16.mxu0 %vm530_vm0, %v1847_v13 }
  0x42   : > { %1737 = vmatpush3.bf16.xpose.msra.mxu0 %v559_v14 }
  0x43   : > { %1815 = vmatprep.subr.msk.bf16.mxu0 %vm530_vm0, %v1848_v15  ;;  %v1622_v15 = vunpack.c.l.bf16 %v1673_v8 }
  0x4a   : > { %1739 = vmatpush3.bf16.xpose.msra.mxu0 %v556_v16  ;;  %v1674_v16 = vld [vmem:[%s2074_s11 + $0x38] sm:$0xff]  }
  0x51   : > { %1741 = vmatmul.mubr.msk.bf16.vlgmr.msra.gmra.mxu0 %vm530_vm0, %v1850_v17 }
  0x52   : > { %1744 = vmatprep.mubr.msk.bf16.mxu0 %vm530_vm0, %v1851_v18 }
  0x59   : > { %1745 = vmatmul.mubr.msk.bf16.gmra.mxu0 %vm530_vm0, %v1852_v19 }
  0x5a   : > { %1748 = vmatprep.mubr.msk.bf16.mxu0 %vm530_vm0, %v1853_v20  ;;  %v1626_v20 = vunpack.c.l.bf16 %v1674_v16 }
  0x61   : > { %1749 = vmatmul.mubr.msk.bf16.gmra.mxu0 %vm530_vm0, %v1854_v21 }
  0x62   : > { %1752 = vmatprep.mubr.msk.bf16.mxu0 %vm530_vm0, %v1855_v22 }
  0x69   : > { %1753 = vmatmul.mubr.msk.bf16.gmra.mxu0 %vm530_vm0, %v1856_v23 }
 0x111   : > { %v1742_v27 = vpop.f32.mrf.mxu0 }
 0x112   : > { %v678_v28 = vmul.f32 0.17677669, %v1742_v27 }
 0x113   : > { %v613_v30 = vpop.f32.mrf.mxu0 }
 0x114   : > { %v676_v31 = vmul.f32 0.17677669, %v613_v30  ;;  %v2078_v32 = vadd.f32 %v1602_v26, %v678_v28  ;;  %v1627_v30 = vunpack.c.h.bf16 %v1674_v16 }
 0x115   : > { %v1743_v34 = vpop.f32.mrf.mxu0 }
 0x116   : > { %v679_v35 = vmul.f32 0.17677669, %v1743_v34  ;;  %744 = vmax.xlane.f32.xlu1 %v2078_v32  ;;  %v2081_v36 = vadd.f32 %v1598_v29, %v676_v31  ;;  %v1858_v34 = vld [vmem:[%s2136_s14 + $0x30] sm:$0xff]  }
 0x117   : > { %v616_v38 = vpop.f32.mrf.mxu0 }
 0x118   : > { %v677_v40 = vmul.f32 0.17677669, %v616_v38  ;;  %740 = vmax.xlane.f32.xlu0 %v2081_v36  ;;  %v2085_v41 = vadd.f32 %v1603_v33, %v679_v35  ;;  %v1857_v33 = vld [vmem:[%s2136_s14 + $0x38] sm:$0xff]  }
 0x119   : > { %v1746_v42 = vpop.f32.mrf.mxu0  ;;  %1756 = vmatprep.subr.bf16.mxu1 %v1857_v33 }
 0x11a   : > { %746 = vmax.xlane.f32.xlu1 %v2085_v41  ;;  %v2088_v43 = vadd.f32 %v1599_v37, %v677_v40  ;;  %v682_v49 = vmul.f32 0.17677669, %v1746_v42  ;;  %1757 = vmatpush3.bf16.msra.mxu1 %v1857_v33 }
 0x11b   : > { %v629_v45 = vpop.f32.mrf.mxu0  ;;  %1758 = vmatprep.subr.bf16.mxu1 %v1858_v34 }
 0x11c   : > { %v680_v47 = vmul.f32 0.17677669, %v629_v45  ;;  %742 = vmax.xlane.f32.xlu0 %v2088_v43  ;;  %v2096_v59 = vadd.f32 %v1610_v51, %v682_v49 }
 0x11d   : > { %v1747_v48 = vpop.f32.mrf.mxu0 }
 0x11e   : > { %v2092_v50 = vadd.f32 %v1606_v44, %v680_v47  ;;  %v683_v58 = vmul.f32 0.17677669, %v1747_v48  ;;  %1759 = vmatpush3.bf16.msra.mxu1 %v1858_v34  ;;  %v1862_v34 = vld [vmem:[%s2136_s14 + $0x10] sm:$0xff]  }
 0x11f   : > { %v632_v53 = vpop.f32.mrf.mxu0 }
 0x120   : > { %v681_v55 = vmul.f32 0.17677669, %v632_v53  ;;  %748 = vmax.xlane.f32.xlu0 %v2092_v50  ;;  %v2103_v4 = vadd.f32 %v1611_v57, %v683_v58 }
 0x121   : > { %v1750_v56 = vpop.f32.mrf.mxu0 }
 0x122   : > { %v2098_v60 = vadd.f32 %v1607_v52, %v681_v55  ;;  %v686_v3 = vmul.f32 0.17677669, %v1750_v56 }
 0x123   : > { %v645_v63 = vpop.f32.mrf.mxu0 }
 0x124   : > { %v684_v0 = vmul.f32 0.17677669, %v645_v63  ;;  %752 = vmax.xlane.f32.xlu0 %v2096_v59  ;;  %750 = vmax.xlane.f32.xlu1 %v2098_v60  ;;  %v2110_v13 = vadd.f32 %v1618_v2, %v686_v3 }
 0x125   : > { %v1751_v1 = vpop.f32.mrf.mxu0 }
 0x126   : > { %v2105_v5 = vadd.f32 %v1614_v61, %v684_v0  ;;  %v687_v12 = vmul.f32 0.17677669, %v1751_v1 }
 0x127   : > { %v648_v7 = vpop.f32.mrf.mxu0 }
 0x128   : > { %v685_v9 = vmul.f32 0.17677669, %v648_v7  ;;  %754 = vmax.xlane.f32.xlu1 %v2103_v4  ;;  %756 = vmax.xlane.f32.xlu0 %v2105_v5  ;;  %v2117_v22 = vadd.f32 %v1619_v11, %v687_v12 }
 0x129   : > { %v1754_v10 = vpop.f32.mrf.mxu0 }
 0x12a   : > { %v2112_v14 = vadd.f32 %v1615_v6, %v685_v9  ;;  %v690_v21 = vmul.f32 0.17677669, %v1754_v10 }
 0x12b   : > { %v661_v17 = vpop.f32.mrf.mxu0 }
 0x12c   : > { %v688_v18 = vmul.f32 0.17677669, %v661_v17  ;;  %760 = vmax.xlane.f32.xlu0 %v2110_v13  ;;  %758 = vmax.xlane.f32.xlu1 %v2112_v14  ;;  %v2123_v28 = vadd.f32 %v1626_v20, %v690_v21 }
 0x12d   : > { %v1755_v19 = vpop.f32.mrf.mxu0 }
 0x12e   : > { %v2119_v23 = vadd.f32 %v1622_v15, %v688_v18  ;;  %v691_v27 = vmul.f32 0.17677669, %v1755_v19  ;;  %v1859_v18 = vld [vmem:[%s2136_s14 + $0x28] sm:$0xff]  }
 0x12f   : > { %v664_v25 = vpop.f32.mrf.mxu0  ;;  %1760 = vmatprep.subr.bf16.mxu1 %v1859_v18 }
 0x130   : > { %v689_v26 = vmul.f32 0.17677669, %v664_v25  ;;  %762 = vmax.xlane.f32.xlu1 %v2117_v22  ;;  %764 = vmax.xlane.f32.xlu0 %v2119_v23  ;;  %v2129_v31 = vadd.f32 %v1627_v30, %v691_v27  ;;  %v1861_v30 = vld [vmem:[%s2136_s14 + $0x18] sm:$0xff]  }
 0x131   : > { %1761 = vmatpush3.bf16.msra.mxu1 %v1859_v18 }
 0x132   : > { %v2125_v29 = vadd.f32 %v1623_v24, %v689_v26  ;;  %v1860_v26 = vld [vmem:[%s2136_s14 + $0x20] sm:$0xff]  }
 0x133   : > { %1762 = vmatprep.subr.bf16.mxu1 %v1860_v26 }
 0x134   : > { %768 = vmax.xlane.f32.xlu0 %v2123_v28  ;;  %766 = vmax.xlane.f32.xlu1 %v2125_v29 }
 0x135   : > { %1763 = vmatpush3.bf16.msra.mxu1 %v1860_v26 }
 0x136   : > { %1764 = vmatprep.subr.bf16.mxu1 %v1861_v30 }
 0x138   : > { %770 = vmax.xlane.f32.xlu1 %v2129_v31 }
 0x139   : > { %1765 = vmatpush3.bf16.msra.mxu1 %v1861_v30 }
 0x13a   : > { %1766 = vmatprep.subr.bf16.mxu1 %v1862_v34 }
 0x13d   : > { %1767 = vmatpush3.bf16.msra.mxu1 %v1862_v34 }
 0x19f   : > { %v745_v35 = vpop.xlane.xlu1 %744 }
 0x1a0   : > { %v774_v37 = vsub.f32 %v2078_v32, %v745_v35 }
 0x1a1   : > { %v741_v38 = vpop.xlane.xlu0 %740 }
 0x1a2   : > { %v772_v39 = vsub.f32 %v2081_v36, %v741_v38  ;;  %v792_v44 = vmul.f32 1.442695, %v774_v37 }
 0x1a3   : > { %v747_v40 = vpop.xlane.xlu1 %746 }
 0x1a4   : > { %v788_v42 = vmul.f32 1.442695, %v772_v39  ;;  %v775_v45 = vsub.f32 %v2085_v41, %v747_v40  ;;  %v1863_v39 = vld [vmem:[%s2136_s14 + $0x8] sm:$0xff]  }
 0x1a5   : > { %v743_v46 = vpop.xlane.xlu0 %742  ;;  %1768 = vmatprep.subr.bf16.mxu1 %v1863_v39 }
 0x1a6   : > { %1867 = vpow2.f32 %v788_v42  ;;  %v773_v47 = vsub.f32 %v2088_v43, %v743_v46  ;;  %v794_v49 = vmul.f32 1.442695, %v775_v45  ;;  %1769 = vmatpush3.bf16.msra.mxu1 %v1863_v39  ;;  %v1864_v42 = vld [vmem:[%s2136_s14] sm:$0xff]  }
 0x1a7   : > { %1869 = vpow2.f32 %v792_v44  ;;  %1770 = vmatprep.subr.bf16.mxu1 %v1864_v42  ;;  %v1865_v44 = vld [vmem:[%s2214_s18 + $0x8] sm:$0xff]  }
 0x1a8   : > { %v790_v48 = vmul.f32 1.442695, %v773_v47 }
 0x1a9   : > { %v749_v51 = vpop.xlane.xlu0 %748 }
 0x1aa   : > { %1871 = vpow2.f32 %v790_v48  ;;  %v776_v52 = vsub.f32 %v2092_v50, %v749_v51  ;;  %1771 = vmatpush3.bf16.msra.mxu1 %v1864_v42 }
 0x1ab   : > { %1873 = vpow2.f32 %v794_v49  ;;  %1788 = vmatprep.subr.bf16.mxu1 %v1865_v44 }
 0x1ac   : > { %v796_v32 = vmul.f32 1.442695, %v776_v52 }
 0x1ad   : > { %v753_v53 = vpop.xlane.xlu0 %752  ;;  %v751_v36 = vpop.xlane.xlu1 %750 }
 0x1ae   : > { %1875 = vpow2.f32 %v796_v32  ;;  %v778_v54 = vsub.f32 %v2096_v59, %v753_v53  ;;  %v777_v41 = vsub.f32 %v2098_v60, %v751_v36 }
 0x1b0   : > { %v800_v55 = vmul.f32 1.442695, %v778_v54  ;;  %v798_v56 = vmul.f32 1.442695, %v777_v41 }
 0x1b1   : > { %v755_v57 = vpop.xlane.xlu1 %754  ;;  %v757_v43 = vpop.xlane.xlu0 %756 }
 0x1b2   : > { %1877 = vpow2.f32 %v800_v55  ;;  %v779_v58 = vsub.f32 %v2103_v4, %v755_v57  ;;  %v780_v61 = vsub.f32 %v2105_v5, %v757_v43 }
 0x1b3   : > { %v2149_v62 = vpop.eup %1867  ;;  %1879 = vpow2.f32 %v798_v56 }
 0x1b4   : > { %v802_v50 = vmul.f32 1.442695, %v779_v58  ;;  %v804_v63 = vmul.f32 1.442695, %v780_v61  ;;  %820 = vadd.xlane.f32.xlu0 %v2149_v62  ;;  %v2152_v1 = vpop.eup %1869 }
 0x1b5   : > { %v761_v0 = vpop.xlane.xlu0 %760  ;;  %v759_v59 = vpop.xlane.xlu1 %758 }
 0x1b6   : > { %1881 = vpow2.f32 %v802_v50  ;;  %v782_v60 = vsub.f32 %v2110_v13, %v761_v0  ;;  %v781_v2 = vsub.f32 %v2112_v14, %v759_v59 }
 0x1b7   : > { %v2156_v3 = vpop.eup %1871  ;;  %1883 = vpow2.f32 %v804_v63 }
 0x1b8   : > { %v808_v4 = vmul.f32 1.442695, %v782_v60  ;;  %v806_v5 = vmul.f32 1.442695, %v781_v2  ;;  %824 = vadd.xlane.f32.xlu0 %v2152_v1  ;;  %822 = vadd.xlane.f32.xlu1 %v2156_v3  ;;  %v2160_v8 = vpop.eup %1873  ;;  %v1866_v2 = vld [vmem:[%s2214_s18] sm:$0xff]  }
 0x1b9   : > { %v763_v6 = vpop.xlane.xlu1 %762  ;;  %v765_v7 = vpop.xlane.xlu0 %764 }
 0x1ba   : > { %1885 = vpow2.f32 %v808_v4  ;;  %v783_v9 = vsub.f32 %v2117_v22, %v763_v6  ;;  %v784_v10 = vsub.f32 %v2119_v23, %v765_v7 }
 0x1bb   : > { %v2164_v11 = vpop.eup %1875  ;;  %1887 = vpow2.f32 %v806_v5 }
 0x1bc   : > { %v810_v12 = vmul.f32 1.442695, %v783_v9  ;;  %v812_v13 = vmul.f32 1.442695, %v784_v10  ;;  %828 = vadd.xlane.f32.xlu0 %v2164_v11  ;;  %826 = vadd.xlane.f32.xlu1 %v2160_v8 }
 0x1bd   : > { %v769_v14 = vpop.xlane.xlu0 %768  ;;  %v767_v15 = vpop.xlane.xlu1 %766 }
 0x1be   : > { %1889 = vpow2.f32 %v810_v12  ;;  %v786_v16 = vsub.f32 %v2123_v28, %v769_v14  ;;  %v785_v17 = vsub.f32 %v2125_v29, %v767_v15 }
 0x1bf   : > { %v2171_v19 = vpop.eup %1877  ;;  %1891 = vpow2.f32 %v812_v13 }
 0x1c0   : > { %v2173_v20 = vpop.eup %1879  ;;  %v816_v21 = vmul.f32 1.442695, %v786_v16  ;;  %v814_v22 = vmul.f32 1.442695, %v785_v17  ;;  %832 = vadd.xlane.f32.xlu0 %v2171_v19 }
 0x1c1   : > { %830 = vadd.xlane.f32.xlu1 %v2173_v20  ;;  %v771_v23 = vpop.xlane.xlu1 %770 }
 0x1c2   : > { %1893 = vpow2.f32 %v816_v21  ;;  %v787_v24 = vsub.f32 %v2129_v31, %v771_v23 }
 0x1c3   : > { %v2178_v25 = vpop.eup %1881  ;;  %1895 = vpow2.f32 %v814_v22 }
 0x1c4   : > { %v2181_v27 = vpop.eup %1883  ;;  %v818_v28 = vmul.f32 1.442695, %v787_v24 }
 0x1c5   : > { %836 = vadd.xlane.f32.xlu0 %v2181_v27  ;;  %834 = vadd.xlane.f32.xlu1 %v2178_v25 }
 0x1c6   : > { %1897 = vpow2.f32 %v818_v28 }
 0x1c7   : > { %v2185_v29 = vpop.eup %1885 }
 0x1c8   : > { %v2188_v31 = vpop.eup %1887 }
 0x1c9   : > { %840 = vadd.xlane.f32.xlu0 %v2185_v29  ;;  %838 = vadd.xlane.f32.xlu1 %v2188_v31 }
 0x1cb   : > { %v2192_v33 = vpop.eup %1889 }
 0x1cc   : > { %v2195_v35 = vpop.eup %1891 }
 0x1cd   : > { %844 = vadd.xlane.f32.xlu0 %v2195_v35  ;;  %842 = vadd.xlane.f32.xlu1 %v2192_v33 }
 0x1cf   : > { %v2199_v37 = vpop.eup %1893 }
 0x1d0   : > { %v2201_v38 = vpop.eup %1895 }
 0x1d1   : > { %848 = vadd.xlane.f32.xlu0 %v2199_v37  ;;  %846 = vadd.xlane.f32.xlu1 %v2201_v38 }
 0x1d3   : > { %v2206_v40 = vpop.eup %1897 }
 0x1d5   : > { %850 = vadd.xlane.f32.xlu1 %v2206_v40 }
 0x23d   : > { %v821_v45 = vpop.xlane.xlu0 %820 }
 0x23e   : > { %1899 = vrcp.f32 %v821_v45 }
 0x241   : > { %v825_v46 = vpop.xlane.xlu0 %824  ;;  %v823_v47 = vpop.xlane.xlu1 %822 }
 0x242   : > { %1901 = vrcp.f32 %v823_v47 }
 0x243   : > { %1903 = vrcp.f32 %v825_v46 }
 0x245   : > { %v829_v48 = vpop.xlane.xlu0 %828  ;;  %v827_v49 = vpop.xlane.xlu1 %826 }
 0x246   : > { %1905 = vrcp.f32 %v827_v49 }
 0x247   : > { %1907 = vrcp.f32 %v829_v48 }
 0x249   : > { %v833_v51 = vpop.xlane.xlu0 %832 }
 0x24a   : > { %v831_v52 = vpop.xlane.xlu1 %830 }
 0x24b   : > { %1909 = vrcp.f32 %v831_v52  ;;  %v1900_v32 = vpop.eup %1899 }
 0x24c   : > { %1911 = vrcp.f32 %v833_v51  ;;  %v868_v41 = vmul.f32 %v1900_v32, %v2149_v62 }
 0x24e   : > { %v837_v53 = vpop.xlane.xlu0 %836  ;;  %v835_v36 = vpop.xlane.xlu1 %834 }
 0x24f   : > { %v1902_v54 = vpop.eup %1901  ;;  %1913 = vrcp.f32 %v835_v36 }
 0x250   : > { %v869_v55 = vmul.f32 %v1902_v54, %v2156_v3  ;;  %v1904_v56 = vpop.eup %1903  ;;  %1915 = vrcp.f32 %v837_v53 }
 0x251   : > { %v870_v62 = vmul.f32 %v1904_v56, %v2152_v1 }
 0x252   : > { %v841_v57 = vpop.xlane.xlu0 %840  ;;  %v839_v43 = vpop.xlane.xlu1 %838  ;;  %v884_v58 = vpack.c.bf16 %v869_v55, %v868_v41 }
 0x253   : > { %v1906_v61 = vpop.eup %1905  ;;  %1917 = vrcp.f32 %v839_v43 }
 0x254   : > { %1632 = vst [vmem:[%s2223_s25] sm:$0xff] %v884_v58   ;;  %1772 = vmatprep.mubr.bf16.mxu1 %v884_v58  ;;  %v871_v50 = vmul.f32 %v1906_v61, %v2160_v8  ;;  %v1908_v63 = vpop.eup %1907  ;;  %1919 = vrcp.f32 %v841_v57 }
 0x255   : > { %v872_v4 = vmul.f32 %v1908_v63, %v2164_v11 }
 0x256   : > { %v845_v0 = vpop.xlane.xlu0 %844  ;;  %v843_v59 = vpop.xlane.xlu1 %842  ;;  %v885_v60 = vpack.c.bf16 %v871_v50, %v870_v62 }
 0x257   : > { %1921 = vrcp.f32 %v843_v59 }
 0x258   : > { %v1910_v3 = vpop.eup %1909  ;;  %1675 = vst [vmem:[%s2223_s25 + $0x8] sm:$0xff] %v885_v60   ;;  %1773 = vmatmul.mubr.bf16.vlgmr.msra.gmra.mxu1 %v885_v60  ;;  %1923 = vrcp.f32 %v845_v0 }
 0x259   : > { %v873_v5 = vmul.f32 %v1910_v3, %v2173_v20  ;;  %1789 = vmatpush3.bf16.msra.mxu1 %v1865_v44  ;;  %v1912_v7 = vpop.eup %1911 }
 0x25a   : > { %v849_v6 = vpop.xlane.xlu0 %848  ;;  %v847_v1 = vpop.xlane.xlu1 %846  ;;  %1790 = vmatprep.subr.bf16.mxu1 %v1866_v2  ;;  %v874_v12 = vmul.f32 %v1912_v7, %v2171_v19 }
 0x25b   : > { %v886_v8 = vpack.c.bf16 %v873_v5, %v872_v4  ;;  %1925 = vrcp.f32 %v847_v1 }
 0x25c   : > { %v1914_v9 = vpop.eup %1913  ;;  %1927 = vrcp.f32 %v849_v6 }
 0x25d   : > { %1676 = vst [vmem:[%s2223_s25 + $0x10] sm:$0xff] %v886_v8   ;;  %1776 = vmatprep.mubr.bf16.mxu1 %v886_v8  ;;  %v875_v11 = vmul.f32 %v1914_v9, %v2178_v25  ;;  %1791 = vmatpush3.bf16.msra.mxu1 %v1866_v2  ;;  %v1916_v13 = vpop.eup %1915 }
 0x25e   : > { %v851_v10 = vpop.xlane.xlu1 %850  ;;  %v876_v16 = vmul.f32 %v1916_v13, %v2181_v27 }
 0x25f   : > { %1929 = vrcp.f32 %v851_v10  ;;  %v887_v14 = vpack.c.bf16 %v875_v11, %v874_v12 }
 0x260   : > { %v1918_v15 = vpop.eup %1917 }
 0x261   : > { %1677 = vst [vmem:[%s2223_s25 + $0x18] sm:$0xff] %v887_v14   ;;  %1777 = vmatmul.mubr.bf16.gmra.mxu1 %v887_v14  ;;  %v877_v17 = vmul.f32 %v1918_v15, %v2188_v31  ;;  %v1920_v18 = vpop.eup %1919 }
 0x262   : > { %v878_v19 = vmul.f32 %v1920_v18, %v2185_v29 }
 0x263   : > { %v888_v20 = vpack.c.bf16 %v877_v17, %v876_v16 }
 0x264   : > { %v1922_v21 = vpop.eup %1921 }
 0x265   : > { %1678 = vst [vmem:[%s2223_s25 + $0x20] sm:$0xff] %v888_v20   ;;  %1780 = vmatprep.mubr.bf16.mxu1 %v888_v20  ;;  %v879_v22 = vmul.f32 %v1922_v21, %v2192_v33  ;;  %v1924_v23 = vpop.eup %1923 }
 0x266   : > { %v880_v27 = vmul.f32 %v1924_v23, %v2195_v35 }
 0x267   : > { %v889_v24 = vpack.c.bf16 %v879_v22, %v878_v19 }
 0x268   : > { %v1926_v25 = vpop.eup %1925 }
 0x269   : > { %v1928_v26 = vpop.eup %1927  ;;  %1679 = vst [vmem:[%s2223_s25 + $0x28] sm:$0xff] %v889_v24   ;;  %1781 = vmatmul.mubr.bf16.gmra.mxu1 %v889_v24  ;;  %v881_v28 = vmul.f32 %v1926_v25, %v2201_v38 }
 0x26a   : > { %v882_v34 = vmul.f32 %v1928_v26, %v2199_v37 }
 0x26b   : > { %v890_v31 = vpack.c.bf16 %v881_v28, %v880_v27 }
 0x26c   : > { %v1930_v30 = vpop.eup %1929 }
 0x26d   : > { %v883_v39 = vmul.f32 %v1930_v30, %v2206_v40  ;;  %1680 = vst [vmem:[%s2223_s25 + $0x30] sm:$0xff] %v890_v31   ;;  %1784 = vmatprep.mubr.bf16.mxu1 %v890_v31 }
 0x26f   : > { %v891_v29 = vpack.c.bf16 %v883_v39, %v882_v34 }
 0x271   : > { %1681 = vst [vmem:[%s2223_s25 + $0x38] sm:$0xff] %v891_v29   ;;  %1785 = vmatmul.mubr.bf16.gmra.mxu1 %v891_v29 }
 0x318   : > { %v1774_v33 = vpop.f32.mrf.mxu1 }
 0x31a   : > { %v1046_v42 = vpop.f32.mrf.mxu1 }
 0x31c   : > { %v1775_v44 = vpop.f32.mrf.mxu1 }
 0x31d   : > { %v1110_v47 = vpack.c.bf16 %v1775_v44, %v1774_v33 }
 0x31e   : > { %v1049_v45 = vpop.f32.mrf.mxu1 }
 0x31f   : > { %v1109_v46 = vpack.c.bf16 %v1049_v45, %v1046_v42 }
 0x321   : > { %v1778_v35 = vpop.f32.mrf.mxu1  ;;  %1792 = vmatprep.mubr.msk.bf16.mxu1 %vm530_vm0, %v1109_v46 }
 0x322   : > { %1793 = vmatmul.mubr.msk.bf16.vlgmr.msra.gmra.mxu1 %vm530_vm0, %v1110_v47 }
 0x323   : > { %v1062_v38 = vpop.f32.mrf.mxu1 }
 0x325   : > { %v1779_v37 = vpop.f32.mrf.mxu1 }
 0x326   : > { %v1112_v49 = vpack.c.bf16 %v1779_v37, %v1778_v35 }
 0x327   : > { %v1065_v48 = vpop.f32.mrf.mxu1 }
 0x328   : > { %v1111_v40 = vpack.c.bf16 %v1065_v48, %v1062_v38 }
 0x329   : > { %v1782_v51 = vpop.f32.mrf.mxu1 }
 0x32a   : > { %1796 = vmatprep.mubr.msk.bf16.mxu1 %vm530_vm0, %v1111_v40 }
 0x32b   : > { %v1078_v52 = vpop.f32.mrf.mxu1  ;;  %1797 = vmatmul.mubr.msk.bf16.gmra.mxu1 %vm530_vm0, %v1112_v49 }
 0x32d   : > { %v1783_v32 = vpop.f32.mrf.mxu1 }
 0x32e   : > { %v1114_v54 = vpack.c.bf16 %v1783_v32, %v1782_v51 }
 0x32f   : > { %v1081_v53 = vpop.f32.mrf.mxu1 }
 0x330   : > { %v1113_v36 = vpack.c.bf16 %v1081_v53, %v1078_v52 }
 0x331   : > { %v1786_v41 = vpop.f32.mrf.mxu1 }
 0x332   : > { %1800 = vmatprep.mubr.msk.bf16.mxu1 %vm530_vm0, %v1113_v36 }
 0x333   : > { %v1094_v55 = vpop.f32.mrf.mxu1  ;;  %1801 = vmatmul.mubr.msk.bf16.gmra.mxu1 %vm530_vm0, %v1114_v54 }
 0x335   : > { %v1787_v56 = vpop.f32.mrf.mxu1 }
 0x336   : > { %v1116_v58 = vpack.c.bf16 %v1787_v56, %v1786_v41 }
 0x337   : > { %v1097_v57 = vpop.f32.mrf.mxu1 }
 0x338   : > { %v1115_v43 = vpack.c.bf16 %v1097_v57, %v1094_v55 }
 0x33a   : > { %1804 = vmatprep.mubr.msk.bf16.mxu1 %vm530_vm0, %v1115_v43 }
 0x33b   : > { %1805 = vmatmul.mubr.msk.bf16.gmra.mxu1 %vm530_vm0, %v1116_v58 }
 0x3e2   : > { %v1794_v61 = vpop.f32.mrf.mxu1 }
 0x3e4   : > { %v1191_v62 = vpop.f32.mrf.mxu1 }
 0x3e6   : > { %v1795_v50 = vpop.f32.mrf.mxu1 }
 0x3e8   : > { %v1194_v63 = vpop.f32.mrf.mxu1 }
 0x3eb   : > { %v1798_v0 = vpop.f32.mrf.mxu1 }
 0x3ed   : > { %v1207_v59 = vpop.f32.mrf.mxu1 }
 0x3ef   : > { %v1799_v60 = vpop.f32.mrf.mxu1 }
 0x3f1   : > { %v1210_v2 = vpop.f32.mrf.mxu1 }
 0x3f3   : > { %v1802_v3 = vpop.f32.mrf.mxu1 }
 0x3f5   : > { %v1223_v4 = vpop.f32.mrf.mxu1 }
 0x3f7   : > { %v1803_v5 = vpop.f32.mrf.mxu1 }
 0x3f9   : > { %v1226_v6 = vpop.f32.mrf.mxu1 }
 0x3fb   : > { %v1806_v1 = vpop.f32.mrf.mxu1 }
 0x3fd   : > { %v1239_v7 = vpop.f32.mrf.mxu1  ;;  %1257 = sbr.rel (%p1569_p5) target bundleno = 1035 (0x40b), region = 44 }
 0x3ff   : > { %v2256_v8 = vpop.f32.mrf.mxu1 }
 0x401   : > { %v1242_v9 = vpop.f32.mrf.mxu1 }
 0x402   : > { %v1955_v10 = vmov 0.0  }
 0x403   : > { %1258 = vst [vmem:[%s2419_s6] sm:$0xff] %v1955_v10  ;;  %1259 = vst [vmem:[%s2419_s6 + $0x8] sm:$0xff] %v1955_v10 }
 0x404   : > { %1260 = vst [vmem:[%s2419_s6 + $0x10] sm:$0xff] %v1955_v10  ;;  %1261 = vst [vmem:[%s2419_s6 + $0x18] sm:$0xff] %v1955_v10 }
 0x405   : > { %1262 = vst [vmem:[%s2419_s6 + $0x20] sm:$0xff] %v1955_v10  ;;  %1263 = vst [vmem:[%s2419_s6 + $0x28] sm:$0xff] %v1955_v10 }
 0x406   : > { %1264 = vst [vmem:[%s2419_s6 + $0x30] sm:$0xff] %v1955_v10  ;;  %1265 = vst [vmem:[%s2419_s6 + $0x38] sm:$0xff] %v1955_v10 }
 0x407   : > { %1266 = vst [vmem:[%s2419_s6 + $0x40] sm:$0xff] %v1955_v10  ;;  %1267 = vst [vmem:[%s2419_s6 + $0x48] sm:$0xff] %v1955_v10 }
 0x408   : > { %1268 = vst [vmem:[%s2419_s6 + $0x50] sm:$0xff] %v1955_v10  ;;  %1269 = vst [vmem:[%s2419_s6 + $0x58] sm:$0xff] %v1955_v10 }
 0x409   : > { %1270 = vst [vmem:[%s2419_s6 + $0x60] sm:$0xff] %v1955_v10  ;;  %1271 = vst [vmem:[%s2419_s6 + $0x68] sm:$0xff] %v1955_v10 }
 0x40a   : > { %1272 = vst [vmem:[%s2419_s6 + $0x70] sm:$0xff] %v1955_v10  ;;  %1273 = vst [vmem:[%s2419_s6 + $0x78] sm:$0xff] %v1955_v10 }
 0x40b PF: > { %v1274_v12 = vld [vmem:[%s2419_s6] sm:$0xff]  ;;  %v1275_v11 = vld [vmem:[%s2419_s6 + $0x8] sm:$0xff]  ;;  %v1276_v13 = vld [vmem:[%s2419_s6 + $0x10] sm:$0xff] }
 0x40c   : > { %v1290_v14 = vadd.f32 %v1274_v12, %v1191_v62  ;;  %v1291_v15 = vadd.f32 %v1275_v11, %v1194_v63  ;;  %v1292_v16 = vadd.f32 %v1794_v61, %v1276_v13  ;;  %v1277_v17 = vld [vmem:[%s2419_s6 + $0x18] sm:$0xff]  ;;  %v1278_v18 = vld [vmem:[%s2419_s6 + $0x20] sm:$0xff]  ;;  %v1279_v20 = vld [vmem:[%s2419_s6 + $0x28] sm:$0xff] }
 0x40d   : > { %v1293_v21 = vadd.f32 %v1795_v50, %v1277_v17  ;;  %v1294_v19 = vadd.f32 %v1278_v18, %v1207_v59  ;;  %v1295_v22 = vadd.f32 %v1279_v20, %v1210_v2  ;;  %v1280_v23 = vld [vmem:[%s2419_s6 + $0x30] sm:$0xff]  ;;  %v1281_v24 = vld [vmem:[%s2419_s6 + $0x38] sm:$0xff] }
 0x40e   : > { %v1282_v25 = vld [vmem:[%s2419_s6 + $0x40] sm:$0xff]  ;;  %1306 = vst [vmem:[%s2419_s6] sm:$0xff] %v1290_v14  ;;  %1307 = vst [vmem:[%s2419_s6 + $0x8] sm:$0xff] %v1291_v15  ;;  %v1296_v26 = vadd.f32 %v1798_v0, %v1280_v23  ;;  %v1297_v27 = vadd.f32 %v1799_v60, %v1281_v24  ;;  %v1283_v30 = vld [vmem:[%s2419_s6 + $0x48] sm:$0xff] }
 0x40f   : > { %1308 = vst [vmem:[%s2419_s6 + $0x10] sm:$0xff] %v1292_v16  ;;  %v1298_v28 = vadd.f32 %v1282_v25, %v1223_v4  ;;  %v1284_v31 = vld [vmem:[%s2419_s6 + $0x50] sm:$0xff]  ;;  %v1285_v34 = vld [vmem:[%s2419_s6 + $0x58] sm:$0xff]  ;;  %1309 = vst [vmem:[%s2419_s6 + $0x18] sm:$0xff] %v1293_v21  ;;  %v1299_v39 = vadd.f32 %v1283_v30, %v1226_v6 }
 0x410   : > { %1310 = vst [vmem:[%s2419_s6 + $0x20] sm:$0xff] %v1294_v19  ;;  %1311 = vst [vmem:[%s2419_s6 + $0x28] sm:$0xff] %v1295_v22  ;;  %v1300_v29 = vadd.f32 %v1802_v3, %v1284_v31  ;;  %v1301_v33 = vadd.f32 %v1803_v5, %v1285_v34  ;;  %v1286_v42 = vld [vmem:[%s2419_s6 + $0x60] sm:$0xff]  ;;  %v1287_v44 = vld [vmem:[%s2419_s6 + $0x68] sm:$0xff] }
 0x411   : > { %v1288_v45 = vld [vmem:[%s2419_s6 + $0x70] sm:$0xff]  ;;  %1312 = vst [vmem:[%s2419_s6 + $0x30] sm:$0xff] %v1296_v26  ;;  %1313 = vst [vmem:[%s2419_s6 + $0x38] sm:$0xff] %v1297_v27  ;;  %v1302_v46 = vadd.f32 %v1286_v42, %v1239_v7  ;;  %v1303_v47 = vadd.f32 %v1287_v44, %v1242_v9  ;;  %v1289_v38 = vld [vmem:[%s2419_s6 + $0x78] sm:$0xff] }
 0x412   : > { %1314 = vst [vmem:[%s2419_s6 + $0x40] sm:$0xff] %v1298_v28  ;;  %v1304_v35 = vadd.f32 %v1806_v1, %v1288_v45  ;;  %1315 = vst [vmem:[%s2419_s6 + $0x48] sm:$0xff] %v1299_v39  ;;  %v1305_v37 = vadd.f32 %v2256_v8, %v1289_v38 }
 0x413   : > { %1316 = vst [vmem:[%s2419_s6 + $0x50] sm:$0xff] %v1300_v29  ;;  %1317 = vst [vmem:[%s2419_s6 + $0x58] sm:$0xff] %v1301_v33 }
 0x414   : > { %1318 = vst [vmem:[%s2419_s6 + $0x60] sm:$0xff] %v1302_v46  ;;  %1319 = vst [vmem:[%s2419_s6 + $0x68] sm:$0xff] %v1303_v47 }
 0x415   : > { %1320 = vst [vmem:[%s2419_s6 + $0x70] sm:$0xff] %v1304_v35  ;;  %1321 = vst [vmem:[%s2419_s6 + $0x78] sm:$0xff] %v1305_v37 }
 0x416 PF: > { %s17_s23 = sadd.s32 1, %s1953_s23   ;;  %s2420_s21 = smov %s1949_s22 }
 0x417   : > { %p14_p6 = scmp.ge.s32.totalorder %s17_s23, 6   ;;  %s2421_s22 = smov %s2423_s24 }
 0x419   :  { %16 = sbr.rel (!%p14_p6) target bundleno = 2 (0x2), region = 98 }

// kernel: lbmil_forward.3
= control target key start
LH: loop header
LB: loop body
LE: loop exit
PB: predicated region body
PF: predicated region fallthrough
CT: control target
= control target key end

     0   :  { %vm69_vm0 = vcmask 261120   ;;  %vm898_vm1 = vcmask 257024   ;;  %s2086_s20 = smov 96   ;;  %s2087_s24 = smov 64   ;;  %s3718_s1 = inlined_call_operand.vmem [shape: bf16[32,128], index: 1, kind: input, shape index: {}]   ;;  %s3719_s0 = inlined_call_operand.vmem [shape: f32[128,32], index: 0, kind: input, shape index: {}]   ;;  %s3720_s3 = inlined_call_operand.vmem [shape: f32[16,128], index: 3, kind: input, shape index: {}]   ;;  %s3721_s4 = inlined_call_operand.vmem [shape: f32[128,128], index: 4, kind: output, shape index: {0}]   ;;  %s3722_s2 = inlined_call_operand.vmem [shape: bf16[128,384], index: 2, kind: input, shape index: {}]   ;;  %s3723_s5 = inlined_call_operand.vmem [shape: bf16[4,128,32], index: 5, kind: output, shape index: {1}]   ;;  %s3724_s6 = inlined_call_operand.vmem [shape: bf16[4,128,32], index: 6, kind: output, shape index: {2}]   ;;  %s3725_s7 = inlined_call_operand.vmem [shape: bf16[4,128,32], index: 7, kind: output, shape index: {3}]  }
   0x1   :  { %v2019_v0 = vld [vmem:[%s3718_s1 + $0x8] sm:$0xff]   ;;  %v2020_v1 = vld [vmem:[%s3718_s1] sm:$0xff]   ;;  %v27_v5 = vld [vmem:[%s3719_s0 + $0x10] sm:$0xff]  ;;  %s2088_s10 = smov 32  }
   0x2   :  { %1963 = vmatprep.subr.bf16.mxu0 %v2019_v0  ;;  %v25_v2 = vld [vmem:[%s3719_s0] sm:$0xff]  ;;  %v26_v3 = vld [vmem:[%s3719_s0 + $0x8] sm:$0xff]  ;;  %v28_v6 = vld [vmem:[%s3719_s0 + $0x18] sm:$0xff] }
   0x3   :  { %1964 = vmatpush3.bf16.msra.mxu0 %v2019_v0  ;;  %v41_v4 = vpack.c.bf16 %v26_v3, %v25_v2  ;;  %v29_v7 = vld [vmem:[%s3719_s0 + $0x20] sm:$0xff]  ;;  %v30_v8 = vld [vmem:[%s3719_s0 + $0x28] sm:$0xff]  ;;  %v42_v9 = vpack.c.bf16 %v28_v6, %v27_v5  ;;  %v31_v11 = vld [vmem:[%s3719_s0 + $0x30] sm:$0xff] }
   0x4   :  { %1965 = vmatprep.subr.bf16.mxu0 %v2020_v1  ;;  %v43_v10 = vpack.c.bf16 %v30_v8, %v29_v7  ;;  %v32_v12 = vld [vmem:[%s3719_s0 + $0x38] sm:$0xff]  ;;  %v33_v13 = vld [vmem:[%s3719_s0 + $0x40] sm:$0xff]  ;;  %v34_v14 = vld [vmem:[%s3719_s0 + $0x48] sm:$0xff] }
   0x5   :  { %1967 = vmatprep.mubr.msk.bf16.mxu0 %vm69_vm0, %v41_v4  ;;  %v44_v15 = vpack.c.bf16 %v32_v12, %v31_v11  ;;  %v45_v16 = vpack.c.bf16 %v34_v14, %v33_v13  ;;  %v35_v17 = vld [vmem:[%s3719_s0 + $0x50] sm:$0xff]  ;;  %v36_v18 = vld [vmem:[%s3719_s0 + $0x58] sm:$0xff]  ;;  %v37_v19 = vld [vmem:[%s3719_s0 + $0x60] sm:$0xff] }
   0x6   :  { %v38_v20 = vld [vmem:[%s3719_s0 + $0x68] sm:$0xff]  ;;  %v46_v21 = vpack.c.bf16 %v36_v18, %v35_v17  ;;  %v39_v23 = vld [vmem:[%s3719_s0 + $0x70] sm:$0xff]  ;;  %v40_v24 = vld [vmem:[%s3719_s0 + $0x78] sm:$0xff] }
   0x7   :  { %1966 = vmatpush3.bf16.msra.mxu0 %v2020_v1  ;;  %v47_v22 = vpack.c.bf16 %v38_v20, %v37_v19  ;;  %v48_v25 = vpack.c.bf16 %v40_v24, %v39_v23  ;;  %v2194_v26 = vld [vmem:[%s3720_s3] ss:$0 sm:$0xff]  ;;  %v2021_v11 = vld [vmem:[%s3722_s2 + $0xac] ss:$12 sps:$4 sm:$0xff]   ;;  %v2023_v12 = vld [vmem:[%s3722_s2 + $0xa8] ss:$12 sps:$4 sm:$0xff]  }
   0x8   :  { %608 = vmatprep.subr.bf16.mxu1 %v2021_v11 }
   0x9   :  { %609 = vmatpush1.bf16.msra.mxu1 %v2023_v12 }
   0xa   :  { %1968 = vmatmul.mubr.msk.bf16.vlgmr.msra.gmra.mxu0 %vm69_vm0, %v42_v9 }
   0xb   :  { %1971 = vmatprep.mubr.msk.bf16.mxu0 %vm69_vm0, %v43_v10 }
  0x12   :  { %1972 = vmatmul.mubr.msk.bf16.gmra.mxu0 %vm69_vm0, %v44_v15 }
  0x13   :  { %1975 = vmatprep.mubr.msk.bf16.mxu0 %vm69_vm0, %v45_v16 }
  0x1a   :  { %1976 = vmatmul.mubr.msk.bf16.gmra.mxu0 %vm69_vm0, %v46_v21 }
  0x1b   :  { %1979 = vmatprep.mubr.msk.bf16.mxu0 %vm69_vm0, %v47_v22 }
  0x22   :  { %1980 = vmatmul.mubr.msk.bf16.gmra.mxu0 %vm69_vm0, %v48_v25 }
  0xca   :  { %v1969_v27 = vpop.f32.mrf.mxu0 }
  0xcb   :  { %v137_v28 = vadd.f32 %v1969_v27, %v2194_v26 }
  0xcc   :  { %v128_v29 = vpop.f32.mrf.mxu0 }
  0xcd   :  { %v2197_v30 = vmax.f32 %v137_v28, 0.0  ;;  %v129_v31 = vadd.f32 %v2194_v26, %v128_v29 }
  0xce   :  { %v1970_v32 = vpop.f32.mrf.mxu0 }
  0xcf   :  { %209 = vst [vmem:[%s3721_s4 + $0x10] sm:$0xff] %v2197_v30  ;;  %v2204_v33 = vmax.f32 %v129_v31, 0.0  ;;  %v140_v34 = vadd.f32 %v1970_v32, %v2194_v26  ;;  %227 = vadd.xlane.f32.xlu1 %v2197_v30 }
  0xd0   :  { %v131_v35 = vpop.f32.mrf.mxu0 }
  0xd1   :  { %207 = vst [vmem:[%s3721_s4] sm:$0xff] %v2204_v33  ;;  %v2212_v36 = vmax.f32 %v140_v34, 0.0  ;;  %v132_v37 = vadd.f32 %v2194_v26, %v131_v35  ;;  %223 = vadd.xlane.f32.xlu0 %v2204_v33 }
  0xd2   :  { %v1973_v38 = vpop.f32.mrf.mxu0 }
  0xd3   :  { %210 = vst [vmem:[%s3721_s4 + $0x18] sm:$0xff] %v2212_v36  ;;  %v2220_v39 = vmax.f32 %v132_v37, 0.0  ;;  %v153_v40 = vadd.f32 %v1973_v38, %v2194_v26  ;;  %229 = vadd.xlane.f32.xlu1 %v2212_v36 }
  0xd4   :  { %v144_v41 = vpop.f32.mrf.mxu0 }
  0xd5   :  { %208 = vst [vmem:[%s3721_s4 + $0x8] sm:$0xff] %v2220_v39  ;;  %v2228_v42 = vmax.f32 %v153_v40, 0.0  ;;  %v145_v43 = vadd.f32 %v2194_v26, %v144_v41  ;;  %225 = vadd.xlane.f32.xlu0 %v2220_v39 }
  0xd6   :  { %v1974_v44 = vpop.f32.mrf.mxu0 }
  0xd7   :  { %213 = vst [vmem:[%s3721_s4 + $0x30] sm:$0xff] %v2228_v42  ;;  %v2236_v45 = vmax.f32 %v145_v43, 0.0  ;;  %v156_v46 = vadd.f32 %v1974_v44, %v2194_v26  ;;  %v2024_v44 = vld [vmem:[%s3722_s2 + $0x94] ss:$12 sps:$4 sm:$0xff]  }
  0xd8   :  { %v147_v47 = vpop.f32.mrf.mxu0  ;;  %610 = vmatprep.subr.bf16.mxu1 %v2024_v44 }
  0xd9   :  { %211 = vst [vmem:[%s3721_s4 + $0x20] sm:$0xff] %v2236_v45  ;;  %v2243_v48 = vmax.f32 %v156_v46, 0.0  ;;  %v148_v49 = vadd.f32 %v2194_v26, %v147_v47  ;;  %231 = vadd.xlane.f32.xlu0 %v2236_v45 }
  0xda   :  { %v1977_v50 = vpop.f32.mrf.mxu0 }
  0xdb   :  { %214 = vst [vmem:[%s3721_s4 + $0x38] sm:$0xff] %v2243_v48  ;;  %v2251_v51 = vmax.f32 %v148_v49, 0.0  ;;  %v169_v52 = vadd.f32 %v1977_v50, %v2194_v26 }
  0xdc   :  { %v160_v53 = vpop.f32.mrf.mxu0 }
  0xdd   :  { %212 = vst [vmem:[%s3721_s4 + $0x28] sm:$0xff] %v2251_v51  ;;  %v2258_v54 = vmax.f32 %v169_v52, 0.0  ;;  %v161_v55 = vadd.f32 %v2194_v26, %v160_v53  ;;  %233 = vadd.xlane.f32.xlu1 %v2251_v51  ;;  %235 = vadd.xlane.f32.xlu0 %v2228_v42 }
  0xde   :  { %v1978_v56 = vpop.f32.mrf.mxu0 }
  0xdf   :  { %217 = vst [vmem:[%s3721_s4 + $0x50] sm:$0xff] %v2258_v54  ;;  %v2267_v57 = vmax.f32 %v161_v55, 0.0  ;;  %v172_v58 = vadd.f32 %v1978_v56, %v2194_v26 }
  0xe0   :  { %v163_v59 = vpop.f32.mrf.mxu0 }
  0xe1   :  { %215 = vst [vmem:[%s3721_s4 + $0x40] sm:$0xff] %v2267_v57  ;;  %v2274_v60 = vmax.f32 %v172_v58, 0.0  ;;  %v164_v61 = vadd.f32 %v2194_v26, %v163_v59  ;;  %237 = vadd.xlane.f32.xlu1 %v2243_v48  ;;  %239 = vadd.xlane.f32.xlu0 %v2267_v57  ;;  %v2031_v59 = vld [vmem:[%s3722_s2 + $0x78] ss:$12 sps:$4 sm:$0xff]  }
  0xe2   :  { %v1981_v62 = vpop.f32.mrf.mxu0 }
  0xe3   :  { %218 = vst [vmem:[%s3721_s4 + $0x58] sm:$0xff] %v2274_v60  ;;  %v2283_v63 = vmax.f32 %v164_v61, 0.0  ;;  %v185_v0 = vadd.f32 %v1981_v62, %v2194_v26 }
  0xe4   :  { %v176_v1 = vpop.f32.mrf.mxu0 }
  0xe5   :  { %216 = vst [vmem:[%s3721_s4 + $0x48] sm:$0xff] %v2283_v63  ;;  %v2290_v2 = vmax.f32 %v185_v0, 0.0  ;;  %v177_v3 = vadd.f32 %v2194_v26, %v176_v1  ;;  %241 = vadd.xlane.f32.xlu1 %v2283_v63  ;;  %243 = vadd.xlane.f32.xlu0 %v2258_v54 }
  0xe6   :  { %v1982_v4 = vpop.f32.mrf.mxu0 }
  0xe7   :  { %221 = vst [vmem:[%s3721_s4 + $0x70] sm:$0xff] %v2290_v2  ;;  %v2299_v5 = vmax.f32 %v177_v3, 0.0  ;;  %v188_v6 = vadd.f32 %v1982_v4, %v2194_v26  ;;  %v2034_v4 = vld [vmem:[%s3722_s2 + $0x80] ss:$12 sps:$4 sm:$0xff]  }
  0xe8   :  { %v179_v7 = vpop.f32.mrf.mxu0 }
  0xe9   :  { %219 = vst [vmem:[%s3721_s4 + $0x60] sm:$0xff] %v2299_v5  ;;  %v2306_v8 = vmax.f32 %v188_v6, 0.0  ;;  %v180_v9 = vadd.f32 %v2194_v26, %v179_v7  ;;  %245 = vadd.xlane.f32.xlu1 %v2274_v60  ;;  %247 = vadd.xlane.f32.xlu0 %v2299_v5  ;;  %v2035_v7 = vld [vmem:[%s3722_s2 + $0x60] ss:$12 sps:$4 sm:$0xff]  }
  0xeb   :  { %222 = vst [vmem:[%s3721_s4 + $0x78] sm:$0xff] %v2306_v8  ;;  %v2315_v10 = vmax.f32 %v180_v9, 0.0 }
  0xed   :  { %220 = vst [vmem:[%s3721_s4 + $0x68] sm:$0xff] %v2315_v10  ;;  %249 = vadd.xlane.f32.xlu1 %v2315_v10  ;;  %251 = vadd.xlane.f32.xlu0 %v2290_v2 }
  0xf1   :  { %253 = vadd.xlane.f32.xlu1 %v2306_v8 }
 0x158   :  { %v228_v13 = vpop.xlane.xlu1 %227 }
 0x159   :  { %v258_v15 = vmul.f32 0.0078125, %v228_v13 }
 0x15a   :  { %v224_v14 = vpop.xlane.xlu0 %223 }
 0x15b   :  { %v256_v16 = vmul.f32 0.0078125, %v224_v14  ;;  %v2336_v23 = vsub.f32 %v2197_v30, %v258_v15 }
 0x15c   :  { %v230_v17 = vpop.xlane.xlu1 %229 }
 0x15d   :  { %v2331_v18 = vsub.f32 %v2204_v33, %v256_v16  ;;  %v259_v20 = vmul.f32 0.0078125, %v230_v17  ;;  %v290_v27 = vmul.f32 %v2336_v23, %v2336_v23  ;;  %v2038_v16 = vld [vmem:[%s3722_s2 + $0x68] ss:$12 sps:$4 sm:$0xff]  }
 0x15e   :  { %v226_v19 = vpop.xlane.xlu0 %225  ;;  %v2039_v17 = vld [vmem:[%s3722_s2 + $0x48] ss:$12 sps:$4 sm:$0xff]  }
 0x15f   :  { %v257_v21 = vmul.f32 0.0078125, %v226_v19  ;;  %v288_v22 = vmul.f32 %v2331_v18, %v2331_v18  ;;  %v2346_v29 = vsub.f32 %v2212_v36, %v259_v20 }
 0x161   :  { %304 = vadd.xlane.f32.xlu0 %v288_v22  ;;  %v2339_v24 = vsub.f32 %v2220_v39, %v257_v21  ;;  %v291_v34 = vmul.f32 %v2346_v29, %v2346_v29 }
 0x162   :  { %v232_v25 = vpop.xlane.xlu0 %231 }
 0x163   :  { %v260_v26 = vmul.f32 0.0078125, %v232_v25  ;;  %v289_v28 = vmul.f32 %v2339_v24, %v2339_v24 }
 0x165   :  { %308 = vadd.xlane.f32.xlu0 %v290_v27  ;;  %306 = vadd.xlane.f32.xlu1 %v289_v28  ;;  %v2349_v30 = vsub.f32 %v2236_v45, %v260_v26  ;;  %v2026_v45 = vld [vmem:[%s3722_s2 + $0xb0] ss:$12 sps:$4 sm:$0xff]  }
 0x166   :  { %v234_v31 = vpop.xlane.xlu1 %233  ;;  %v236_v32 = vpop.xlane.xlu0 %235  ;;  %1983 = vmatprep.subr.bf16.mxu0 %v2026_v45  ;;  %v2042_v27 = vld [vmem:[%s3722_s2 + $0x50] ss:$12 sps:$4 sm:$0xff]  }
 0x167   :  { %v262_v33 = vmul.f32 0.0078125, %v236_v32  ;;  %v292_v35 = vmul.f32 %v2349_v30, %v2349_v30  ;;  %v261_v36 = vmul.f32 0.0078125, %v234_v31  ;;  %1984 = vmatpush3.bf16.msra.mxu0 %v2026_v45 }
 0x169   :  { %310 = vadd.xlane.f32.xlu1 %v291_v34  ;;  %312 = vadd.xlane.f32.xlu0 %v292_v35  ;;  %v2356_v37 = vsub.f32 %v2228_v42, %v262_v33  ;;  %v2027_v42 = vld [vmem:[%s3722_s2 + $0x90] ss:$12 sps:$4 sm:$0xff]   ;;  %v2380_v56 = vsub.f32 %v2251_v51, %v261_v36  ;;  %v2046_v34 = vld [vmem:[%s3722_s2 + $0x38] ss:$12 sps:$4 sm:$0xff]  }
 0x16a   :  { %v238_v38 = vpop.xlane.xlu1 %237  ;;  %v240_v39 = vpop.xlane.xlu0 %239  ;;  %611 = vmatpush1.bf16.msra.mxu1 %v2027_v42  ;;  %v2047_v35 = vld [vmem:[%s3722_s2 + $0x18] ss:$12 sps:$4 sm:$0xff]  }
 0x16b   :  { %v263_v40 = vmul.f32 0.0078125, %v238_v38  ;;  %v264_v41 = vmul.f32 0.0078125, %v240_v39  ;;  %v294_v43 = vmul.f32 %v2356_v37, %v2356_v37  ;;  %v293_v1 = vmul.f32 %v2380_v56, %v2380_v56  ;;  %v2048_v36 = vld [vmem:[%s3722_s2 + $0x4] ss:$12 sps:$4 sm:$0xff]   ;;  %v2050_v38 = vld [vmem:[%s3722_s2 + $0x20] ss:$12 sps:$4 sm:$0xff]  }
 0x16c   :  { %v2051_v39 = vld [vmem:[%s3722_s2] ss:$12 sps:$4 sm:$0xff]  }
 0x16d   :  { %316 = vadd.xlane.f32.xlu0 %v294_v43  ;;  %v2370_v46 = vsub.f32 %v2243_v48, %v263_v40  ;;  %v2373_v47 = vsub.f32 %v2267_v57, %v264_v41  ;;  %v2028_v48 = vld [vmem:[%s3722_s2 + $0x7c] ss:$12 sps:$4 sm:$0xff]   ;;  %v2030_v57 = vld [vmem:[%s3722_s2 + $0x98] ss:$12 sps:$4 sm:$0xff]   ;;  %v2085_v41 = vmov 0  }
 0x16e   :  { %v242_v49 = vpop.xlane.xlu1 %241  ;;  %v244_v50 = vpop.xlane.xlu0 %243  ;;  %612 = vmatprep.subr.bf16.mxu1 %v2028_v48  ;;  %1985 = vmatprep.subr.bf16.mxu0 %v2030_v57  ;;  %v2052_v40 = vld [vmem:[%s3722_s2 + $0x8] ss:$12 sps:$4 sm:$0xff]  }
 0x16f   :  { %v266_v52 = vmul.f32 0.0078125, %v244_v50  ;;  %v295_v53 = vmul.f32 %v2370_v46, %v2370_v46  ;;  %v296_v55 = vmul.f32 %v2373_v47, %v2373_v47  ;;  %v265_v51 = vmul.f32 0.0078125, %v242_v49  ;;  %613 = vmatpush1.bf16.msra.mxu1 %v2031_v59  ;;  %1986 = vmatpush3.bf16.msra.mxu0 %v2030_v57 }
 0x170   :  { %1987 = vmatprep.subr.bf16.mxu0 %v2034_v4  ;;  %640 = vmatprep.mubr.bf16.mxu1 %v2085_v41 }
 0x171   :  { %318 = vadd.xlane.f32.xlu1 %v295_v53  ;;  %320 = vadd.xlane.f32.xlu0 %v296_v55  ;;  %v2389_v58 = vsub.f32 %v2258_v54, %v266_v52  ;;  %v2032_v54 = vld [vmem:[%s3722_s2 + $0x64] ss:$12 sps:$4 sm:$0xff]   ;;  %v2411_v12 = vsub.f32 %v2283_v63, %v265_v51 }
 0x172   :  { %v246_v61 = vpop.xlane.xlu1 %245  ;;  %v248_v62 = vpop.xlane.xlu0 %247  ;;  %614 = vmatprep.subr.bf16.mxu1 %v2032_v54 }
 0x173   :  { %v267_v0 = vmul.f32 0.0078125, %v246_v61  ;;  %v298_v3 = vmul.f32 %v2389_v58, %v2389_v58  ;;  %v268_v13 = vmul.f32 0.0078125, %v248_v62  ;;  %615 = vmatpush1.bf16.msra.mxu1 %v2035_v7  ;;  %1988 = vmatpush3.bf16.msra.mxu0 %v2034_v4  ;;  %v297_v20 = vmul.f32 %v2411_v12, %v2411_v12 }
 0x174   :  { %1989 = vmatprep.subr.bf16.mxu0 %v2038_v16 }
 0x175   :  { %314 = vadd.xlane.f32.xlu1 %v293_v1  ;;  %324 = vadd.xlane.f32.xlu0 %v298_v3  ;;  %v2405_v6 = vsub.f32 %v2274_v60, %v267_v0  ;;  %v2036_v60 = vld [vmem:[%s3722_s2 + $0x4c] ss:$12 sps:$4 sm:$0xff]   ;;  %v2432_v26 = vsub.f32 %v2299_v5, %v268_v13  ;;  %v2043_v5 = vld [vmem:[%s3722_s2 + $0x30] ss:$12 sps:$4 sm:$0xff]  }
 0x176   :  { %v250_v9 = vpop.xlane.xlu1 %249  ;;  %v252_v11 = vpop.xlane.xlu0 %251  ;;  %616 = vmatprep.subr.bf16.mxu1 %v2036_v60 }
 0x177   :  { %v270_v14 = vmul.f32 0.0078125, %v252_v11  ;;  %v299_v15 = vmul.f32 %v2405_v6, %v2405_v6  ;;  %v269_v21 = vmul.f32 0.0078125, %v250_v9  ;;  %617 = vmatpush1.bf16.msra.mxu1 %v2039_v17  ;;  %1990 = vmatpush3.bf16.msra.mxu0 %v2038_v16  ;;  %v300_v32 = vmul.f32 %v2432_v26, %v2432_v26 }
 0x178   :  { %1991 = vmatprep.subr.bf16.mxu0 %v2042_v27 }
 0x179   :  { %326 = vadd.xlane.f32.xlu1 %v299_v15  ;;  %v2422_v63 = vsub.f32 %v2290_v2, %v270_v14  ;;  %v2040_v2 = vld [vmem:[%s3722_s2 + $0x34] ss:$12 sps:$4 sm:$0xff]   ;;  %v2451_v33 = vsub.f32 %v2315_v10, %v269_v21 }
 0x17a   :  { %v254_v19 = vpop.xlane.xlu1 %253  ;;  %618 = vmatprep.subr.bf16.mxu1 %v2040_v2  ;;  %v2481_v15 = vld [vmem:[%s3720_s3 + $0x1] ss:$0 sm:$0xff] }
 0x17b   :  { %v271_v22 = vmul.f32 0.0078125, %v254_v19  ;;  %v302_v25 = vmul.f32 %v2422_v63, %v2422_v63  ;;  %619 = vmatpush1.bf16.msra.mxu1 %v2043_v5  ;;  %1992 = vmatpush3.bf16.msra.mxu0 %v2042_v27  ;;  %v301_v10 = vmul.f32 %v2451_v33, %v2451_v33 }
 0x17c   :  { %1993 = vmatprep.subr.bf16.mxu0 %v2046_v34 }
 0x17d   :  { %322 = vadd.xlane.f32.xlu1 %v297_v20  ;;  %332 = vadd.xlane.f32.xlu0 %v302_v25  ;;  %v2441_v28 = vsub.f32 %v2306_v8, %v271_v22  ;;  %v2044_v8 = vld [vmem:[%s3722_s2 + $0x1c] ss:$12 sps:$4 sm:$0xff]  }
 0x17e   :  { %620 = vmatprep.subr.bf16.mxu1 %v2044_v8 }
 0x17f   :  { %v303_v31 = vmul.f32 %v2441_v28, %v2441_v28  ;;  %621 = vmatpush1.bf16.msra.mxu1 %v2047_v35  ;;  %1994 = vmatpush3.bf16.msra.mxu0 %v2046_v34 }
 0x180   :  { %622 = vmatprep.subr.bf16.mxu1 %v2048_v36  ;;  %1995 = vmatprep.subr.bf16.mxu0 %v2050_v38 }
 0x181   :  { %334 = vadd.xlane.f32.xlu1 %v303_v31  ;;  %328 = vadd.xlane.f32.xlu0 %v300_v32 }
 0x183   :  { %623 = vmatpush1.bf16.msra.mxu1 %v2051_v39  ;;  %1996 = vmatpush3.bf16.msra.mxu0 %v2050_v38 }
 0x184   :  { %1997 = vmatprep.subr.bf16.mxu0 %v2052_v40 }
 0x185   :  { %330 = vadd.xlane.f32.xlu1 %v301_v10 }
 0x187   :  { %1998 = vmatpush3.bf16.msra.mxu0 %v2052_v40 }
 0x1ea   :  { %v305_v43 = vpop.xlane.xlu0 %304 }
 0x1eb   :  { %v336_v44 = vmul.f32 0.0078125, %v305_v43 }
 0x1ed   :  { %v352_v45 = vadd.f32 1e-05, %v336_v44 }
 0x1ee   :  { %v307_v42 = vpop.xlane.xlu1 %306  ;;  %v309_v49 = vpop.xlane.xlu0 %308 }
 0x1ef   :  { %2053 = vrsqrt.f32 %v352_v45  ;;  %v337_v50 = vmul.f32 0.0078125, %v307_v42  ;;  %v338_v52 = vmul.f32 0.0078125, %v309_v49 }
 0x1f1   :  { %v353_v53 = vadd.f32 1e-05, %v337_v50  ;;  %v354_v55 = vadd.f32 1e-05, %v338_v52 }
 0x1f2   :  { %v311_v48 = vpop.xlane.xlu1 %310  ;;  %v313_v57 = vpop.xlane.xlu0 %312 }
 0x1f3   :  { %2055 = vrsqrt.f32 %v353_v53  ;;  %v339_v59 = vmul.f32 0.0078125, %v311_v48  ;;  %v340_v61 = vmul.f32 0.0078125, %v313_v57 }
 0x1f4   :  { %2057 = vrsqrt.f32 %v354_v55 }
 0x1f5   :  { %v355_v51 = vadd.f32 1e-05, %v339_v59  ;;  %v356_v1 = vadd.f32 1e-05, %v340_v61 }
 0x1f6   :  { %v317_v62 = vpop.xlane.xlu0 %316 }
 0x1f7   :  { %2059 = vrsqrt.f32 %v355_v51  ;;  %v342_v0 = vmul.f32 0.0078125, %v317_v62 }
 0x1f8   :  { %2061 = vrsqrt.f32 %v356_v1 }
 0x1f9   :  { %v358_v3 = vadd.f32 1e-05, %v342_v0 }
 0x1fa   :  { %v319_v54 = vpop.xlane.xlu1 %318  ;;  %v321_v4 = vpop.xlane.xlu0 %320 }
 0x1fb   :  { %v343_v7 = vmul.f32 0.0078125, %v319_v54  ;;  %v344_v11 = vmul.f32 0.0078125, %v321_v4  ;;  %2063 = vrsqrt.f32 %v358_v3 }
 0x1fc   :  { %v2054_v9 = vpop.eup %2053 }
 0x1fd   :  { %v359_v13 = vadd.f32 1e-05, %v343_v7  ;;  %v384_v14 = vmul.f32 %v2054_v9, %v2331_v18  ;;  %v360_v21 = vadd.f32 1e-05, %v344_v11  ;;  %v2488_v18 = vld [vmem:[%s3720_s3 + $0x2] ss:$0 sm:$0xff] }
 0x1fe   :  { %v315_v60 = vpop.xlane.xlu1 %314  ;;  %v325_v16 = vpop.xlane.xlu0 %324 }
 0x1ff   :  { %2065 = vrsqrt.f32 %v359_v13  ;;  %v341_v17 = vmul.f32 0.0078125, %v315_v60  ;;  %v346_v19 = vmul.f32 0.0078125, %v325_v16  ;;  %v404_v27 = vmul.f32 %v2481_v15, %v384_v14 }
 0x200   :  { %v2056_v20 = vpop.eup %2055 }
 0x201   :  { %v2058_v22 = vpop.eup %2057  ;;  %v357_v25 = vadd.f32 1e-05, %v341_v17  ;;  %v385_v2 = vmul.f32 %v2056_v20, %v2339_v24  ;;  %v362_v31 = vadd.f32 1e-05, %v346_v19  ;;  %v424_v36 = vadd.f32 %v2488_v18, %v404_v27 }
 0x202   :  { %v386_v5 = vmul.f32 %v2058_v22, %v2336_v23  ;;  %v327_v32 = vpop.xlane.xlu1 %326 }
 0x203   :  { %2067 = vrsqrt.f32 %v357_v25  ;;  %v347_v8 = vmul.f32 0.0078125, %v327_v32  ;;  %v405_v34 = vmul.f32 %v2481_v15, %v385_v2 }
 0x204   :  { %v2060_v35 = vpop.eup %2059  ;;  %2069 = vrsqrt.f32 %v360_v21  ;;  %v406_v23 = vmul.f32 %v2481_v15, %v386_v5 }
 0x205   :  { %v387_v10 = vmul.f32 %v2060_v35, %v2346_v29  ;;  %v363_v24 = vadd.f32 1e-05, %v347_v8  ;;  %v425_v38 = vadd.f32 %v2488_v18, %v405_v34  ;;  %2071 = vrsqrt.f32 %v362_v31  ;;  %v2062_v29 = vpop.eup %2061 }
 0x206   :  { %v323_v39 = vpop.xlane.xlu1 %322  ;;  %v333_v40 = vpop.xlane.xlu0 %332  ;;  %v426_v55 = vadd.f32 %v2488_v18, %v406_v23  ;;  %v388_v3 = vmul.f32 %v2062_v29, %v2349_v30 }
 0x207   :  { %2073 = vrsqrt.f32 %v363_v24  ;;  %v345_v43 = vmul.f32 0.0078125, %v323_v39  ;;  %v350_v44 = vmul.f32 0.0078125, %v333_v40  ;;  %v440_v45 = vpack.c.bf16 %v425_v38, %v424_v36 }
 0x208   :  { %v407_v42 = vmul.f32 %v2481_v15, %v387_v10  ;;  %v2064_v57 = vpop.eup %2063  ;;  %v408_v30 = vmul.f32 %v2481_v15, %v388_v3 }
 0x209   :  { %v361_v49 = vadd.f32 1e-05, %v345_v43  ;;  %641 = vmatmul.mubr.bf16.vlgmr.msra.gmra.mxu1 %v440_v45  ;;  %1999 = vmatprep.mubr.bf16.mxu0 %v440_v45  ;;  %v366_v50 = vadd.f32 1e-05, %v350_v44  ;;  %v390_v7 = vmul.f32 %v2064_v57, %v2356_v37 }
 0x20a   :  { %v335_v52 = vpop.xlane.xlu1 %334  ;;  %v329_v53 = vpop.xlane.xlu0 %328  ;;  %v427_v48 = vadd.f32 %v2488_v18, %v407_v42  ;;  %650 = vmatprep.mubr.bf16.mxu1 %v2085_v41  ;;  %v428_v21 = vadd.f32 %v2488_v18, %v408_v30 }
 0x20b   :  { %2075 = vrsqrt.f32 %v361_v49  ;;  %v351_v59 = vmul.f32 0.0078125, %v335_v52  ;;  %v348_v51 = vmul.f32 0.0078125, %v329_v53 }
 0x20c   :  { %v2066_v61 = vpop.eup %2065  ;;  %v441_v62 = vpack.c.bf16 %v427_v48, %v426_v55  ;;  %2077 = vrsqrt.f32 %v366_v50 }
 0x20d   :  { %v367_v0 = vadd.f32 1e-05, %v351_v59  ;;  %v364_v1 = vadd.f32 1e-05, %v348_v51  ;;  %v391_v54 = vmul.f32 %v2066_v61, %v2370_v46  ;;  %v410_v46 = vmul.f32 %v2481_v15, %v390_v7 }
 0x20e   :  { %2000 = vmatmul.mubr.bf16.vlgmr.msra.gmra.mxu0 %v441_v62  ;;  %v331_v4 = vpop.xlane.xlu1 %330 }
 0x20f   :  { %2079 = vrsqrt.f32 %v367_v0  ;;  %v349_v9 = vmul.f32 0.0078125, %v331_v4  ;;  %v411_v13 = vmul.f32 %v2481_v15, %v391_v54  ;;  %v430_v2 = vadd.f32 %v2488_v18, %v410_v46 }
 0x210   :  { %v2068_v11 = vpop.eup %2067  ;;  %2081 = vrsqrt.f32 %v364_v1 }
 0x211   :  { %v2070_v14 = vpop.eup %2069  ;;  %v365_v60 = vadd.f32 1e-05, %v349_v9  ;;  %651 = vmatmul.mubr.bf16.gmra.mxu1 %v441_v62  ;;  %v389_v16 = vmul.f32 %v2068_v11, %v2380_v56  ;;  %v431_v20 = vadd.f32 %v2488_v18, %v411_v13 }
 0x212   :  { %660 = vmatprep.mubr.bf16.mxu1 %v2085_v41  ;;  %v2072_v17 = vpop.eup %2071  ;;  %v392_v25 = vmul.f32 %v2070_v14, %v2373_v47 }
 0x213   :  { %2083 = vrsqrt.f32 %v365_v60  ;;  %v409_v37 = vmul.f32 %v2481_v15, %v389_v16  ;;  %v394_v27 = vmul.f32 %v2072_v17, %v2389_v58  ;;  %v443_v32 = vpack.c.bf16 %v431_v20, %v430_v2 }
 0x214   :  { %v2074_v19 = vpop.eup %2073  ;;  %v412_v35 = vmul.f32 %v2481_v15, %v392_v25 }
 0x215   :  { %v429_v22 = vadd.f32 %v2488_v18, %v409_v37  ;;  %v395_v56 = vmul.f32 %v2074_v19, %v2405_v6  ;;  %v414_v47 = vmul.f32 %v2481_v15, %v394_v27 }
 0x216   :  { %v432_v38 = vadd.f32 %v2488_v18, %v412_v35 }
 0x217   :  { %v442_v5 = vpack.c.bf16 %v429_v22, %v428_v21  ;;  %v415_v8 = vmul.f32 %v2481_v15, %v395_v56  ;;  %v434_v40 = vadd.f32 %v2488_v18, %v414_v47 }
 0x218   :  { %v2076_v31 = vpop.eup %2075 }
 0x219   :  { %661 = vmatmul.mubr.bf16.gmra.mxu1 %v442_v5  ;;  %2003 = vmatprep.mubr.bf16.mxu0 %v442_v5  ;;  %v393_v34 = vmul.f32 %v2076_v31, %v2411_v12  ;;  %v2078_v6 = vpop.eup %2077  ;;  %v435_v24 = vadd.f32 %v2488_v18, %v415_v8 }
 0x21a   :  { %2004 = vmatmul.mubr.bf16.gmra.mxu0 %v443_v32  ;;  %670 = vmatprep.mubr.bf16.mxu1 %v2085_v41  ;;  %v398_v43 = vmul.f32 %v2078_v6, %v2422_v63 }
 0x21b   :  { %v413_v10 = vmul.f32 %v2481_v15, %v393_v34  ;;  %v445_v42 = vpack.c.bf16 %v435_v24, %v434_v40 }
 0x21c   :  { %v2080_v58 = vpop.eup %2079 }
 0x21d   :  { %v2082_v36 = vpop.eup %2081  ;;  %v433_v39 = vadd.f32 %v2488_v18, %v413_v10  ;;  %v399_v12 = vmul.f32 %v2080_v58, %v2441_v28  ;;  %v418_v28 = vmul.f32 %v2481_v15, %v398_v43 }
 0x21e   :  { %v396_v23 = vmul.f32 %v2082_v36, %v2432_v26 }
 0x21f   :  { %v444_v44 = vpack.c.bf16 %v433_v39, %v432_v38  ;;  %v419_v49 = vmul.f32 %v2481_v15, %v399_v12  ;;  %v438_v55 = vadd.f32 %v2488_v18, %v418_v28 }
 0x220   :  { %v2084_v45 = vpop.eup %2083  ;;  %v416_v50 = vmul.f32 %v2481_v15, %v396_v23 }
 0x221   :  { %671 = vmatmul.mubr.bf16.gmra.mxu1 %v443_v32  ;;  %2007 = vmatprep.mubr.bf16.mxu0 %v444_v44  ;;  %v397_v29 = vmul.f32 %v2084_v45, %v2451_v33  ;;  %v439_v63 = vadd.f32 %v2488_v18, %v419_v49 }
 0x222   :  { %2008 = vmatmul.mubr.bf16.gmra.mxu0 %v445_v42  ;;  %680 = vmatprep.mubr.bf16.mxu1 %v2085_v41  ;;  %v436_v52 = vadd.f32 %v2488_v18, %v416_v50 }
 0x223   :  { %v417_v26 = vmul.f32 %v2481_v15, %v397_v29  ;;  %v447_v57 = vpack.c.bf16 %v439_v63, %v438_v55 }
 0x225   :  { %v437_v53 = vadd.f32 %v2488_v18, %v417_v26 }
 0x227   :  { %v446_v48 = vpack.c.bf16 %v437_v53, %v436_v52 }
 0x229   :  { %681 = vmatmul.mubr.bf16.gmra.mxu1 %v444_v44  ;;  %2011 = vmatprep.mubr.bf16.mxu0 %v446_v48 }
 0x22a   :  { %2012 = vmatmul.mubr.bf16.gmra.mxu0 %v447_v57  ;;  %690 = vmatprep.mubr.bf16.mxu1 %v2085_v41 }
 0x231   :  { %691 = vmatmul.mubr.bf16.gmra.mxu1 %v445_v42 }
 0x232   :  { %700 = vmatprep.mubr.bf16.mxu1 %v2085_v41 }
 0x239   :  { %701 = vmatmul.mubr.bf16.gmra.mxu1 %v446_v48 }
 0x23a   :  { %710 = vmatprep.mubr.bf16.mxu1 %v2085_v41 }
 0x241   :  { %711 = vmatmul.mubr.bf16.gmra.mxu1 %v447_v57 }
 0x2c9   :  { %v642_v33 = vpop.f32.mrf.mxu1 }
 0x2ca   :  { %v1889_v15 = vpack.c.bf16 %v642_v33, %v642_v33 }
 0x2cb   :  { %v644_v59 = vpop.f32.mrf.mxu1 }
 0x2cc   :  { %899 = vst.msk [vmem:[%s3723_s5] sm:$0xf] %vm898_vm1, %v1889_v15  ;;  %v2546_v18 = vpack.c.bf16 %v644_v59, %v644_v59  ;;  %1059 = vrot.lane.b32.xlu0 %v1889_v15, %s2086_s20 }
 0x2cd   :  { %v646_v51 = vpop.f32.mrf.mxu1 }
 0x2ce   :  { %971 = vst.msk [vmem:[%s3724_s6] sm:$0xf] %vm898_vm1, %v2546_v18  ;;  %v1890_v41 = vpack.c.bf16 %v646_v51, %v646_v51  ;;  %v2001_v61 = vpop.f32.mrf.mxu0 }
 0x2cf   :  { %v1923_v62 = vpack.c.bf16 %v2001_v61, %v2001_v61  ;;  %v648_v0 = vpop.f32.mrf.mxu1 }
 0x2d0   :  { %900 = vst.msk [vmem:[%s3723_s5 + $0x4] sm:$0xf] %vm898_vm1, %v1890_v41  ;;  %v2558_v1 = vpack.c.bf16 %v648_v0, %v648_v0  ;;  %v755_v3 = vpop.f32.mrf.mxu0  ;;  %1254 = vrot.lane.b32.xlu0 %v1889_v15, %s2087_s24  ;;  %1061 = vrot.lane.b32.xlu1 %v1890_v41, %s2086_s20 }
 0x2d1   :  { %1045 = vst.msk [vmem:[%s3725_s7 + $0x8] sm:$0xf] %vm898_vm1, %v1923_v62  ;;  %v2566_v54 = vpack.c.bf16 %v755_v3, %v755_v3  ;;  %v652_v4 = vpop.f32.mrf.mxu1 }
 0x2d2   :  { %972 = vst.msk [vmem:[%s3724_s6 + $0x4] sm:$0xf] %vm898_vm1, %v2558_v1  ;;  %v2573_v7 = vpack.c.bf16 %v652_v4, %v652_v4  ;;  %v2002_v9 = vpop.f32.mrf.mxu0 }
 0x2d3   :  { %1043 = vst.msk [vmem:[%s3725_s7] sm:$0xf] %vm898_vm1, %v2566_v54  ;;  %v1924_v11 = vpack.c.bf16 %v2002_v9, %v2002_v9  ;;  %v654_v13 = vpop.f32.mrf.mxu1 }
 0x2d4   :  { %901 = vst.msk [vmem:[%s3723_s5 + $0x8] sm:$0xf] %vm898_vm1, %v2573_v7  ;;  %v2585_v14 = vpack.c.bf16 %v654_v13, %v654_v13  ;;  %v758_v60 = vpop.f32.mrf.mxu0  ;;  %1449 = vrot.lane.b32.xlu0 %v1889_v15, %s2088_s10  ;;  %1256 = vrot.lane.b32.xlu1 %v1890_v41, %s2087_s24 }
 0x2d5   :  { %1046 = vst.msk [vmem:[%s3725_s7 + $0xc] sm:$0xf] %vm898_vm1, %v1924_v11  ;;  %v2593_v16 = vpack.c.bf16 %v758_v60, %v758_v60  ;;  %v656_v30 = vpop.f32.mrf.mxu1 }
 0x2d6   :  { %973 = vst.msk [vmem:[%s3724_s6 + $0x8] sm:$0xf] %vm898_vm1, %v2585_v14  ;;  %v2600_v46 = vpack.c.bf16 %v656_v30, %v656_v30 }
 0x2d7   :  { %1044 = vst.msk [vmem:[%s3725_s7 + $0x4] sm:$0xf] %vm898_vm1, %v2593_v16  ;;  %v658_v17 = vpop.f32.mrf.mxu1 }
 0x2d8   :  { %902 = vst.msk [vmem:[%s3723_s5 + $0xc] sm:$0xf] %vm898_vm1, %v2600_v46  ;;  %v2612_v37 = vpack.c.bf16 %v658_v17, %v658_v17  ;;  %1451 = vrot.lane.b32.xlu1 %v1890_v41, %s2088_s10  ;;  %1193 = vrot.lane.b32.xlu0 %v1923_v62, %s2086_s20 }
 0x2d9   :  { %v662_v19 = vpop.f32.mrf.mxu1 }
 0x2da   :  { %974 = vst.msk [vmem:[%s3724_s6 + $0xc] sm:$0xf] %vm898_vm1, %v2612_v37  ;;  %v2621_v20 = vpack.c.bf16 %v662_v19, %v662_v19  ;;  %v2005_v21 = vpop.f32.mrf.mxu0 }
 0x2db   :  { %v2623_v22 = vpack.c.bf16 %v2005_v21, %v2005_v21  ;;  %v664_v25 = vpop.f32.mrf.mxu1 }
 0x2dc   :  { %903 = vst.msk [vmem:[%s3723_s5 + $0x10] sm:$0xf] %vm898_vm1, %v2621_v20  ;;  %v2630_v56 = vpack.c.bf16 %v664_v25, %v664_v25  ;;  %1388 = vrot.lane.b32.xlu0 %v1923_v62, %s2087_s24  ;;  %1195 = vrot.lane.b32.xlu1 %v1924_v11, %s2086_s20  ;;  %v771_v2 = vpop.f32.mrf.mxu0 }
 0x2dd   :  { %1049 = vst.msk [vmem:[%s3725_s7 + $0x18] sm:$0xf] %vm898_vm1, %v2623_v22  ;;  %v2639_v27 = vpack.c.bf16 %v771_v2, %v771_v2  ;;  %v666_v5 = vpop.f32.mrf.mxu1 }
 0x2de   :  { %975 = vst.msk [vmem:[%s3724_s6 + $0x10] sm:$0xf] %vm898_vm1, %v2630_v56  ;;  %v2646_v31 = vpack.c.bf16 %v666_v5, %v666_v5  ;;  %v2006_v32 = vpop.f32.mrf.mxu0 }
 0x2df   :  { %1047 = vst.msk [vmem:[%s3725_s7 + $0x10] sm:$0xf] %vm898_vm1, %v2639_v27  ;;  %v2653_v8 = vpack.c.bf16 %v2006_v32, %v2006_v32  ;;  %v668_v34 = vpop.f32.mrf.mxu1 }
 0x2e0   :  { %904 = vst.msk [vmem:[%s3723_s5 + $0x14] sm:$0xf] %vm898_vm1, %v2646_v31  ;;  %v2660_v35 = vpack.c.bf16 %v668_v34, %v668_v34  ;;  %1583 = vrot.lane.b32.xlu0 %v1923_v62, %s2088_s10  ;;  %1390 = vrot.lane.b32.xlu1 %v1924_v11, %s2087_s24  ;;  %v774_v47 = vpop.f32.mrf.mxu0 }
 0x2e1   :  { %1050 = vst.msk [vmem:[%s3725_s7 + $0x1c] sm:$0xf] %vm898_vm1, %v2653_v8  ;;  %v2669_v6 = vpack.c.bf16 %v774_v47, %v774_v47  ;;  %v672_v10 = vpop.f32.mrf.mxu1 }
 0x2e2   :  { %976 = vst.msk [vmem:[%s3724_s6 + $0x14] sm:$0xf] %vm898_vm1, %v2660_v35  ;;  %v2676_v58 = vpack.c.bf16 %v672_v10, %v672_v10  ;;  %v2009_v24 = vpop.f32.mrf.mxu0 }
 0x2e3   :  { %1048 = vst.msk [vmem:[%s3725_s7 + $0x14] sm:$0xf] %vm898_vm1, %v2669_v6  ;;  %v2683_v36 = vpack.c.bf16 %v2009_v24, %v2009_v24  ;;  %v674_v38 = vpop.f32.mrf.mxu1 }
 0x2e4   :  { %905 = vst.msk [vmem:[%s3723_s5 + $0x18] sm:$0xf] %vm898_vm1, %v2676_v58  ;;  %v2690_v39 = vpack.c.bf16 %v674_v38, %v674_v38  ;;  %1124 = vrot.lane.b32.xlu0 %v2546_v18, %s2086_s20  ;;  %1585 = vrot.lane.b32.xlu1 %v1924_v11, %s2088_s10  ;;  %v787_v12 = vpop.f32.mrf.mxu0 }
 0x2e5   :  { %1053 = vst.msk [vmem:[%s3725_s7 + $0x28] sm:$0xf] %vm898_vm1, %v2683_v36  ;;  %v2700_v40 = vpack.c.bf16 %v787_v12, %v787_v12  ;;  %v676_v23 = vpop.f32.mrf.mxu1 }
 0x2e6   :  { %977 = vst.msk [vmem:[%s3724_s6 + $0x18] sm:$0xf] %vm898_vm1, %v2690_v39  ;;  %v2707_v43 = vpack.c.bf16 %v676_v23, %v676_v23  ;;  %v2010_v44 = vpop.f32.mrf.mxu0 }
 0x2e7   :  { %1051 = vst.msk [vmem:[%s3725_s7 + $0x20] sm:$0xf] %vm898_vm1, %v2700_v40  ;;  %v2714_v45 = vpack.c.bf16 %v2010_v44, %v2010_v44  ;;  %v678_v42 = vpop.f32.mrf.mxu1 }
 0x2e8   :  { %906 = vst.msk [vmem:[%s3723_s5 + $0x1c] sm:$0xf] %vm898_vm1, %v2707_v43  ;;  %v2721_v49 = vpack.c.bf16 %v678_v42, %v678_v42  ;;  %1319 = vrot.lane.b32.xlu0 %v2546_v18, %s2087_s24  ;;  %1126 = vrot.lane.b32.xlu1 %v2558_v1, %s2086_s20  ;;  %v790_v29 = vpop.f32.mrf.mxu0 }
 0x2e9   :  { %1054 = vst.msk [vmem:[%s3725_s7 + $0x2c] sm:$0xf] %vm898_vm1, %v2714_v45  ;;  %v2732_v50 = vpack.c.bf16 %v790_v29, %v790_v29  ;;  %v682_v28 = vpop.f32.mrf.mxu1 }
 0x2ea   :  { %978 = vst.msk [vmem:[%s3724_s6 + $0x1c] sm:$0xf] %vm898_vm1, %v2721_v49  ;;  %v2739_v26 = vpack.c.bf16 %v682_v28, %v682_v28  ;;  %v2013_v63 = vpop.f32.mrf.mxu0 }
 0x2eb   :  { %1052 = vst.msk [vmem:[%s3725_s7 + $0x24] sm:$0xf] %vm898_vm1, %v2732_v50  ;;  %v2746_v52 = vpack.c.bf16 %v2013_v63, %v2013_v63  ;;  %v684_v53 = vpop.f32.mrf.mxu1 }
 0x2ec   :  { %907 = vst.msk [vmem:[%s3723_s5 + $0x20] sm:$0xf] %vm898_vm1, %v2739_v26  ;;  %v2753_v55 = vpack.c.bf16 %v684_v53, %v684_v53  ;;  %1514 = vrot.lane.b32.xlu0 %v2546_v18, %s2088_s10  ;;  %1321 = vrot.lane.b32.xlu1 %v2558_v1, %s2087_s24  ;;  %v803_v48 = vpop.f32.mrf.mxu0 }
 0x2ed   :  { %1057 = vst.msk [vmem:[%s3725_s7 + $0x38] sm:$0xf] %vm898_vm1, %v2746_v52  ;;  %v2764_v57 = vpack.c.bf16 %v803_v48, %v803_v48  ;;  %v686_v33 = vpop.f32.mrf.mxu1 }
 0x2ee   :  { %979 = vst.msk [vmem:[%s3724_s6 + $0x20] sm:$0xf] %vm898_vm1, %v2753_v55  ;;  %v2771_v15 = vpack.c.bf16 %v686_v33, %v686_v33  ;;  %v2014_v59 = vpop.f32.mrf.mxu0 }
 0x2ef   :  { %1055 = vst.msk [vmem:[%s3725_s7 + $0x30] sm:$0xf] %vm898_vm1, %v2764_v57  ;;  %v2778_v18 = vpack.c.bf16 %v2014_v59, %v2014_v59  ;;  %v688_v51 = vpop.f32.mrf.mxu1 }
 0x2f0   :  { %908 = vst.msk [vmem:[%s3723_s5 + $0x24] sm:$0xf] %vm898_vm1, %v2771_v15  ;;  %v2785_v41 = vpack.c.bf16 %v688_v51, %v688_v51  ;;  %1189 = vrot.lane.b32.xlu0 %v2566_v54, %s2086_s20  ;;  %1516 = vrot.lane.b32.xlu1 %v2558_v1, %s2088_s10  ;;  %v806_v61 = vpop.f32.mrf.mxu0 }
 0x2f1   :  { %1058 = vst.msk [vmem:[%s3725_s7 + $0x3c] sm:$0xf] %vm898_vm1, %v2778_v18  ;;  %v2796_v62 = vpack.c.bf16 %v806_v61, %v806_v61  ;;  %v692_v0 = vpop.f32.mrf.mxu1 }
 0x2f2   :  { %980 = vst.msk [vmem:[%s3724_s6 + $0x24] sm:$0xf] %vm898_vm1, %v2785_v41  ;;  %v2803_v3 = vpack.c.bf16 %v692_v0, %v692_v0 }
 0x2f3   :  { %1056 = vst.msk [vmem:[%s3725_s7 + $0x34] sm:$0xf] %vm898_vm1, %v2796_v62  ;;  %v694_v1 = vpop.f32.mrf.mxu1 }
 0x2f4   :  { %909 = vst.msk [vmem:[%s3723_s5 + $0x28] sm:$0xf] %vm898_vm1, %v2803_v3  ;;  %v2815_v4 = vpack.c.bf16 %v694_v1, %v694_v1  ;;  %1384 = vrot.lane.b32.xlu0 %v2566_v54, %s2087_s24  ;;  %1191 = vrot.lane.b32.xlu1 %v2593_v16, %s2086_s20 }
 0x2f5   :  { %v696_v9 = vpop.f32.mrf.mxu1 }
 0x2f6   :  { %981 = vst.msk [vmem:[%s3724_s6 + $0x28] sm:$0xf] %vm898_vm1, %v2815_v4  ;;  %v2826_v11 = vpack.c.bf16 %v696_v9, %v696_v9 }
 0x2f7   :  { %v698_v13 = vpop.f32.mrf.mxu1 }
 0x2f8   :  { %910 = vst.msk [vmem:[%s3723_s5 + $0x2c] sm:$0xf] %vm898_vm1, %v2826_v11  ;;  %v2833_v60 = vpack.c.bf16 %v698_v13, %v698_v13  ;;  %1579 = vrot.lane.b32.xlu0 %v2566_v54, %s2088_s10  ;;  %1386 = vrot.lane.b32.xlu1 %v2593_v16, %s2087_s24 }
 0x2f9   :  { %v702_v30 = vpop.f32.mrf.mxu1 }
 0x2fa   :  { %982 = vst.msk [vmem:[%s3724_s6 + $0x2c] sm:$0xf] %vm898_vm1, %v2833_v60  ;;  %v2844_v17 = vpack.c.bf16 %v702_v30, %v702_v30 }
 0x2fb   :  { %v704_v19 = vpop.f32.mrf.mxu1 }
 0x2fc   :  { %911 = vst.msk [vmem:[%s3723_s5 + $0x30] sm:$0xf] %vm898_vm1, %v2844_v17  ;;  %v2851_v54 = vpack.c.bf16 %v704_v19, %v704_v19  ;;  %1581 = vrot.lane.b32.xlu1 %v2593_v16, %s2088_s10  ;;  %1258 = vrot.lane.b32.xlu0 %v2573_v7, %s2087_s24 }
 0x2fd   :  { %v706_v21 = vpop.f32.mrf.mxu1 }
 0x2fe   :  { %983 = vst.msk [vmem:[%s3724_s6 + $0x30] sm:$0xf] %vm898_vm1, %v2851_v54  ;;  %v2862_v25 = vpack.c.bf16 %v706_v21, %v706_v21 }
 0x2ff   :  { %v708_v2 = vpop.f32.mrf.mxu1 }
 0x300   :  { %912 = vst.msk [vmem:[%s3723_s5 + $0x34] sm:$0xf] %vm898_vm1, %v2862_v25  ;;  %v2869_v16 = vpack.c.bf16 %v708_v2, %v708_v2  ;;  %1453 = vrot.lane.b32.xlu0 %v2573_v7, %s2088_s10  ;;  %1063 = vrot.lane.b32.xlu1 %v2573_v7, %s2086_s20 }
 0x301   :  { %v712_v5 = vpop.f32.mrf.mxu1 }
 0x302   :  { %984 = vst.msk [vmem:[%s3724_s6 + $0x34] sm:$0xf] %vm898_vm1, %v2869_v16  ;;  %v2880_v32 = vpack.c.bf16 %v712_v5, %v712_v5 }
 0x303   :  { %v714_v34 = vpop.f32.mrf.mxu1 }
 0x304   :  { %913 = vst.msk [vmem:[%s3723_s5 + $0x38] sm:$0xf] %vm898_vm1, %v2880_v32  ;;  %v2887_v47 = vpack.c.bf16 %v714_v34, %v714_v34  ;;  %1065 = vrot.lane.b32.xlu1 %v2600_v46, %s2086_s20  ;;  %1201 = vrot.lane.b32.xlu0 %v2623_v22, %s2086_s20 }
 0x305   :  { %v716_v7 = vpop.f32.mrf.mxu1 }
 0x306   :  { %985 = vst.msk [vmem:[%s3724_s6 + $0x38] sm:$0xf] %vm898_vm1, %v2887_v47  ;;  %v2898_v10 = vpack.c.bf16 %v716_v7, %v716_v7 }
 0x307   :  { %v718_v24 = vpop.f32.mrf.mxu1 }
 0x308   :  { %914 = vst.msk [vmem:[%s3723_s5 + $0x3c] sm:$0xf] %vm898_vm1, %v2898_v10  ;;  %v2905_v38 = vpack.c.bf16 %v718_v24, %v718_v24  ;;  %1260 = vrot.lane.b32.xlu1 %v2600_v46, %s2087_s24  ;;  %1396 = vrot.lane.b32.xlu0 %v2623_v22, %s2087_s24 }
 0x30a   :  { %986 = vst.msk [vmem:[%s3724_s6 + $0x3c] sm:$0xf] %vm898_vm1, %v2905_v38 }
 0x30c   :  { %1455 = vrot.lane.b32.xlu1 %v2600_v46, %s2088_s10  ;;  %1591 = vrot.lane.b32.xlu0 %v2623_v22, %s2088_s10 }
 0x310   :  { %1128 = vrot.lane.b32.xlu0 %v2585_v14, %s2086_s20  ;;  %1203 = vrot.lane.b32.xlu1 %v2653_v8, %s2086_s20 }
 0x314   :  { %1323 = vrot.lane.b32.xlu0 %v2585_v14, %s2087_s24  ;;  %1398 = vrot.lane.b32.xlu1 %v2653_v8, %s2087_s24 }
 0x318   :  { %1518 = vrot.lane.b32.xlu0 %v2585_v14, %s2088_s10  ;;  %1593 = vrot.lane.b32.xlu1 %v2653_v8, %s2088_s10 }
 0x31c   :  { %1197 = vrot.lane.b32.xlu0 %v2639_v27, %s2086_s20  ;;  %1130 = vrot.lane.b32.xlu1 %v2612_v37, %s2086_s20 }
 0x320   :  { %1392 = vrot.lane.b32.xlu0 %v2639_v27, %s2087_s24  ;;  %1325 = vrot.lane.b32.xlu1 %v2612_v37, %s2087_s24 }
 0x324   :  { %1587 = vrot.lane.b32.xlu0 %v2639_v27, %s2088_s10  ;;  %1520 = vrot.lane.b32.xlu1 %v2612_v37, %s2088_s10 }
 0x328   :  { %1067 = vrot.lane.b32.xlu0 %v2621_v20, %s2086_s20  ;;  %1199 = vrot.lane.b32.xlu1 %v2669_v6, %s2086_s20 }
 0x32c   :  { %1262 = vrot.lane.b32.xlu0 %v2621_v20, %s2087_s24  ;;  %1394 = vrot.lane.b32.xlu1 %v2669_v6, %s2087_s24 }
 0x330   :  { %1457 = vrot.lane.b32.xlu0 %v2621_v20, %s2088_s10  ;;  %1589 = vrot.lane.b32.xlu1 %v2669_v6, %s2088_s10 }
 0x334   :  { %1069 = vrot.lane.b32.xlu1 %v2646_v31, %s2086_s20  ;;  %1209 = vrot.lane.b32.xlu0 %v2683_v36, %s2086_s20 }
 0x338   :  { %1264 = vrot.lane.b32.xlu1 %v2646_v31, %s2087_s24  ;;  %1404 = vrot.lane.b32.xlu0 %v2683_v36, %s2087_s24 }
 0x33c   :  { %1459 = vrot.lane.b32.xlu1 %v2646_v31, %s2088_s10  ;;  %1599 = vrot.lane.b32.xlu0 %v2683_v36, %s2088_s10 }
 0x33e   :  { %v1060_v14 = vpop.permute.xlu0 %1059 }
 0x33f   :  { %1745 = vst.msk [vmem:[%s3723_s5 + $0x40] sm:$0xf] %vm898_vm1, %v1060_v14 }
 0x340   :  { %1132 = vrot.lane.b32.xlu0 %v2630_v56, %s2086_s20  ;;  %1211 = vrot.lane.b32.xlu1 %v2714_v45, %s2086_s20 }
 0x342   :  { %v1062_v46 = vpop.permute.xlu1 %1061  ;;  %v1255_v37 = vpop.permute.xlu0 %1254 }
 0x343   :  { %1746 = vst.msk [vmem:[%s3723_s5 + $0x44] sm:$0xf] %vm898_vm1, %v1062_v46  ;;  %1793 = vst.msk [vmem:[%s3723_s5 + $0x80] sm:$0xf] %vm898_vm1, %v1255_v37 }
 0x344   :  { %1327 = vrot.lane.b32.xlu0 %v2630_v56, %s2087_s24  ;;  %1406 = vrot.lane.b32.xlu1 %v2714_v45, %s2087_s24 }
 0x346   :  { %v1257_v20 = vpop.permute.xlu1 %1256  ;;  %v1450_v22 = vpop.permute.xlu0 %1449 }
 0x347   :  { %1794 = vst.msk [vmem:[%s3723_s5 + $0x84] sm:$0xf] %vm898_vm1, %v1257_v20  ;;  %1841 = vst.msk [vmem:[%s3723_s5 + $0xc0] sm:$0xf] %vm898_vm1, %v1450_v22 }
 0x348   :  { %1522 = vrot.lane.b32.xlu0 %v2630_v56, %s2088_s10  ;;  %1601 = vrot.lane.b32.xlu1 %v2714_v45, %s2088_s10 }
 0x34a   :  { %v1452_v27 = vpop.permute.xlu1 %1451  ;;  %v1194_v31 = vpop.permute.xlu0 %1193 }
 0x34b   :  { %1842 = vst.msk [vmem:[%s3723_s5 + $0xc4] sm:$0xf] %vm898_vm1, %v1452_v27  ;;  %1779 = vst.msk [vmem:[%s3725_s7 + $0x48] sm:$0xf] %vm898_vm1, %v1194_v31 }
 0x34c   :  { %1205 = vrot.lane.b32.xlu0 %v2700_v40, %s2086_s20  ;;  %1134 = vrot.lane.b32.xlu1 %v2660_v35, %s2086_s20 }
 0x34e   :  { %v1196_v56 = vpop.permute.xlu1 %1195  ;;  %v1389_v8 = vpop.permute.xlu0 %1388 }
 0x34f   :  { %1780 = vst.msk [vmem:[%s3725_s7 + $0x4c] sm:$0xf] %vm898_vm1, %v1196_v56  ;;  %1827 = vst.msk [vmem:[%s3725_s7 + $0x88] sm:$0xf] %vm898_vm1, %v1389_v8 }
 0x350   :  { %1400 = vrot.lane.b32.xlu0 %v2700_v40, %s2087_s24  ;;  %1329 = vrot.lane.b32.xlu1 %v2660_v35, %s2087_s24 }
 0x352   :  { %v1391_v6 = vpop.permute.xlu1 %1390  ;;  %v1584_v36 = vpop.permute.xlu0 %1583 }
 0x353   :  { %1828 = vst.msk [vmem:[%s3725_s7 + $0x8c] sm:$0xf] %vm898_vm1, %v1391_v6  ;;  %1875 = vst.msk [vmem:[%s3725_s7 + $0xc8] sm:$0xf] %vm898_vm1, %v1584_v36 }
 0x354   :  { %1595 = vrot.lane.b32.xlu0 %v2700_v40, %s2088_s10  ;;  %1524 = vrot.lane.b32.xlu1 %v2660_v35, %s2088_s10 }
 0x356   :  { %v1586_v12 = vpop.permute.xlu1 %1585  ;;  %v1125_v23 = vpop.permute.xlu0 %1124 }
 0x357   :  { %1876 = vst.msk [vmem:[%s3725_s7 + $0xcc] sm:$0xf] %vm898_vm1, %v1586_v12  ;;  %1761 = vst.msk [vmem:[%s3724_s6 + $0x40] sm:$0xf] %vm898_vm1, %v1125_v23 }
 0x358   :  { %1071 = vrot.lane.b32.xlu0 %v2676_v58, %s2086_s20  ;;  %1207 = vrot.lane.b32.xlu1 %v2732_v50, %s2086_s20 }
 0x35a   :  { %v1127_v40 = vpop.permute.xlu1 %1126  ;;  %v1320_v35 = vpop.permute.xlu0 %1319 }
 0x35b   :  { %1762 = vst.msk [vmem:[%s3724_s6 + $0x44] sm:$0xf] %vm898_vm1, %v1127_v40  ;;  %1809 = vst.msk [vmem:[%s3724_s6 + $0x80] sm:$0xf] %vm898_vm1, %v1320_v35 }
 0x35c   :  { %1266 = vrot.lane.b32.xlu0 %v2676_v58, %s2087_s24  ;;  %1402 = vrot.lane.b32.xlu1 %v2732_v50, %s2087_s24 }
 0x35e   :  { %v1322_v44 = vpop.permute.xlu1 %1321  ;;  %v1515_v45 = vpop.permute.xlu0 %1514 }
 0x35f   :  { %1810 = vst.msk [vmem:[%s3724_s6 + $0x84] sm:$0xf] %vm898_vm1, %v1322_v44  ;;  %1857 = vst.msk [vmem:[%s3724_s6 + $0xc0] sm:$0xf] %vm898_vm1, %v1515_v45 }
 0x360   :  { %1461 = vrot.lane.b32.xlu0 %v2676_v58, %s2088_s10  ;;  %1597 = vrot.lane.b32.xlu1 %v2732_v50, %s2088_s10 }
 0x362   :  { %v1517_v42 = vpop.permute.xlu1 %1516  ;;  %v1190_v29 = vpop.permute.xlu0 %1189 }
 0x363   :  { %1858 = vst.msk [vmem:[%s3724_s6 + $0xc4] sm:$0xf] %vm898_vm1, %v1517_v42  ;;  %1777 = vst.msk [vmem:[%s3725_s7 + $0x40] sm:$0xf] %vm898_vm1, %v1190_v29 }
 0x364   :  { %1073 = vrot.lane.b32.xlu1 %v2707_v43, %s2086_s20  ;;  %1217 = vrot.lane.b32.xlu0 %v2746_v52, %s2086_s20 }
 0x366   :  { %v1192_v58 = vpop.permute.xlu1 %1191  ;;  %v1385_v50 = vpop.permute.xlu0 %1384 }
 0x367   :  { %1778 = vst.msk [vmem:[%s3725_s7 + $0x44] sm:$0xf] %vm898_vm1, %v1192_v58  ;;  %1825 = vst.msk [vmem:[%s3725_s7 + $0x80] sm:$0xf] %vm898_vm1, %v1385_v50 }
 0x368   :  { %1268 = vrot.lane.b32.xlu1 %v2707_v43, %s2087_s24  ;;  %1412 = vrot.lane.b32.xlu0 %v2746_v52, %s2087_s24 }
 0x36a   :  { %v1387_v28 = vpop.permute.xlu1 %1386  ;;  %v1580_v63 = vpop.permute.xlu0 %1579 }
 0x36b   :  { %1826 = vst.msk [vmem:[%s3725_s7 + $0x84] sm:$0xf] %vm898_vm1, %v1387_v28  ;;  %1873 = vst.msk [vmem:[%s3725_s7 + $0xc0] sm:$0xf] %vm898_vm1, %v1580_v63 }
 0x36c   :  { %1463 = vrot.lane.b32.xlu1 %v2707_v43, %s2088_s10  ;;  %1136 = vrot.lane.b32.xlu0 %v2690_v39, %s2086_s20 }
 0x36e   :  { %v1582_v53 = vpop.permute.xlu1 %1581  ;;  %v1259_v48 = vpop.permute.xlu0 %1258 }
 0x36f   :  { %1874 = vst.msk [vmem:[%s3725_s7 + $0xc4] sm:$0xf] %vm898_vm1, %v1582_v53  ;;  %1795 = vst.msk [vmem:[%s3723_s5 + $0x88] sm:$0xf] %vm898_vm1, %v1259_v48 }
 0x370   :  { %1331 = vrot.lane.b32.xlu0 %v2690_v39, %s2087_s24  ;;  %1219 = vrot.lane.b32.xlu1 %v2778_v18, %s2086_s20 }
 0x372   :  { %v1064_v43 = vpop.permute.xlu1 %1063  ;;  %v1454_v33 = vpop.permute.xlu0 %1453 }
 0x373   :  { %1747 = vst.msk [vmem:[%s3723_s5 + $0x48] sm:$0xf] %vm898_vm1, %v1064_v43  ;;  %1843 = vst.msk [vmem:[%s3723_s5 + $0xc8] sm:$0xf] %vm898_vm1, %v1454_v33 }
 0x374   :  { %1526 = vrot.lane.b32.xlu0 %v2690_v39, %s2088_s10  ;;  %1414 = vrot.lane.b32.xlu1 %v2778_v18, %s2087_s24 }
 0x376   :  { %v1066_v59 = vpop.permute.xlu1 %1065  ;;  %v1202_v51 = vpop.permute.xlu0 %1201 }
 0x377   :  { %1748 = vst.msk [vmem:[%s3723_s5 + $0x4c] sm:$0xf] %vm898_vm1, %v1066_v59  ;;  %1783 = vst.msk [vmem:[%s3725_s7 + $0x58] sm:$0xf] %vm898_vm1, %v1202_v51 }
 0x378   :  { %1213 = vrot.lane.b32.xlu0 %v2764_v57, %s2086_s20  ;;  %1138 = vrot.lane.b32.xlu1 %v2721_v49, %s2086_s20 }
 0x37a   :  { %v1261_v39 = vpop.permute.xlu1 %1260  ;;  %v1397_v61 = vpop.permute.xlu0 %1396 }
 0x37b   :  { %1796 = vst.msk [vmem:[%s3723_s5 + $0x8c] sm:$0xf] %vm898_vm1, %v1261_v39  ;;  %1831 = vst.msk [vmem:[%s3725_s7 + $0x98] sm:$0xf] %vm898_vm1, %v1397_v61 }
 0x37c   :  { %1408 = vrot.lane.b32.xlu0 %v2764_v57, %s2087_s24  ;;  %1333 = vrot.lane.b32.xlu1 %v2721_v49, %s2087_s24 }
 0x37e   :  { %v1456_v0 = vpop.permute.xlu1 %1455  ;;  %v1592_v1 = vpop.permute.xlu0 %1591 }
 0x37f   :  { %1844 = vst.msk [vmem:[%s3723_s5 + $0xcc] sm:$0xf] %vm898_vm1, %v1456_v0  ;;  %1879 = vst.msk [vmem:[%s3725_s7 + $0xd8] sm:$0xf] %vm898_vm1, %v1592_v1 }
 0x380   :  { %1603 = vrot.lane.b32.xlu0 %v2764_v57, %s2088_s10  ;;  %1528 = vrot.lane.b32.xlu1 %v2721_v49, %s2088_s10 }
 0x382   :  { %v1204_v9 = vpop.permute.xlu1 %1203  ;;  %v1129_v13 = vpop.permute.xlu0 %1128 }
 0x383   :  { %1784 = vst.msk [vmem:[%s3725_s7 + $0x5c] sm:$0xf] %vm898_vm1, %v1204_v9  ;;  %1763 = vst.msk [vmem:[%s3724_s6 + $0x48] sm:$0xf] %vm898_vm1, %v1129_v13 }
 0x384   :  { %1075 = vrot.lane.b32.xlu0 %v2739_v26, %s2086_s20  ;;  %1215 = vrot.lane.b32.xlu1 %v2796_v62, %s2086_s20 }
 0x386   :  { %v1399_v57 = vpop.permute.xlu1 %1398  ;;  %v1324_v49 = vpop.permute.xlu0 %1323 }
 0x387   :  { %1832 = vst.msk [vmem:[%s3725_s7 + $0x9c] sm:$0xf] %vm898_vm1, %v1399_v57  ;;  %1811 = vst.msk [vmem:[%s3724_s6 + $0x88] sm:$0xf] %vm898_vm1, %v1324_v49 }
 0x388   :  { %1270 = vrot.lane.b32.xlu0 %v2739_v26, %s2087_s24  ;;  %1410 = vrot.lane.b32.xlu1 %v2796_v62, %s2087_s24 }
 0x38a   :  { %v1594_v30 = vpop.permute.xlu1 %1593  ;;  %v1519_v19 = vpop.permute.xlu0 %1518 }
 0x38b   :  { %1880 = vst.msk [vmem:[%s3725_s7 + $0xdc] sm:$0xf] %vm898_vm1, %v1594_v30  ;;  %1859 = vst.msk [vmem:[%s3724_s6 + $0xc8] sm:$0xf] %vm898_vm1, %v1519_v19 }
 0x38c   :  { %1465 = vrot.lane.b32.xlu0 %v2739_v26, %s2088_s10  ;;  %1605 = vrot.lane.b32.xlu1 %v2796_v62, %s2088_s10 }
 0x38e   :  { %v1131_v21 = vpop.permute.xlu1 %1130  ;;  %v1198_v2 = vpop.permute.xlu0 %1197 }
 0x38f   :  { %1764 = vst.msk [vmem:[%s3724_s6 + $0x4c] sm:$0xf] %vm898_vm1, %v1131_v21  ;;  %1781 = vst.msk [vmem:[%s3725_s7 + $0x50] sm:$0xf] %vm898_vm1, %v1198_v2 }
 0x390   :  { %1077 = vrot.lane.b32.xlu1 %v2771_v15, %s2086_s20  ;;  %1140 = vrot.lane.b32.xlu0 %v2753_v55, %s2086_s20 }
 0x392   :  { %v1326_v26 = vpop.permute.xlu1 %1325  ;;  %v1393_v62 = vpop.permute.xlu0 %1392 }
 0x393   :  { %1812 = vst.msk [vmem:[%s3724_s6 + $0x8c] sm:$0xf] %vm898_vm1, %v1326_v26  ;;  %1829 = vst.msk [vmem:[%s3725_s7 + $0x90] sm:$0xf] %vm898_vm1, %v1393_v62 }
 0x394   :  { %1272 = vrot.lane.b32.xlu1 %v2771_v15, %s2087_s24  ;;  %1335 = vrot.lane.b32.xlu0 %v2753_v55, %s2087_s24 }
 0x396   :  { %v1521_v5 = vpop.permute.xlu1 %1520  ;;  %v1588_v34 = vpop.permute.xlu0 %1587 }
 0x397   :  { %1860 = vst.msk [vmem:[%s3724_s6 + $0xcc] sm:$0xf] %vm898_vm1, %v1521_v5  ;;  %1877 = vst.msk [vmem:[%s3725_s7 + $0xd0] sm:$0xf] %vm898_vm1, %v1588_v34 }
 0x398   :  { %1467 = vrot.lane.b32.xlu1 %v2771_v15, %s2088_s10  ;;  %1530 = vrot.lane.b32.xlu0 %v2753_v55, %s2088_s10 }
 0x39a   :  { %v1200_v7 = vpop.permute.xlu1 %1199  ;;  %v1068_v24 = vpop.permute.xlu0 %1067 }
 0x39b   :  { %1782 = vst.msk [vmem:[%s3725_s7 + $0x54] sm:$0xf] %vm898_vm1, %v1200_v7  ;;  %1749 = vst.msk [vmem:[%s3723_s5 + $0x50] sm:$0xf] %vm898_vm1, %v1068_v24 }
 0x39c   :  { %1142 = vrot.lane.b32.xlu1 %v2785_v41, %s2086_s20  ;;  %1079 = vrot.lane.b32.xlu0 %v2803_v3, %s2086_s20 }
 0x39e   :  { %v1395_v15 = vpop.permute.xlu1 %1394  ;;  %v1263_v55 = vpop.permute.xlu0 %1262 }
 0x39f   :  { %1830 = vst.msk [vmem:[%s3725_s7 + $0x94] sm:$0xf] %vm898_vm1, %v1395_v15  ;;  %1797 = vst.msk [vmem:[%s3723_s5 + $0x90] sm:$0xf] %vm898_vm1, %v1263_v55 }
 0x3a0   :  { %1337 = vrot.lane.b32.xlu1 %v2785_v41, %s2087_s24  ;;  %1274 = vrot.lane.b32.xlu0 %v2803_v3, %s2087_s24 }
 0x3a2   :  { %v1590_v14 = vpop.permute.xlu1 %1589  ;;  %v1458_v46 = vpop.permute.xlu0 %1457 }
 0x3a3   :  { %1878 = vst.msk [vmem:[%s3725_s7 + $0xd4] sm:$0xf] %vm898_vm1, %v1590_v14  ;;  %1845 = vst.msk [vmem:[%s3723_s5 + $0xd0] sm:$0xf] %vm898_vm1, %v1458_v46 }
 0x3a4   :  { %1532 = vrot.lane.b32.xlu1 %v2785_v41, %s2088_s10  ;;  %1469 = vrot.lane.b32.xlu0 %v2803_v3, %s2088_s10 }
 0x3a6   :  { %v1070_v37 = vpop.permute.xlu1 %1069  ;;  %v1210_v20 = vpop.permute.xlu0 %1209 }
 0x3a7   :  { %1750 = vst.msk [vmem:[%s3723_s5 + $0x54] sm:$0xf] %vm898_vm1, %v1070_v37  ;;  %1787 = vst.msk [vmem:[%s3725_s7 + $0x68] sm:$0xf] %vm898_vm1, %v1210_v20 }
 0x3a8   :  { %1081 = vrot.lane.b32.xlu1 %v2826_v11, %s2086_s20  ;;  %1144 = vrot.lane.b32.xlu0 %v2815_v4, %s2086_s20 }
 0x3aa   :  { %v1265_v41 = vpop.permute.xlu1 %1264  ;;  %v1405_v3 = vpop.permute.xlu0 %1404 }
 0x3ab   :  { %1798 = vst.msk [vmem:[%s3723_s5 + $0x94] sm:$0xf] %vm898_vm1, %v1265_v41  ;;  %1835 = vst.msk [vmem:[%s3725_s7 + $0xa8] sm:$0xf] %vm898_vm1, %v1405_v3 }
 0x3ac   :  { %1276 = vrot.lane.b32.xlu1 %v2826_v11, %s2087_s24  ;;  %1339 = vrot.lane.b32.xlu0 %v2815_v4, %s2087_s24 }
 0x3ae   :  { %v1460_v22 = vpop.permute.xlu1 %1459  ;;  %v1600_v27 = vpop.permute.xlu0 %1599 }
 0x3af   :  { %1846 = vst.msk [vmem:[%s3723_s5 + $0xd4] sm:$0xf] %vm898_vm1, %v1460_v22  ;;  %1883 = vst.msk [vmem:[%s3725_s7 + $0xe8] sm:$0xf] %vm898_vm1, %v1600_v27 }
 0x3b0   :  { %1471 = vrot.lane.b32.xlu1 %v2826_v11, %s2088_s10  ;;  %1534 = vrot.lane.b32.xlu0 %v2815_v4, %s2088_s10 }
 0x3b2   :  { %v1212_v31 = vpop.permute.xlu1 %1211  ;;  %v1133_v56 = vpop.permute.xlu0 %1132 }
 0x3b3   :  { %1788 = vst.msk [vmem:[%s3725_s7 + $0x6c] sm:$0xf] %vm898_vm1, %v1212_v31  ;;  %1765 = vst.msk [vmem:[%s3724_s6 + $0x50] sm:$0xf] %vm898_vm1, %v1133_v56 }
 0x3b4   :  { %1146 = vrot.lane.b32.xlu1 %v2833_v60, %s2086_s20  ;;  %1083 = vrot.lane.b32.xlu0 %v2844_v17, %s2086_s20 }
 0x3b6   :  { %v1407_v11 = vpop.permute.xlu1 %1406  ;;  %v1328_v4 = vpop.permute.xlu0 %1327 }
 0x3b7   :  { %1836 = vst.msk [vmem:[%s3725_s7 + $0xac] sm:$0xf] %vm898_vm1, %v1407_v11  ;;  %1813 = vst.msk [vmem:[%s3724_s6 + $0x90] sm:$0xf] %vm898_vm1, %v1328_v4 }
 0x3b8   :  { %1341 = vrot.lane.b32.xlu1 %v2833_v60, %s2087_s24  ;;  %1278 = vrot.lane.b32.xlu0 %v2844_v17, %s2087_s24 }
 0x3ba   :  { %v1602_v8 = vpop.permute.xlu1 %1601  ;;  %v1523_v6 = vpop.permute.xlu0 %1522 }
 0x3bb   :  { %1884 = vst.msk [vmem:[%s3725_s7 + $0xec] sm:$0xf] %vm898_vm1, %v1602_v8  ;;  %1861 = vst.msk [vmem:[%s3724_s6 + $0xd0] sm:$0xf] %vm898_vm1, %v1523_v6 }
 0x3bc   :  { %1536 = vrot.lane.b32.xlu1 %v2833_v60, %s2088_s10  ;;  %1473 = vrot.lane.b32.xlu0 %v2844_v17, %s2088_s10 }
 0x3be   :  { %v1135_v36 = vpop.permute.xlu1 %1134  ;;  %v1206_v12 = vpop.permute.xlu0 %1205 }
 0x3bf   :  { %1766 = vst.msk [vmem:[%s3724_s6 + $0x54] sm:$0xf] %vm898_vm1, %v1135_v36  ;;  %1785 = vst.msk [vmem:[%s3725_s7 + $0x60] sm:$0xf] %vm898_vm1, %v1206_v12 }
 0x3c0   :  { %1085 = vrot.lane.b32.xlu1 %v2862_v25, %s2086_s20  ;;  %1148 = vrot.lane.b32.xlu0 %v2851_v54, %s2086_s20 }
 0x3c2   :  { %v1330_v60 = vpop.permute.xlu1 %1329  ;;  %v1401_v17 = vpop.permute.xlu0 %1400 }
 0x3c3   :  { %1814 = vst.msk [vmem:[%s3724_s6 + $0x94] sm:$0xf] %vm898_vm1, %v1330_v60  ;;  %1833 = vst.msk [vmem:[%s3725_s7 + $0xa0] sm:$0xf] %vm898_vm1, %v1401_v17 }
 0x3c4   :  { %1280 = vrot.lane.b32.xlu1 %v2862_v25, %s2087_s24  ;;  %1343 = vrot.lane.b32.xlu0 %v2851_v54, %s2087_s24 }
 0x3c6   :  { %v1525_v23 = vpop.permute.xlu1 %1524  ;;  %v1596_v40 = vpop.permute.xlu0 %1595 }
 0x3c7   :  { %1862 = vst.msk [vmem:[%s3724_s6 + $0xd4] sm:$0xf] %vm898_vm1, %v1525_v23  ;;  %1881 = vst.msk [vmem:[%s3725_s7 + $0xe0] sm:$0xf] %vm898_vm1, %v1596_v40 }
 0x3c8   :  { %1475 = vrot.lane.b32.xlu1 %v2862_v25, %s2088_s10  ;;  %1538 = vrot.lane.b32.xlu0 %v2851_v54, %s2088_s10 }
 0x3ca   :  { %v1208_v35 = vpop.permute.xlu1 %1207  ;;  %v1072_v44 = vpop.permute.xlu0 %1071 }
 0x3cb   :  { %1786 = vst.msk [vmem:[%s3725_s7 + $0x64] sm:$0xf] %vm898_vm1, %v1208_v35  ;;  %1751 = vst.msk [vmem:[%s3723_s5 + $0x58] sm:$0xf] %vm898_vm1, %v1072_v44 }
 0x3cc   :  { %1150 = vrot.lane.b32.xlu1 %v2869_v16, %s2086_s20  ;;  %1087 = vrot.lane.b32.xlu0 %v2880_v32, %s2086_s20 }
 0x3ce   :  { %v1403_v25 = vpop.permute.xlu1 %1402  ;;  %v1267_v54 = vpop.permute.xlu0 %1266 }
 0x3cf   :  { %1834 = vst.msk [vmem:[%s3725_s7 + $0xa4] sm:$0xf] %vm898_vm1, %v1403_v25  ;;  %1799 = vst.msk [vmem:[%s3723_s5 + $0x98] sm:$0xf] %vm898_vm1, %v1267_v54 }
 0x3d0   :  { %1345 = vrot.lane.b32.xlu1 %v2869_v16, %s2087_s24  ;;  %1282 = vrot.lane.b32.xlu0 %v2880_v32, %s2087_s24 }
 0x3d2   :  { %v1598_v45 = vpop.permute.xlu1 %1597  ;;  %v1462_v42 = vpop.permute.xlu0 %1461 }
 0x3d3   :  { %1882 = vst.msk [vmem:[%s3725_s7 + $0xe4] sm:$0xf] %vm898_vm1, %v1598_v45  ;;  %1847 = vst.msk [vmem:[%s3723_s5 + $0xd8] sm:$0xf] %vm898_vm1, %v1462_v42 }
 0x3d4   :  { %1540 = vrot.lane.b32.xlu1 %v2869_v16, %s2088_s10  ;;  %1477 = vrot.lane.b32.xlu0 %v2880_v32, %s2088_s10 }
 0x3d6   :  { %v1074_v29 = vpop.permute.xlu1 %1073  ;;  %v1218_v58 = vpop.permute.xlu0 %1217 }
 0x3d7   :  { %1752 = vst.msk [vmem:[%s3723_s5 + $0x5c] sm:$0xf] %vm898_vm1, %v1074_v29  ;;  %1791 = vst.msk [vmem:[%s3725_s7 + $0x78] sm:$0xf] %vm898_vm1, %v1218_v58 }
 0x3d8   :  { %1089 = vrot.lane.b32.xlu1 %v2898_v10, %s2086_s20  ;;  %1152 = vrot.lane.b32.xlu0 %v2887_v47, %s2086_s20 }
 0x3da   :  { %v1269_v16 = vpop.permute.xlu1 %1268  ;;  %v1413_v32 = vpop.permute.xlu0 %1412 }
 0x3db   :  { %1800 = vst.msk [vmem:[%s3723_s5 + $0x9c] sm:$0xf] %vm898_vm1, %v1269_v16  ;;  %1839 = vst.msk [vmem:[%s3725_s7 + $0xb8] sm:$0xf] %vm898_vm1, %v1413_v32 }
 0x3dc   :  { %1284 = vrot.lane.b32.xlu1 %v2898_v10, %s2087_s24  ;;  %1347 = vrot.lane.b32.xlu0 %v2887_v47, %s2087_s24 }
 0x3de   :  { %v1464_v50 = vpop.permute.xlu1 %1463  ;;  %v1137_v28 = vpop.permute.xlu0 %1136 }
 0x3df   :  { %1848 = vst.msk [vmem:[%s3723_s5 + $0xdc] sm:$0xf] %vm898_vm1, %v1464_v50  ;;  %1767 = vst.msk [vmem:[%s3724_s6 + $0x58] sm:$0xf] %vm898_vm1, %v1137_v28 }
 0x3e0   :  { %1479 = vrot.lane.b32.xlu1 %v2898_v10, %s2088_s10  ;;  %1542 = vrot.lane.b32.xlu0 %v2887_v47, %s2088_s10 }
 0x3e2   :  { %v1220_v63 = vpop.permute.xlu1 %1219  ;;  %v1332_v53 = vpop.permute.xlu0 %1331 }
 0x3e3   :  { %1792 = vst.msk [vmem:[%s3725_s7 + $0x7c] sm:$0xf] %vm898_vm1, %v1220_v63  ;;  %1815 = vst.msk [vmem:[%s3724_s6 + $0x98] sm:$0xf] %vm898_vm1, %v1332_v53 }
 0x3e4   :  { %1154 = vrot.lane.b32.xlu1 %v2905_v38, %s2086_s20  ;;  %1607 = vrot.lane.b32.xlu0 %v2746_v52, %s2088_s10 }
 0x3e6   :  { %v1415_v10 = vpop.permute.xlu1 %1414  ;;  %v1527_v47 = vpop.permute.xlu0 %1526 }
 0x3e7   :  { %1840 = vst.msk [vmem:[%s3725_s7 + $0xbc] sm:$0xf] %vm898_vm1, %v1415_v10  ;;  %1863 = vst.msk [vmem:[%s3724_s6 + $0xd8] sm:$0xf] %vm898_vm1, %v1527_v47 }
 0x3e8   :  { %1349 = vrot.lane.b32.xlu1 %v2905_v38, %s2087_s24 }
 0x3ea   :  { %v1139_v48 = vpop.permute.xlu1 %1138  ;;  %v1214_v43 = vpop.permute.xlu0 %1213 }
 0x3eb   :  { %1768 = vst.msk [vmem:[%s3724_s6 + $0x5c] sm:$0xf] %vm898_vm1, %v1139_v48  ;;  %1789 = vst.msk [vmem:[%s3725_s7 + $0x70] sm:$0xf] %vm898_vm1, %v1214_v43 }
 0x3ec   :  { %1544 = vrot.lane.b32.xlu1 %v2905_v38, %s2088_s10 }
 0x3ee   :  { %v1334_v52 = vpop.permute.xlu1 %1333  ;;  %v1409_v33 = vpop.permute.xlu0 %1408 }
 0x3ef   :  { %1816 = vst.msk [vmem:[%s3724_s6 + $0x9c] sm:$0xf] %vm898_vm1, %v1334_v52  ;;  %1837 = vst.msk [vmem:[%s3725_s7 + $0xb0] sm:$0xf] %vm898_vm1, %v1409_v33 }
 0x3f0   :  { %1609 = vrot.lane.b32.xlu1 %v2778_v18, %s2088_s10 }
 0x3f2   :  { %v1529_v59 = vpop.permute.xlu1 %1528  ;;  %v1604_v51 = vpop.permute.xlu0 %1603 }
 0x3f3   :  { %1864 = vst.msk [vmem:[%s3724_s6 + $0xdc] sm:$0xf] %vm898_vm1, %v1529_v59  ;;  %1885 = vst.msk [vmem:[%s3725_s7 + $0xf0] sm:$0xf] %vm898_vm1, %v1604_v51 }
 0x3f6   :  { %v1216_v38 = vpop.permute.xlu1 %1215  ;;  %v1076_v39 = vpop.permute.xlu0 %1075 }
 0x3f7   :  { %1790 = vst.msk [vmem:[%s3725_s7 + $0x74] sm:$0xf] %vm898_vm1, %v1216_v38  ;;  %1753 = vst.msk [vmem:[%s3723_s5 + $0x60] sm:$0xf] %vm898_vm1, %v1076_v39 }
 0x3fa   :  { %v1411_v18 = vpop.permute.xlu1 %1410  ;;  %v1271_v61 = vpop.permute.xlu0 %1270 }
 0x3fb   :  { %1838 = vst.msk [vmem:[%s3725_s7 + $0xb4] sm:$0xf] %vm898_vm1, %v1411_v18  ;;  %1801 = vst.msk [vmem:[%s3723_s5 + $0xa0] sm:$0xf] %vm898_vm1, %v1271_v61 }
 0x3fe   :  { %v1606_v0 = vpop.permute.xlu1 %1605  ;;  %v1466_v1 = vpop.permute.xlu0 %1465 }
 0x3ff   :  { %1886 = vst.msk [vmem:[%s3725_s7 + $0xf4] sm:$0xf] %vm898_vm1, %v1606_v0  ;;  %1849 = vst.msk [vmem:[%s3723_s5 + $0xe0] sm:$0xf] %vm898_vm1, %v1466_v1 }
 0x402   :  { %v1078_v9 = vpop.permute.xlu1 %1077  ;;  %v1141_v13 = vpop.permute.xlu0 %1140 }
 0x403   :  { %1754 = vst.msk [vmem:[%s3723_s5 + $0x64] sm:$0xf] %vm898_vm1, %v1078_v9  ;;  %1769 = vst.msk [vmem:[%s3724_s6 + $0x60] sm:$0xf] %vm898_vm1, %v1141_v13 }
 0x406   :  { %v1273_v57 = vpop.permute.xlu1 %1272  ;;  %v1336_v49 = vpop.permute.xlu0 %1335 }
 0x407   :  { %1802 = vst.msk [vmem:[%s3723_s5 + $0xa4] sm:$0xf] %vm898_vm1, %v1273_v57  ;;  %1817 = vst.msk [vmem:[%s3724_s6 + $0xa0] sm:$0xf] %vm898_vm1, %v1336_v49 }
 0x40a   :  { %v1468_v30 = vpop.permute.xlu1 %1467  ;;  %v1531_v19 = vpop.permute.xlu0 %1530 }
 0x40b   :  { %1850 = vst.msk [vmem:[%s3723_s5 + $0xe4] sm:$0xf] %vm898_vm1, %v1468_v30  ;;  %1865 = vst.msk [vmem:[%s3724_s6 + $0xe0] sm:$0xf] %vm898_vm1, %v1531_v19 }
 0x40e   :  { %v1143_v21 = vpop.permute.xlu1 %1142  ;;  %v1080_v2 = vpop.permute.xlu0 %1079 }
 0x40f   :  { %1770 = vst.msk [vmem:[%s3724_s6 + $0x64] sm:$0xf] %vm898_vm1, %v1143_v21  ;;  %1755 = vst.msk [vmem:[%s3723_s5 + $0x68] sm:$0xf] %vm898_vm1, %v1080_v2 }
 0x412   :  { %v1338_v26 = vpop.permute.xlu1 %1337  ;;  %v1275_v62 = vpop.permute.xlu0 %1274 }
 0x413   :  { %1818 = vst.msk [vmem:[%s3724_s6 + $0xa4] sm:$0xf] %vm898_vm1, %v1338_v26  ;;  %1803 = vst.msk [vmem:[%s3723_s5 + $0xa8] sm:$0xf] %vm898_vm1, %v1275_v62 }
 0x416   :  { %v1533_v5 = vpop.permute.xlu1 %1532  ;;  %v1470_v34 = vpop.permute.xlu0 %1469 }
 0x417   :  { %1866 = vst.msk [vmem:[%s3724_s6 + $0xe4] sm:$0xf] %vm898_vm1, %v1533_v5  ;;  %1851 = vst.msk [vmem:[%s3723_s5 + $0xe8] sm:$0xf] %vm898_vm1, %v1470_v34 }
 0x41a   :  { %v1082_v7 = vpop.permute.xlu1 %1081  ;;  %v1145_v24 = vpop.permute.xlu0 %1144 }
 0x41b   :  { %1756 = vst.msk [vmem:[%s3723_s5 + $0x6c] sm:$0xf] %vm898_vm1, %v1082_v7  ;;  %1771 = vst.msk [vmem:[%s3724_s6 + $0x68] sm:$0xf] %vm898_vm1, %v1145_v24 }
 0x41e   :  { %v1277_v15 = vpop.permute.xlu1 %1276  ;;  %v1340_v55 = vpop.permute.xlu0 %1339 }
 0x41f   :  { %1804 = vst.msk [vmem:[%s3723_s5 + $0xac] sm:$0xf] %vm898_vm1, %v1277_v15  ;;  %1819 = vst.msk [vmem:[%s3724_s6 + $0xa8] sm:$0xf] %vm898_vm1, %v1340_v55 }
 0x422   :  { %v1472_v14 = vpop.permute.xlu1 %1471  ;;  %v1535_v46 = vpop.permute.xlu0 %1534 }
 0x423   :  { %1852 = vst.msk [vmem:[%s3723_s5 + $0xec] sm:$0xf] %vm898_vm1, %v1472_v14  ;;  %1867 = vst.msk [vmem:[%s3724_s6 + $0xe8] sm:$0xf] %vm898_vm1, %v1535_v46 }
 0x426   :  { %v1147_v37 = vpop.permute.xlu1 %1146  ;;  %v1084_v20 = vpop.permute.xlu0 %1083 }
 0x427   :  { %1772 = vst.msk [vmem:[%s3724_s6 + $0x6c] sm:$0xf] %vm898_vm1, %v1147_v37  ;;  %1757 = vst.msk [vmem:[%s3723_s5 + $0x70] sm:$0xf] %vm898_vm1, %v1084_v20 }
 0x42a   :  { %v1342_v41 = vpop.permute.xlu1 %1341  ;;  %v1279_v3 = vpop.permute.xlu0 %1278 }
 0x42b   :  { %1820 = vst.msk [vmem:[%s3724_s6 + $0xac] sm:$0xf] %vm898_vm1, %v1342_v41  ;;  %1805 = vst.msk [vmem:[%s3723_s5 + $0xb0] sm:$0xf] %vm898_vm1, %v1279_v3 }
 0x42e   :  { %v1537_v22 = vpop.permute.xlu1 %1536  ;;  %v1474_v27 = vpop.permute.xlu0 %1473 }
 0x42f   :  { %1868 = vst.msk [vmem:[%s3724_s6 + $0xec] sm:$0xf] %vm898_vm1, %v1537_v22  ;;  %1853 = vst.msk [vmem:[%s3723_s5 + $0xf0] sm:$0xf] %vm898_vm1, %v1474_v27 }
 0x432   :  { %v1086_v31 = vpop.permute.xlu1 %1085  ;;  %v1149_v56 = vpop.permute.xlu0 %1148 }
 0x433   :  { %1758 = vst.msk [vmem:[%s3723_s5 + $0x74] sm:$0xf] %vm898_vm1, %v1086_v31  ;;  %1773 = vst.msk [vmem:[%s3724_s6 + $0x70] sm:$0xf] %vm898_vm1, %v1149_v56 }
 0x436   :  { %v1281_v11 = vpop.permute.xlu1 %1280  ;;  %v1344_v4 = vpop.permute.xlu0 %1343 }
 0x437   :  { %1806 = vst.msk [vmem:[%s3723_s5 + $0xb4] sm:$0xf] %vm898_vm1, %v1281_v11  ;;  %1821 = vst.msk [vmem:[%s3724_s6 + $0xb0] sm:$0xf] %vm898_vm1, %v1344_v4 }
 0x43a   :  { %v1476_v8 = vpop.permute.xlu1 %1475  ;;  %v1539_v6 = vpop.permute.xlu0 %1538 }
 0x43b   :  { %1854 = vst.msk [vmem:[%s3723_s5 + $0xf4] sm:$0xf] %vm898_vm1, %v1476_v8  ;;  %1869 = vst.msk [vmem:[%s3724_s6 + $0xf0] sm:$0xf] %vm898_vm1, %v1539_v6 }
 0x43e   :  { %v1151_v36 = vpop.permute.xlu1 %1150  ;;  %v1088_v12 = vpop.permute.xlu0 %1087 }
 0x43f   :  { %1774 = vst.msk [vmem:[%s3724_s6 + $0x74] sm:$0xf] %vm898_vm1, %v1151_v36  ;;  %1759 = vst.msk [vmem:[%s3723_s5 + $0x78] sm:$0xf] %vm898_vm1, %v1088_v12 }
 0x442   :  { %v1346_v60 = vpop.permute.xlu1 %1345  ;;  %v1283_v17 = vpop.permute.xlu0 %1282 }
 0x443   :  { %1822 = vst.msk [vmem:[%s3724_s6 + $0xb4] sm:$0xf] %vm898_vm1, %v1346_v60  ;;  %1807 = vst.msk [vmem:[%s3723_s5 + $0xb8] sm:$0xf] %vm898_vm1, %v1283_v17 }
 0x446   :  { %v1541_v23 = vpop.permute.xlu1 %1540  ;;  %v1478_v40 = vpop.permute.xlu0 %1477 }
 0x447   :  { %1870 = vst.msk [vmem:[%s3724_s6 + $0xf4] sm:$0xf] %vm898_vm1, %v1541_v23  ;;  %1855 = vst.msk [vmem:[%s3723_s5 + $0xf8] sm:$0xf] %vm898_vm1, %v1478_v40 }
 0x44a   :  { %v1090_v35 = vpop.permute.xlu1 %1089  ;;  %v1153_v44 = vpop.permute.xlu0 %1152 }
 0x44b   :  { %1760 = vst.msk [vmem:[%s3723_s5 + $0x7c] sm:$0xf] %vm898_vm1, %v1090_v35  ;;  %1775 = vst.msk [vmem:[%s3724_s6 + $0x78] sm:$0xf] %vm898_vm1, %v1153_v44 }
 0x44e   :  { %v1285_v25 = vpop.permute.xlu1 %1284  ;;  %v1348_v54 = vpop.permute.xlu0 %1347 }
 0x44f   :  { %1808 = vst.msk [vmem:[%s3723_s5 + $0xbc] sm:$0xf] %vm898_vm1, %v1285_v25  ;;  %1823 = vst.msk [vmem:[%s3724_s6 + $0xb8] sm:$0xf] %vm898_vm1, %v1348_v54 }
 0x452   :  { %v1480_v45 = vpop.permute.xlu1 %1479  ;;  %v1543_v42 = vpop.permute.xlu0 %1542 }
 0x453   :  { %1856 = vst.msk [vmem:[%s3723_s5 + $0xfc] sm:$0xf] %vm898_vm1, %v1480_v45  ;;  %1871 = vst.msk [vmem:[%s3724_s6 + $0xf8] sm:$0xf] %vm898_vm1, %v1543_v42 }
 0x456   :  { %v1155_v29 = vpop.permute.xlu1 %1154  ;;  %v1608_v58 = vpop.permute.xlu0 %1607 }
 0x457   :  { %1776 = vst.msk [vmem:[%s3724_s6 + $0x7c] sm:$0xf] %vm898_vm1, %v1155_v29  ;;  %1887 = vst.msk [vmem:[%s3725_s7 + $0xf8] sm:$0xf] %vm898_vm1, %v1608_v58 }
 0x45a   :  { %v1350_v16 = vpop.permute.xlu1 %1349 }
 0x45b   :  { %1824 = vst.msk [vmem:[%s3724_s6 + $0xbc] sm:$0xf] %vm898_vm1, %v1350_v16 }
 0x45e   :  { %v1545_v32 = vpop.permute.xlu1 %1544 }
 0x45f   :  { %1872 = vst.msk [vmem:[%s3724_s6 + $0xfc] sm:$0xf] %vm898_vm1, %v1545_v32 }
 0x462   :  { %v1610_v50 = vpop.permute.xlu1 %1609 }
 0x463   :  { %1888 = vst.msk [vmem:[%s3725_s7 + $0xfc] sm:$0xf] %vm898_vm1, %v1610_v50 }

// kernel: lbmil_forward.5
= control target key start
LH: loop header
LB: loop body
LE: loop exit
PB: predicated region body
PF: predicated region fallthrough
CT: control target
= control target key end

     0   :  { %s3212_s0 = inlined_call_operand.vmem [shape: f32[128,128], index: 0, kind: input, shape index: {}]   ;;  %s3213_s1 = inlined_call_operand.vmem [shape: f32[128,128], index: 1, kind: input, shape index: {}]   ;;  %s3214_s2 = inlined_call_operand.vmem [shape: f32[16,128], index: 2, kind: input, shape index: {}]   ;;  %s3215_s3 = inlined_call_operand.vmem [shape: bf16[128,512], index: 3, kind: input, shape index: {}]   ;;  %s3216_s5 = inlined_call_operand.vmem [shape: bf16[512,128], index: 5, kind: input, shape index: {}]   ;;  %s3217_s4 = inlined_call_operand.vmem [shape: f32[1,512], index: 4, kind: input, shape index: {}]   ;;  %s3218_s6 = inlined_call_operand.vmem [shape: f32[8,128], index: 6, kind: output, shape index: {}]  }
   0x1   :  { %v2186_v0 = vld [vmem:[%s3214_s2 + $0x3] ss:$0 sm:$0xff]  ;;  %v30_v4 = vld [vmem:[%s3212_s0 + $0x10] sm:$0xff]  ;;  %v29_v6 = vld [vmem:[%s3212_s0 + $0x8] sm:$0xff] }
   0x2   :  { %v28_v1 = vld [vmem:[%s3212_s0] sm:$0xff]  ;;  %v46_v5 = vld [vmem:[%s3213_s1 + $0x10] sm:$0xff]  ;;  %v45_v8 = vld [vmem:[%s3213_s1 + $0x8] sm:$0xff] }
   0x3   :  { %v44_v2 = vld [vmem:[%s3213_s1] sm:$0xff]  ;;  %v62_v7 = vadd.f32 %v46_v5, %v30_v4  ;;  %v31_v9 = vld [vmem:[%s3212_s0 + $0x18] sm:$0xff]  ;;  %v61_v12 = vadd.f32 %v45_v8, %v29_v6  ;;  %v33_v16 = vld [vmem:[%s3212_s0 + $0x28] sm:$0xff] }
   0x4   :  { %v60_v3 = vadd.f32 %v44_v2, %v28_v1  ;;  %v47_v10 = vld [vmem:[%s3213_s1 + $0x18] sm:$0xff]  ;;  %v32_v14 = vld [vmem:[%s3212_s0 + $0x20] sm:$0xff]  ;;  %v49_v18 = vld [vmem:[%s3213_s1 + $0x28] sm:$0xff] }
   0x5   :  { %v63_v13 = vadd.f32 %v47_v10, %v31_v9  ;;  %v48_v15 = vld [vmem:[%s3213_s1 + $0x20] sm:$0xff]  ;;  %v2225_v17 = vadd.f32 %v2186_v0, %v62_v7  ;;  %v2232_v19 = vadd.f32 %v2186_v0, %v61_v12  ;;  %v65_v22 = vadd.f32 %v49_v18, %v33_v16  ;;  %v34_v23 = vld [vmem:[%s3212_s0 + $0x30] sm:$0xff]  ;;  %v35_v25 = vld [vmem:[%s3212_s0 + $0x38] sm:$0xff] }
   0x6   :  { %v2213_v11 = vadd.f32 %v2186_v0, %v60_v3  ;;  %v64_v20 = vadd.f32 %v48_v15, %v32_v14  ;;  %v50_v24 = vld [vmem:[%s3213_s1 + $0x30] sm:$0xff]  ;;  %v51_v26 = vld [vmem:[%s3213_s1 + $0x38] sm:$0xff]  ;;  %v36_v31 = vld [vmem:[%s3212_s0 + $0x40] sm:$0xff] }
   0x7   :  { %100 = vadd.xlane.f32.xlu1 %v2225_v17  ;;  %v2236_v21 = vadd.f32 %v2186_v0, %v63_v13  ;;  %v66_v28 = vadd.f32 %v50_v24, %v34_v23  ;;  %v2256_v29 = vadd.f32 %v2186_v0, %v65_v22  ;;  %v67_v30 = vadd.f32 %v51_v26, %v35_v25  ;;  %v52_v32 = vld [vmem:[%s3213_s1 + $0x40] sm:$0xff]  ;;  %v37_v33 = vld [vmem:[%s3212_s0 + $0x48] sm:$0xff]  ;;  %v38_v39 = vld [vmem:[%s3212_s0 + $0x50] sm:$0xff] }
   0x8   :  { %96 = vadd.xlane.f32.xlu0 %v2213_v11  ;;  %v2252_v27 = vadd.f32 %v2186_v0, %v64_v20  ;;  %v53_v34 = vld [vmem:[%s3213_s1 + $0x48] sm:$0xff]  ;;  %v68_v36 = vadd.f32 %v52_v32, %v36_v31  ;;  %v54_v40 = vld [vmem:[%s3213_s1 + $0x50] sm:$0xff]  ;;  %v39_v41 = vld [vmem:[%s3212_s0 + $0x58] sm:$0xff] }
   0x9   :  { %3229 = vst [vmem:[#allocation3_spill] sm:$0xff] %v2256_v29  ;;  %v2272_v35 = vadd.f32 %v2186_v0, %v66_v28  ;;  %v2276_v37 = vadd.f32 %v2186_v0, %v67_v30  ;;  %v69_v38 = vadd.f32 %v53_v34, %v37_v33  ;;  %v55_v42 = vld [vmem:[%s3213_s1 + $0x58] sm:$0xff]  ;;  %v70_v44 = vadd.f32 %v54_v40, %v38_v39  ;;  %v40_v47 = vld [vmem:[%s3212_s0 + $0x60] sm:$0xff]  ;;  %v41_v49 = vld [vmem:[%s3212_s0 + $0x68] sm:$0xff] }
   0xa   :  { %3228 = vst [vmem:[#allocation2_spill] sm:$0xff] %v2252_v27  ;;  %v2292_v43 = vadd.f32 %v2186_v0, %v68_v36  ;;  %v71_v46 = vadd.f32 %v55_v42, %v39_v41  ;;  %v56_v48 = vld [vmem:[%s3213_s1 + $0x60] sm:$0xff]  ;;  %v57_v50 = vld [vmem:[%s3213_s1 + $0x68] sm:$0xff]  ;;  %v42_v55 = vld [vmem:[%s3212_s0 + $0x70] sm:$0xff] }
   0xb   :  { %102 = vadd.xlane.f32.xlu1 %v2236_v21  ;;  %3230 = vst [vmem:[#allocation4_spill] sm:$0xff] %v2272_v35  ;;  %3231 = vst [vmem:[#allocation5_spill] sm:$0xff] %v2276_v37  ;;  %v2296_v45 = vadd.f32 %v2186_v0, %v69_v38  ;;  %v2312_v51 = vadd.f32 %v2186_v0, %v70_v44  ;;  %v72_v52 = vadd.f32 %v56_v48, %v40_v47  ;;  %v58_v56 = vld [vmem:[%s3213_s1 + $0x70] sm:$0xff]  ;;  %v43_v57 = vld [vmem:[%s3212_s0 + $0x78] sm:$0xff] }
   0xc   :  { %98 = vadd.xlane.f32.xlu0 %v2232_v19  ;;  %3232 = vst [vmem:[#allocation6_spill] sm:$0xff] %v2292_v43  ;;  %v2316_v53 = vadd.f32 %v2186_v0, %v71_v46  ;;  %v73_v54 = vadd.f32 %v57_v50, %v41_v49  ;;  %v59_v58 = vld [vmem:[%s3213_s1 + $0x78] sm:$0xff]  ;;  %v74_v60 = vadd.f32 %v58_v56, %v42_v55  ;;  %v1907_v2 = vld [vmem:[%s3215_s3 + $0xe4] ss:$16 sps:$4 sm:$0xff]   ;;  %v1911_v4 = vld [vmem:[%s3215_s3 + $0xe0] ss:$16 sps:$4 sm:$0xff]  }
   0xd   :  { %3233 = vst [vmem:[#allocation7_spill] sm:$0xff] %v2296_v45  ;;  %3234 = vst [vmem:[#allocation8_spill] sm:$0xff] %v2312_v51  ;;  %v2332_v59 = vadd.f32 %v2186_v0, %v72_v52  ;;  %v75_v62 = vadd.f32 %v59_v58, %v43_v57  ;;  %v1909_v3 = vld [vmem:[%s3215_s3 + $0xec] ss:$16 sps:$4 sm:$0xff]   ;;  %535 = vmatprep.subr.bf16.mxu0 %v1907_v2  ;;  %v1913_v49 = vld [vmem:[%s3215_s3 + $0xc4] ss:$16 sps:$4 sm:$0xff]  }
   0xe   :  { %3235 = vst [vmem:[#allocation9_spill] sm:$0xff] %v2316_v53  ;;  %v2336_v61 = vadd.f32 %v2186_v0, %v73_v54  ;;  %v2340_v63 = vadd.f32 %v2186_v0, %v74_v60  ;;  %648 = vmatprep.subr.bf16.mxu1 %v1909_v3  ;;  %536 = vmatpush1.bf16.msra.mxu0 %v1911_v4  ;;  %v1915_v50 = vld [vmem:[%s3215_s3 + $0xcc] ss:$16 sps:$4 sm:$0xff]   ;;  %v1917_v54 = vld [vmem:[%s3215_s3 + $0xc0] ss:$16 sps:$4 sm:$0xff]  }
   0xf   :  { %106 = vadd.xlane.f32.xlu1 %v2256_v29  ;;  %v2344_v1 = vadd.f32 %v2186_v0, %v75_v62  ;;  %v1912_v0 = vld [vmem:[%s3215_s3 + $0xe8] ss:$16 sps:$4 sm:$0xff]   ;;  %537 = vmatprep.subr.bf16.mxu0 %v1913_v49 }
  0x10   :  { %104 = vadd.xlane.f32.xlu0 %v2252_v27  ;;  %649 = vmatpush1.bf16.msra.mxu1 %v1912_v0  ;;  %v1918_v55 = vld [vmem:[%s3215_s3 + $0xc8] ss:$16 sps:$4 sm:$0xff]   ;;  %v1919_v0 = vld [vmem:[%s3215_s3 + $0xa4] ss:$16 sps:$4 sm:$0xff]  }
  0x11   :  { %650 = vmatprep.subr.bf16.mxu1 %v1915_v50  ;;  %v1936_v49 = vld [vmem:[%s3215_s3 + $0x68] ss:$16 sps:$4 sm:$0xff]  }
  0x12   :  { %538 = vmatpush1.bf16.msra.mxu0 %v1917_v54  ;;  %v1939_v54 = vld [vmem:[%s3215_s3 + $0x4c] ss:$16 sps:$4 sm:$0xff]  }
  0x13   :  { %110 = vadd.xlane.f32.xlu1 %v2276_v37  ;;  %539 = vmatprep.subr.bf16.mxu0 %v1919_v0  ;;  %v1951_v0 = vld [vmem:[%s3215_s3 + $0xc] ss:$16 sps:$4 sm:$0xff]  }
  0x14   :  { %108 = vadd.xlane.f32.xlu0 %v2272_v35  ;;  %651 = vmatpush1.bf16.msra.mxu1 %v1918_v55  ;;  %v1941_v55 = vld [vmem:[%s3215_s3 + $0x40] ss:$16 sps:$4 sm:$0xff]  }
  0x17   :  { %114 = vadd.xlane.f32.xlu1 %v2296_v45 }
  0x18   :  { %112 = vadd.xlane.f32.xlu0 %v2292_v43 }
  0x1b   :  { %118 = vadd.xlane.f32.xlu1 %v2316_v53 }
  0x1c   :  { %116 = vadd.xlane.f32.xlu0 %v2312_v51 }
  0x1f   :  { %122 = vadd.xlane.f32.xlu1 %v2336_v61 }
  0x20   :  { %120 = vadd.xlane.f32.xlu0 %v2332_v59 }
  0x23   :  { %126 = vadd.xlane.f32.xlu1 %v2344_v1 }
  0x24   :  { %124 = vadd.xlane.f32.xlu0 %v2340_v63 }
  0x90   :  { %v101_v7 = vpop.xlane.xlu1 %100 }
  0x91   :  { %v97_v5 = vpop.xlane.xlu0 %96  ;;  %v131_v8 = vmul.f32 0.0078125, %v101_v7 }
  0x92   :  { %v129_v6 = vmul.f32 0.0078125, %v97_v5  ;;  %v1921_v5 = vld [vmem:[%s3215_s3 + $0xac] ss:$16 sps:$4 sm:$0xff]  }
  0x93   :  { %v2364_v10 = vsub.f32 %v2225_v17, %v131_v8  ;;  %v1923_v8 = vld [vmem:[%s3215_s3 + $0xa0] ss:$16 sps:$4 sm:$0xff]   ;;  %652 = vmatprep.subr.bf16.mxu1 %v1921_v5 }
  0x94   :  { %v2361_v9 = vsub.f32 %v2213_v11, %v129_v6  ;;  %v103_v15 = vpop.xlane.xlu1 %102  ;;  %540 = vmatpush1.bf16.msra.mxu0 %v1923_v8  ;;  %v1953_v5 = vld [vmem:[%s3215_s3] ss:$16 sps:$4 sm:$0xff]   ;;  %v2147_v8 = vmov 0  }
  0x95   :  { %v99_v12 = vpop.xlane.xlu0 %98  ;;  %v132_v16 = vmul.f32 0.0078125, %v103_v15  ;;  %v163_v20 = vmul.f32 %v2364_v10, %v2364_v10  ;;  %567 = vmatprep.mubr.bf16.mxu0 %v2147_v8  ;;  %680 = vmatprep.mubr.bf16.mxu1 %v2147_v8 }
  0x96   :  { %v130_v13 = vmul.f32 0.0078125, %v99_v12  ;;  %v161_v14 = vmul.f32 %v2361_v9, %v2361_v9  ;;  %v1924_v12 = vld [vmem:[%s3215_s3 + $0xa8] ss:$16 sps:$4 sm:$0xff]  }
  0x97   :  { %v2374_v22 = vsub.f32 %v2236_v21, %v132_v16  ;;  %653 = vmatpush1.bf16.msra.mxu1 %v1924_v12  ;;  %v1955_v12 = vld [vmem:[%s3216_s5 + $0x78] sm:$0xff]  }
  0x98   :  { %v2369_v18 = vsub.f32 %v2232_v19, %v130_v13  ;;  %177 = vadd.xlane.f32.xlu0 %v161_v14  ;;  %v107_v26 = vpop.xlane.xlu1 %106 }
  0x99   :  { %v105_v23 = vpop.xlane.xlu0 %104  ;;  %v134_v28 = vmul.f32 0.0078125, %v107_v26  ;;  %v164_v31 = vmul.f32 %v2374_v22, %v2374_v22 }
  0x9a   :  { %v133_v24 = vmul.f32 0.0078125, %v105_v23  ;;  %v162_v25 = vmul.f32 %v2369_v18, %v2369_v18 }
  0x9b   :  { %v2384_v32 = vsub.f32 %v2256_v29, %v134_v28 }
  0x9c   :  { %v2379_v30 = vsub.f32 %v2252_v27, %v133_v24  ;;  %181 = vadd.xlane.f32.xlu0 %v163_v20  ;;  %179 = vadd.xlane.f32.xlu1 %v162_v25  ;;  %v111_v38 = vpop.xlane.xlu1 %110  ;;  %v1925_v24 = vld [vmem:[%s3215_s3 + $0x84] ss:$16 sps:$4 sm:$0xff]   ;;  %v1927_v25 = vld [vmem:[%s3215_s3 + $0x8c] ss:$16 sps:$4 sm:$0xff]  }
  0x9d   :  { %v109_v33 = vpop.xlane.xlu0 %108  ;;  %v136_v39 = vmul.f32 0.0078125, %v111_v38  ;;  %v166_v41 = vmul.f32 %v2384_v32, %v2384_v32  ;;  %541 = vmatprep.subr.bf16.mxu0 %v1925_v24  ;;  %654 = vmatprep.subr.bf16.mxu1 %v1927_v25 }
  0x9e   :  { %v135_v34 = vmul.f32 0.0078125, %v109_v33  ;;  %v165_v36 = vmul.f32 %v2379_v30, %v2379_v30  ;;  %v1930_v33 = vld [vmem:[%s3215_s3 + $0x88] ss:$16 sps:$4 sm:$0xff]  }
  0x9f   :  { %v2394_v42 = vsub.f32 %v2276_v37, %v136_v39  ;;  %655 = vmatpush1.bf16.msra.mxu1 %v1930_v33 }
  0xa0   :  { %v2389_v40 = vsub.f32 %v2272_v35, %v135_v34  ;;  %183 = vadd.xlane.f32.xlu1 %v164_v31  ;;  %185 = vadd.xlane.f32.xlu0 %v165_v36  ;;  %v115_v48 = vpop.xlane.xlu1 %114  ;;  %v1929_v31 = vld [vmem:[%s3215_s3 + $0x80] ss:$16 sps:$4 sm:$0xff]  }
  0xa1   :  { %v113_v44 = vpop.xlane.xlu0 %112  ;;  %v138_v52 = vmul.f32 0.0078125, %v115_v48  ;;  %v168_v57 = vmul.f32 %v2394_v42, %v2394_v42  ;;  %542 = vmatpush1.bf16.msra.mxu0 %v1929_v31  ;;  %v1935_v48 = vld [vmem:[%s3215_s3 + $0x60] ss:$16 sps:$4 sm:$0xff]  }
  0xa2   :  { %v137_v46 = vmul.f32 0.0078125, %v113_v44  ;;  %v167_v47 = vmul.f32 %v2389_v40, %v2389_v40  ;;  %v1931_v44 = vld [vmem:[%s3215_s3 + $0x64] ss:$16 sps:$4 sm:$0xff]  }
  0xa3   :  { %v2416_v58 = vsub.f32 %v2296_v45, %v138_v52  ;;  %543 = vmatprep.subr.bf16.mxu0 %v1931_v44  ;;  %v1937_v52 = vld [vmem:[%s3215_s3 + $0x44] ss:$16 sps:$4 sm:$0xff]  }
  0xa4   :  { %v2411_v56 = vsub.f32 %v2292_v43, %v137_v46  ;;  %187 = vadd.xlane.f32.xlu1 %v166_v41  ;;  %189 = vadd.xlane.f32.xlu0 %v167_v47  ;;  %v119_v3 = vpop.xlane.xlu1 %118 }
  0xa5   :  { %v117_v60 = vpop.xlane.xlu0 %116  ;;  %v140_v4 = vmul.f32 0.0078125, %v119_v3  ;;  %v170_v7 = vmul.f32 %v2416_v58, %v2416_v58  ;;  %544 = vmatpush1.bf16.msra.mxu0 %v1935_v48  ;;  %v1948_v3 = vld [vmem:[%s3215_s3 + $0x28] ss:$16 sps:$4 sm:$0xff]  }
  0xa6   :  { %v139_v62 = vmul.f32 0.0078125, %v117_v60  ;;  %v169_v2 = vmul.f32 %v2411_v56, %v2411_v56  ;;  %545 = vmatprep.subr.bf16.mxu0 %v1937_v52  ;;  %v1943_v60 = vld [vmem:[%s3215_s3 + $0x24] ss:$16 sps:$4 sm:$0xff]  }
  0xa7   :  { %v2438_v13 = vsub.f32 %v2316_v53, %v140_v4  ;;  %v1949_v4 = vld [vmem:[%s3215_s3 + $0x4] ss:$16 sps:$4 sm:$0xff]  }
  0xa8   :  { %v2427_v6 = vsub.f32 %v2312_v51, %v139_v62  ;;  %191 = vadd.xlane.f32.xlu1 %v168_v57  ;;  %193 = vadd.xlane.f32.xlu0 %v169_v2  ;;  %v123_v20 = vpop.xlane.xlu1 %122  ;;  %v1942_v57 = vld [vmem:[%s3215_s3 + $0x48] ss:$16 sps:$4 sm:$0xff]   ;;  %v1945_v62 = vld [vmem:[%s3215_s3 + $0x2c] ss:$16 sps:$4 sm:$0xff]   ;;  %v1947_v2 = vld [vmem:[%s3215_s3 + $0x20] ss:$16 sps:$4 sm:$0xff]  }
  0xa9   :  { %v121_v14 = vpop.xlane.xlu0 %120  ;;  %v142_v23 = vmul.f32 0.0078125, %v123_v20  ;;  %v172_v28 = vmul.f32 %v2438_v13, %v2438_v13  ;;  %546 = vmatpush1.bf16.msra.mxu0 %v1941_v55 }
  0xaa   :  { %v141_v15 = vmul.f32 0.0078125, %v121_v14  ;;  %v171_v16 = vmul.f32 %v2427_v6, %v2427_v6  ;;  %547 = vmatprep.subr.bf16.mxu0 %v1943_v60  ;;  %v1957_v14 = vld [vmem:[%s3216_s5 + $0xf8] sm:$0xff]  }
  0xab   :  { %v2460_v34 = vsub.f32 %v2336_v61, %v142_v23  ;;  %v1933_v61 = vld [vmem:[%s3215_s3 + $0x6c] ss:$16 sps:$4 sm:$0xff]  }
  0xac   :  { %v2449_v26 = vsub.f32 %v2332_v59, %v141_v15  ;;  %195 = vadd.xlane.f32.xlu1 %v170_v7  ;;  %197 = vadd.xlane.f32.xlu0 %v171_v16  ;;  %v127_v39 = vpop.xlane.xlu1 %126  ;;  %v1954_v7 = vld [vmem:[%s3215_s3 + $0x8] ss:$16 sps:$4 sm:$0xff]  }
  0xad   :  { %v125_v36 = vpop.xlane.xlu0 %124  ;;  %v144_v41 = vmul.f32 0.0078125, %v127_v39  ;;  %v174_v47 = vmul.f32 %v2460_v34, %v2460_v34  ;;  %656 = vmatprep.subr.bf16.mxu1 %v1933_v61  ;;  %548 = vmatpush1.bf16.msra.mxu0 %v1947_v2 }
  0xae   :  { %v143_v59 = vmul.f32 0.0078125, %v125_v36  ;;  %v173_v38 = vmul.f32 %v2449_v26, %v2449_v26  ;;  %657 = vmatpush1.bf16.msra.mxu1 %v1936_v49  ;;  %549 = vmatprep.subr.bf16.mxu0 %v1949_v4 }
  0xaf   :  { %v2482_v50 = vsub.f32 %v2344_v1, %v144_v41  ;;  %658 = vmatprep.subr.bf16.mxu1 %v1939_v54 }
  0xb0   :  { %v2471_v46 = vsub.f32 %v2340_v63, %v143_v59  ;;  %199 = vadd.xlane.f32.xlu1 %v172_v28  ;;  %201 = vadd.xlane.f32.xlu0 %v173_v38 }
  0xb1   :  { %v176_v1 = vmul.f32 %v2482_v50, %v2482_v50  ;;  %550 = vmatpush1.bf16.msra.mxu0 %v1953_v5 }
  0xb2   :  { %v175_v63 = vmul.f32 %v2471_v46, %v2471_v46  ;;  %659 = vmatpush1.bf16.msra.mxu1 %v1942_v57  ;;  %1778 = vmatprep.subr.bf16.mxu0 %v1955_v12  ;;  %v2536_v57 = vld [vmem:[%s3214_s2 + $0x4] ss:$0 sm:$0xff]  ;;  %v2543_v12 = vld [vmem:[%s3214_s2 + $0x5] ss:$0 sm:$0xff] }
  0xb3   :  { %660 = vmatprep.subr.bf16.mxu1 %v1945_v62 }
  0xb4   :  { %203 = vadd.xlane.f32.xlu1 %v174_v47  ;;  %205 = vadd.xlane.f32.xlu0 %v175_v63 }
  0xb6   :  { %661 = vmatpush1.bf16.msra.mxu1 %v1948_v3 }
  0xb7   :  { %662 = vmatprep.subr.bf16.mxu1 %v1951_v0 }
  0xb8   :  { %207 = vadd.xlane.f32.xlu1 %v176_v1 }
  0xba   :  { %663 = vmatpush1.bf16.msra.mxu1 %v1954_v7 }
  0xbb   :  { %1842 = vmatprep.subr.bf16.mxu1 %v1957_v14 }
 0x121   :  { %v178_v15 = vpop.xlane.xlu0 %177 }
 0x122   :  { %v209_v16 = vmul.f32 0.0078125, %v178_v15 }
 0x124   :  { %v225_v20 = vadd.f32 1e-05, %v209_v16 }
 0x125   :  { %v180_v23 = vpop.xlane.xlu1 %179  ;;  %v182_v24 = vpop.xlane.xlu0 %181 }
 0x126   :  { %1987 = vrsqrt.f32 %v225_v20  ;;  %v210_v25 = vmul.f32 0.0078125, %v180_v23  ;;  %v211_v28 = vmul.f32 0.0078125, %v182_v24 }
 0x128   :  { %v226_v31 = vadd.f32 1e-05, %v210_v25  ;;  %v227_v33 = vadd.f32 1e-05, %v211_v28 }
 0x129   :  { %v184_v36 = vpop.xlane.xlu1 %183  ;;  %v186_v59 = vpop.xlane.xlu0 %185 }
 0x12a   :  { %1989 = vrsqrt.f32 %v226_v31  ;;  %v212_v38 = vmul.f32 0.0078125, %v184_v36  ;;  %v213_v41 = vmul.f32 0.0078125, %v186_v59  ;;  %v1956_v31 = vld [vmem:[%s3216_s5 + $0x38] sm:$0xff]  }
 0x12b   :  { %1991 = vrsqrt.f32 %v227_v33  ;;  %v1958_v33 = vld [vmem:[%s3216_s5 + $0xb8] sm:$0xff]  }
 0x12c   :  { %v228_v39 = vadd.f32 1e-05, %v212_v38  ;;  %v229_v47 = vadd.f32 1e-05, %v213_v41 }
 0x12d   :  { %v188_v44 = vpop.xlane.xlu1 %187  ;;  %v190_v49 = vpop.xlane.xlu0 %189 }
 0x12e   :  { %1993 = vrsqrt.f32 %v228_v39  ;;  %v214_v61 = vmul.f32 0.0078125, %v188_v44  ;;  %v215_v1 = vmul.f32 0.0078125, %v190_v49 }
 0x130   :  { %v230_v48 = vadd.f32 1e-05, %v214_v61  ;;  %v231_v2 = vadd.f32 1e-05, %v215_v1 }
 0x131   :  { %v192_v63 = vpop.xlane.xlu1 %191  ;;  %v194_v4 = vpop.xlane.xlu0 %193 }
 0x132   :  { %1995 = vrsqrt.f32 %v230_v48  ;;  %v216_v52 = vmul.f32 0.0078125, %v192_v63  ;;  %v217_v16 = vmul.f32 0.0078125, %v194_v4  ;;  %v1960_v63 = vld [vmem:[%s3216_s5 + $0x30] sm:$0xff]   ;;  %v1964_v4 = vld [vmem:[%s3216_s5 + $0x28] sm:$0xff]  }
 0x133   :  { %v1988_v54 = vpop.eup %1987  ;;  %1997 = vrsqrt.f32 %v229_v47 }
 0x134   :  { %v257_v55 = vmul.f32 %v1988_v54, %v2361_v9  ;;  %v232_v60 = vadd.f32 1e-05, %v216_v52  ;;  %v233_v39 = vadd.f32 1e-05, %v217_v16  ;;  %v1962_v52 = vld [vmem:[%s3216_s5 + $0xb0] sm:$0xff]   ;;  %v1963_v54 = vld [vmem:[%s3216_s5 + $0x68] sm:$0xff]  }
 0x135   :  { %v196_v3 = vpop.xlane.xlu1 %195  ;;  %v198_v61 = vpop.xlane.xlu0 %197 }
 0x136   :  { %v277_v5 = vmul.f32 %v2536_v57, %v257_v55  ;;  %1999 = vrsqrt.f32 %v232_v60  ;;  %v218_v9 = vmul.f32 0.0078125, %v196_v3  ;;  %v219_v1 = vmul.f32 0.0078125, %v198_v61 }
 0x137   :  { %v1990_v62 = vpop.eup %1989  ;;  %2001 = vrsqrt.f32 %v231_v2 }
 0x138   :  { %v258_v0 = vmul.f32 %v1990_v62, %v2369_v18  ;;  %v1992_v7 = vpop.eup %1991  ;;  %v297_v20 = vadd.f32 %v2543_v12, %v277_v5  ;;  %v234_v25 = vadd.f32 1e-05, %v218_v9  ;;  %v1969_v9 = vld [vmem:[%s3216_s5 + $0xe0] sm:$0xff]  }
 0x139   :  { %v259_v18 = vmul.f32 %v1992_v7, %v2364_v10  ;;  %v200_v59 = vpop.xlane.xlu1 %199  ;;  %v1959_v10 = vld [vmem:[%s3216_s5 + $0x70] sm:$0xff]  }
 0x13a   :  { %v278_v14 = vmul.f32 %v2536_v57, %v258_v0  ;;  %2003 = vrsqrt.f32 %v234_v25  ;;  %v220_v47 = vmul.f32 0.0078125, %v200_v59  ;;  %v1966_v0 = vld [vmem:[%s3216_s5 + $0xa8] sm:$0xff]   ;;  %v1968_v25 = vld [vmem:[%s3216_s5 + $0x20] sm:$0xff]  }
 0x13b   :  { %v1994_v15 = vpop.eup %1993  ;;  %v279_v41 = vmul.f32 %v2536_v57, %v259_v18  ;;  %2005 = vrsqrt.f32 %v233_v39 }
 0x13c   :  { %v298_v23 = vadd.f32 %v2543_v12, %v278_v14  ;;  %v260_v24 = vmul.f32 %v1994_v15, %v2374_v22  ;;  %v1961_v22 = vld [vmem:[%s3216_s5 + $0xf0] sm:$0xff]   ;;  %v236_v62 = vadd.f32 1e-05, %v220_v47  ;;  %v235_v15 = vadd.f32 1e-05, %v219_v1 }
 0x13d   :  { %v299_v55 = vadd.f32 %v2543_v12, %v279_v41  ;;  %v204_v7 = vpop.xlane.xlu1 %203 }
 0x13e   :  { %v313_v28 = vpack.c.bf16 %v298_v23, %v297_v20  ;;  %v280_v38 = vmul.f32 %v2536_v57, %v260_v24  ;;  %v202_v20 = vpop.xlane.xlu0 %201  ;;  %2007 = vrsqrt.f32 %v236_v62  ;;  %v222_v23 = vmul.f32 0.0078125, %v204_v7 }
 0x13f   :  { %v1996_v36 = vpop.eup %1995  ;;  %2009 = vrsqrt.f32 %v235_v15 }
 0x140   :  { %568 = vmatmul.mubr.bf16.vlgmr.msra.gmra.mxu0 %v313_v28  ;;  %681 = vmatmul.mubr.bf16.vlgmr.msra.gmra.mxu1 %v313_v28  ;;  %v1998_v44 = vpop.eup %1997  ;;  %v300_v48 = vadd.f32 %v2543_v12, %v280_v38  ;;  %v262_v49 = vmul.f32 %v1996_v36, %v2384_v32  ;;  %v1965_v32 = vld [vmem:[%s3216_s5 + $0xe8] sm:$0xff]   ;;  %v1970_v28 = vld [vmem:[%s3216_s5 + $0xa0] sm:$0xff]   ;;  %v238_v59 = vadd.f32 1e-05, %v222_v23 }
 0x141   :  { %577 = vmatprep.mubr.bf16.mxu0 %v2147_v8  ;;  %690 = vmatprep.mubr.bf16.mxu1 %v2147_v8  ;;  %v261_v60 = vmul.f32 %v1998_v44, %v2379_v30  ;;  %v1967_v30 = vld [vmem:[%s3216_s5 + $0x60] sm:$0xff]   ;;  %v208_v39 = vpop.xlane.xlu1 %207 }
 0x142   :  { %1779 = vmatpush3.bf16.msra.mxu0 %v1956_v31  ;;  %1843 = vmatpush3.bf16.msra.mxu1 %v1958_v33  ;;  %v314_v2 = vpack.c.bf16 %v300_v48, %v299_v55  ;;  %v282_v3 = vmul.f32 %v2536_v57, %v262_v49  ;;  %v1971_v31 = vld [vmem:[%s3216_s5 + $0x58] sm:$0xff]   ;;  %v221_v33 = vmul.f32 0.0078125, %v202_v20  ;;  %v206_v47 = vpop.xlane.xlu0 %205  ;;  %2011 = vrsqrt.f32 %v238_v59 }
 0x143   :  { %1780 = vmatprep.subr.bf16.mxu0 %v1959_v10  ;;  %1844 = vmatprep.subr.bf16.mxu1 %v1961_v22  ;;  %v2000_v5 = vpop.eup %1999  ;;  %v281_v16 = vmul.f32 %v2536_v57, %v261_v60 }
 0x144   :  { %v2002_v14 = vpop.eup %2001  ;;  %v302_v18 = vadd.f32 %v2543_v12, %v282_v3  ;;  %v264_v24 = vmul.f32 %v2000_v5, %v2394_v42  ;;  %v237_v41 = vadd.f32 1e-05, %v221_v33 }
 0x145   :  { %v301_v42 = vadd.f32 %v2543_v12, %v281_v16  ;;  %v263_v36 = vmul.f32 %v2002_v14, %v2389_v40  ;;  %v224_v40 = vmul.f32 0.0078125, %v208_v39  ;;  %v1978_v39 = vld [vmem:[%s3216_s5 + $0x90] sm:$0xff]  }
 0x146   :  { %1781 = vmatpush3.bf16.msra.mxu0 %v1960_v63  ;;  %1845 = vmatpush3.bf16.msra.mxu1 %v1962_v52  ;;  %v284_v10 = vmul.f32 %v2536_v57, %v264_v24  ;;  %2013 = vrsqrt.f32 %v237_v41  ;;  %v223_v63 = vmul.f32 0.0078125, %v206_v47  ;;  %v1979_v41 = vld [vmem:[%s3216_s5 + $0x48] sm:$0xff]  }
 0x147   :  { %1782 = vmatprep.subr.bf16.mxu0 %v1963_v54  ;;  %1846 = vmatprep.subr.bf16.mxu1 %v1965_v32  ;;  %v315_v38 = vpack.c.bf16 %v302_v18, %v301_v42  ;;  %v2004_v22 = vpop.eup %2003  ;;  %v283_v44 = vmul.f32 %v2536_v57, %v263_v36  ;;  %v240_v32 = vadd.f32 1e-05, %v224_v40  ;;  %v1982_v47 = vld [vmem:[%s3216_s5 + $0x88] sm:$0xff]   ;;  %v1983_v40 = vld [vmem:[%s3216_s5 + $0x40] sm:$0xff]  }
 0x148   :  { %578 = vmatmul.mubr.bf16.gmra.mxu0 %v314_v2  ;;  %691 = vmatmul.mubr.bf16.gmra.mxu1 %v314_v2  ;;  %v2006_v61 = vpop.eup %2005  ;;  %v304_v48 = vadd.f32 %v2543_v12, %v284_v10  ;;  %v266_v49 = vmul.f32 %v2004_v22, %v2416_v58  ;;  %v239_v62 = vadd.f32 1e-05, %v223_v63  ;;  %v1972_v10 = vld [vmem:[%s3216_s5 + $0x18] sm:$0xff]   ;;  %v1976_v22 = vld [vmem:[%s3216_s5 + $0x10] sm:$0xff]   ;;  %v1986_v63 = vld [vmem:[%s3216_s5 + $0x80] sm:$0xff]  }
 0x149   :  { %587 = vmatprep.mubr.bf16.mxu0 %v2147_v8  ;;  %700 = vmatprep.mubr.bf16.mxu1 %v2147_v8  ;;  %v303_v52 = vadd.f32 %v2543_v12, %v283_v44  ;;  %v265_v54 = vmul.f32 %v2006_v61, %v2411_v56  ;;  %2015 = vrsqrt.f32 %v240_v32  ;;  %v1981_v44 = vld [vmem:[%s3216_s5 + $0xc8] sm:$0xff]  }
 0x14a   :  { %1783 = vmatpush3.bf16.msra.mxu0 %v1964_v4  ;;  %1847 = vmatpush3.bf16.msra.mxu1 %v1966_v0  ;;  %v286_v55 = vmul.f32 %v2536_v57, %v266_v49  ;;  %2017 = vrsqrt.f32 %v239_v62  ;;  %v1980_v61 = vld [vmem:[%s3216_s5 + $0x8] sm:$0xff]   ;;  %v1984_v49 = vld [vmem:[%s3216_s5] sm:$0xff]  }
 0x14b   :  { %1784 = vmatprep.subr.bf16.mxu0 %v1967_v30  ;;  %1848 = vmatprep.subr.bf16.mxu1 %v1969_v9  ;;  %v316_v1 = vpack.c.bf16 %v304_v48, %v303_v52  ;;  %v2008_v60 = vpop.eup %2007  ;;  %v285_v2 = vmul.f32 %v2536_v57, %v265_v54  ;;  %v1985_v48 = vld [vmem:[%s3216_s5 + $0xc0] sm:$0xff]   ;;  %v355_v52 = vlaneseq }
 0x14c   :  { %v2010_v3 = vpop.eup %2009  ;;  %v306_v58 = vadd.f32 %v2543_v12, %v286_v55  ;;  %v268_v56 = vmul.f32 %v2008_v60, %v2438_v13 }
 0x14d   :  { %v305_v4 = vadd.f32 %v2543_v12, %v285_v2  ;;  %v267_v0 = vmul.f32 %v2010_v3, %v2427_v6  ;;  %v2694_v54 = vshrl.u32 %v355_v52, 7 }
 0x14e   :  { %1785 = vmatpush3.bf16.msra.mxu0 %v1968_v25  ;;  %1849 = vmatpush3.bf16.msra.mxu1 %v1970_v28  ;;  %v288_v7 = vmul.f32 %v2536_v57, %v268_v56 }
 0x14f   :  { %1786 = vmatprep.subr.bf16.mxu0 %v1971_v31  ;;  %v317_v5 = vpack.c.bf16 %v306_v58, %v305_v4  ;;  %v2012_v30 = vpop.eup %2011  ;;  %v287_v9 = vmul.f32 %v2536_v57, %v267_v0  ;;  %3236 = vst [vmem:[#allocation10_spill] sm:$0xff] %v2694_v54  ;;  %v357_v32 = vsub.s32 0, %v2694_v54  ;;  %v365_v55 = vsub.s32 2, %v2694_v54 }
 0x150   :  { %588 = vmatmul.mubr.bf16.gmra.mxu0 %v315_v38  ;;  %701 = vmatmul.mubr.bf16.gmra.mxu1 %v315_v38  ;;  %v308_v13 = vadd.f32 %v2543_v12, %v288_v7  ;;  %v270_v15 = vmul.f32 %v2012_v30, %v2460_v34  ;;  %v361_v60 = vsub.s32 1, %v2694_v54  ;;  %v369_v2 = vsub.s32 3, %v2694_v54 }
 0x151   :  { %597 = vmatprep.mubr.bf16.mxu0 %v2147_v8  ;;  %710 = vmatprep.mubr.bf16.mxu1 %v2147_v8  ;;  %v307_v16 = vadd.f32 %v2543_v12, %v287_v9 }
 0x152   :  { %v290_v23 = vmul.f32 %v2536_v57, %v270_v15  ;;  %1787 = vmatpush3.bf16.msra.mxu0 %v1972_v10 }
 0x153   :  { %v2014_v14 = vpop.eup %2013  ;;  %v318_v20 = vpack.c.bf16 %v308_v13, %v307_v16 }
 0x154   :  { %v269_v6 = vmul.f32 %v2014_v14, %v2449_v26  ;;  %v310_v28 = vadd.f32 %v2543_v12, %v290_v23 }
 0x156   :  { %v2016_v18 = vpop.eup %2015  ;;  %v289_v24 = vmul.f32 %v2536_v57, %v269_v6 }
 0x157   :  { %v2018_v25 = vpop.eup %2017  ;;  %v272_v34 = vmul.f32 %v2016_v18, %v2482_v50 }
 0x158   :  { %598 = vmatmul.mubr.bf16.gmra.mxu0 %v316_v1  ;;  %711 = vmatmul.mubr.bf16.gmra.mxu1 %v316_v1  ;;  %v309_v31 = vadd.f32 %v2543_v12, %v289_v24  ;;  %v271_v26 = vmul.f32 %v2018_v25, %v2471_v46  ;;  %v1973_v46 = vld [vmem:[%s3216_s5 + $0xd8] sm:$0xff]   ;;  %v353_v1 = vld [vmem:[%s3217_s4] sm:$0xf] }
 0x159   :  { %607 = vmatprep.mubr.bf16.mxu0 %v2147_v8  ;;  %720 = vmatprep.mubr.bf16.mxu1 %v2147_v8  ;;  %v292_v42 = vmul.f32 %v2536_v57, %v272_v34  ;;  %v2702_v62 = vrot.slane %v353_v1, %v357_v32  ;;  %v2705_v58 = vrot.slane %v353_v1, %v365_v55 }
 0x15a   :  { %v319_v33 = vpack.c.bf16 %v310_v28, %v309_v31  ;;  %v291_v36 = vmul.f32 %v2536_v57, %v271_v26  ;;  %1850 = vmatprep.subr.bf16.mxu1 %v1973_v46  ;;  %v1975_v57 = vld [vmem:[%s3216_s5 + $0x50] sm:$0xff]   ;;  %v2707_v4 = vrot.slane %v353_v1, %v361_v60  ;;  %v2710_v30 = vrot.slane %v353_v1, %v369_v2 }
 0x15b   :  { %v312_v59 = vadd.f32 %v2543_v12, %v292_v42  ;;  %1788 = vmatprep.subr.bf16.mxu0 %v1975_v57 }
 0x15c   :  { %v311_v38 = vadd.f32 %v2543_v12, %v291_v36  ;;  %v1977_v12 = vld [vmem:[%s3216_s5 + $0xd0] sm:$0xff]   ;;  %1789 = vmatpush3.bf16.msra.mxu0 %v1976_v22 }
 0x15d   :  { %1790 = vmatprep.subr.bf16.mxu0 %v1979_v41 }
 0x15e   :  { %v320_v50 = vpack.c.bf16 %v312_v59, %v311_v38 }
 0x160   :  { %608 = vmatmul.mubr.bf16.gmra.mxu0 %v317_v5  ;;  %721 = vmatmul.mubr.bf16.gmra.mxu1 %v317_v5 }
 0x161   :  { %617 = vmatprep.mubr.bf16.mxu0 %v2147_v8  ;;  %730 = vmatprep.mubr.bf16.mxu1 %v2147_v8 }
 0x162   :  { %1791 = vmatpush3.bf16.msra.mxu0 %v1980_v61 }
 0x163   :  { %1792 = vmatprep.subr.bf16.mxu0 %v1983_v40 }
 0x166   :  { %1793 = vmatpush3.bf16.msra.mxu0 %v1984_v49 }
 0x168   :  { %618 = vmatmul.mubr.bf16.gmra.mxu0 %v318_v20  ;;  %731 = vmatmul.mubr.bf16.gmra.mxu1 %v318_v20 }
 0x169   :  { %627 = vmatprep.mubr.bf16.mxu0 %v2147_v8  ;;  %740 = vmatprep.mubr.bf16.mxu1 %v2147_v8 }
 0x170   :  { %628 = vmatmul.mubr.bf16.gmra.mxu0 %v319_v33  ;;  %741 = vmatmul.mubr.bf16.gmra.mxu1 %v319_v33 }
 0x171   :  { %637 = vmatprep.mubr.bf16.mxu0 %v2147_v8  ;;  %750 = vmatprep.mubr.bf16.mxu1 %v2147_v8  ;;  %v1974_v8 = vld [vmem:[%s3216_s5 + $0x98] sm:$0xff]  }
 0x172   :  { %1851 = vmatpush3.bf16.msra.mxu1 %v1974_v8 }
 0x173   :  { %1852 = vmatprep.subr.bf16.mxu1 %v1977_v12 }
 0x176   :  { %1853 = vmatpush3.bf16.msra.mxu1 %v1978_v39 }
 0x177   :  { %1854 = vmatprep.subr.bf16.mxu1 %v1981_v44 }
 0x178   :  { %638 = vmatmul.mubr.bf16.gmra.mxu0 %v320_v50  ;;  %751 = vmatmul.mubr.bf16.gmra.mxu1 %v320_v50 }
 0x17a   :  { %1855 = vmatpush3.bf16.msra.mxu1 %v1982_v47 }
 0x17b   :  { %1856 = vmatprep.subr.bf16.mxu1 %v1985_v48 }
 0x17e   :  { %1857 = vmatpush3.bf16.msra.mxu1 %v1986_v63 }
 0x200   :  { %v569_v3 = vpop.f32.mrf.mxu0  ;;  %v682_v56 = vpop.f32.mrf.mxu1 }
 0x201   :  { %v570_v7 = vadd.f32 %v569_v3, %v2702_v62  ;;  %v683_v9 = vadd.f32 %v682_v56, %v2705_v58 }
 0x202   :  { %v571_v0 = vpop.f32.mrf.mxu0  ;;  %v684_v5 = vpop.f32.mrf.mxu1 }
 0x203   :  { %v572_v15 = vadd.f32 %v571_v0, %v2707_v4  ;;  %v825_v23 = vmul.f32 0.70710677, %v570_v7  ;;  %v685_v18 = vadd.f32 %v684_v5, %v2710_v30  ;;  %v827_v24 = vmul.f32 0.70710677, %v683_v9 }
 0x204   :  { %v573_v14 = vpop.f32.mrf.mxu0  ;;  %v686_v13 = vpop.f32.mrf.mxu1  ;;  %v761_v0 = vmul.f32 0.5, %v570_v7  ;;  %v2728_v5 = vmul.f32 0.5, %v683_v9 }
 0x205   :  { %v574_v16 = vadd.f32 %v573_v14, %v2702_v62  ;;  %v687_v25 = vadd.f32 %v686_v13, %v2705_v58  ;;  %v826_v31 = vmul.f32 0.70710677, %v572_v15  ;;  %2019 = verf.f32 %v825_v23 }
 0x206   :  { %v575_v6 = vpop.f32.mrf.mxu0  ;;  %v688_v20 = vpop.f32.mrf.mxu1  ;;  %v828_v59 = vmul.f32 0.70710677, %v685_v18  ;;  %2021 = verf.f32 %v827_v24  ;;  %v2735_v23 = vmul.f32 0.5, %v572_v15 }
 0x207   :  { %v829_v26 = vmul.f32 0.70710677, %v574_v16  ;;  %v576_v33 = vadd.f32 %v575_v6, %v2707_v4  ;;  %v689_v38 = vadd.f32 %v688_v20, %v2710_v30  ;;  %v831_v50 = vmul.f32 0.70710677, %v687_v25 }
 0x208   :  { %v579_v28 = vpop.f32.mrf.mxu0  ;;  %v692_v34 = vpop.f32.mrf.mxu1  ;;  %2023 = verf.f32 %v826_v31  ;;  %v2738_v31 = vmul.f32 0.5, %v685_v18  ;;  %v765_v7 = vmul.f32 0.5, %v574_v16  ;;  %v2740_v9 = vmul.f32 0.5, %v687_v25 }
 0x209   :  { %v580_v46 = vadd.f32 %v579_v28, %v2702_v62  ;;  %v693_v57 = vadd.f32 %v692_v34, %v2705_v58  ;;  %2025 = verf.f32 %v829_v26  ;;  %v830_v12 = vmul.f32 0.70710677, %v576_v33 }
 0x20a   :  { %v581_v42 = vpop.f32.mrf.mxu0  ;;  %v694_v36 = vpop.f32.mrf.mxu1  ;;  %2027 = verf.f32 %v828_v59  ;;  %v832_v44 = vmul.f32 0.70710677, %v689_v38  ;;  %v2748_v15 = vmul.f32 0.5, %v689_v38 }
 0x20b   :  { %v582_v22 = vadd.f32 %v581_v42, %v2707_v4  ;;  %v695_v61 = vadd.f32 %v694_v36, %v2710_v30  ;;  %2029 = verf.f32 %v831_v50  ;;  %v833_v47 = vmul.f32 0.70710677, %v580_v46 }
 0x20c   :  { %v583_v10 = vpop.f32.mrf.mxu0  ;;  %v696_v8 = vpop.f32.mrf.mxu1  ;;  %v835_v49 = vmul.f32 0.70710677, %v693_v57  ;;  %2031 = verf.f32 %v830_v12  ;;  %v2746_v50 = vmul.f32 0.5, %v576_v33  ;;  %v2753_v18 = vmul.f32 0.5, %v693_v57 }
 0x20d   :  { %v834_v63 = vmul.f32 0.70710677, %v582_v22  ;;  %v584_v52 = vadd.f32 %v583_v10, %v2702_v62  ;;  %2033 = verf.f32 %v832_v44  ;;  %v836_v55 = vmul.f32 0.70710677, %v695_v61 }
 0x20e   :  { %v585_v39 = vpop.f32.mrf.mxu0  ;;  %v698_v41 = vpop.f32.mrf.mxu1  ;;  %v697_v60 = vadd.f32 %v696_v8, %v2705_v58  ;;  %2035 = verf.f32 %v833_v47  ;;  %v2750_v10 = vmul.f32 0.5, %v580_v46  ;;  %v2760_v33 = vmul.f32 0.5, %v582_v22 }
 0x20f   :  { %v586_v2 = vadd.f32 %v585_v39, %v2707_v4  ;;  %2037 = verf.f32 %v835_v49  ;;  %v837_v14 = vmul.f32 0.70710677, %v584_v52  ;;  %v699_v13 = vadd.f32 %v698_v41, %v2710_v30 }
 0x210   :  { %v589_v40 = vpop.f32.mrf.mxu0  ;;  %v702_v48 = vpop.f32.mrf.mxu1  ;;  %2039 = verf.f32 %v834_v63  ;;  %v839_v24 = vmul.f32 0.70710677, %v697_v60  ;;  %v2762_v38 = vmul.f32 0.5, %v695_v61 }
 0x211   :  { %2041 = verf.f32 %v836_v55  ;;  %v590_v28 = vadd.f32 %v589_v40, %v2702_v62  ;;  %v838_v26 = vmul.f32 0.70710677, %v586_v2  ;;  %v703_v8 = vadd.f32 %v702_v48, %v2705_v58 }
 0x212   :  { %v591_v32 = vpop.f32.mrf.mxu0  ;;  %v704_v1 = vpop.f32.mrf.mxu1  ;;  %2043 = verf.f32 %v837_v14  ;;  %v840_v16 = vmul.f32 0.70710677, %v699_v13  ;;  %v2764_v48 = vmul.f32 0.5, %v584_v52  ;;  %v2771_v14 = vmul.f32 0.5, %v697_v60 }
 0x213   :  { %v2020_v34 = vpop.eup %2019  ;;  %v592_v25 = vadd.f32 %v591_v32, %v2707_v4  ;;  %2045 = verf.f32 %v839_v24  ;;  %v841_v46 = vmul.f32 0.70710677, %v590_v28  ;;  %v705_v57 = vadd.f32 %v704_v1, %v2710_v30 }
 0x214   :  { %v593_v3 = vpop.f32.mrf.mxu0  ;;  %v2726_v56 = vpop.f32.mrf.mxu1  ;;  %v953_v40 = vadd.f32 1.0, %v2020_v34  ;;  %2047 = verf.f32 %v838_v26  ;;  %v2773_v22 = vmul.f32 0.5, %v586_v2  ;;  %v843_v61 = vmul.f32 0.70710677, %v703_v8 }
 0x215   :  { %v2022_v59 = vpop.eup %2021  ;;  %2049 = verf.f32 %v840_v16  ;;  %v842_v34 = vmul.f32 0.70710677, %v592_v25  ;;  %v2779_v51 = vmul.f32 0.5, %v699_v13  ;;  %v2784_v43 = vmul.f32 0.5, %v590_v28 }
 0x216   :  { %v2731_v6 = vpop.f32.mrf.mxu0  ;;  %v2733_v20 = vpop.f32.mrf.mxu1  ;;  %v955_v55 = vadd.f32 1.0, %v2022_v59  ;;  %2051 = verf.f32 %v841_v46  ;;  %v594_v59 = vadd.f32 %v593_v3, %v2702_v62  ;;  %v2782_v45 = vmul.f32 %v953_v40, %v761_v0 }
 0x217   :  { %v2024_v12 = vpop.eup %2023  ;;  %v2793_v13 = vmul.f32 0.5, %v703_v8  ;;  %2053 = verf.f32 %v843_v61  ;;  %v707_v3 = vadd.f32 %v2726_v56, %v2705_v58 }
 0x218   :  { %v2742_v42 = vpop.f32.mrf.mxu0  ;;  %v2744_v36 = vpop.f32.mrf.mxu1  ;;  %v954_v24 = vadd.f32 1.0, %v2024_v12  ;;  %v844_v12 = vmul.f32 0.70710677, %v705_v57  ;;  %v2791_v35 = vmul.f32 %v955_v55, %v2728_v5  ;;  %2055 = verf.f32 %v842_v34 }
 0x219   :  { %v2026_v44 = vpop.eup %2025  ;;  %v845_v55 = vmul.f32 0.70710677, %v594_v59 }
 0x21a   :  { %v2756_v39 = vpop.f32.mrf.mxu0  ;;  %v2758_v41 = vpop.f32.mrf.mxu1  ;;  %v957_v54 = vadd.f32 1.0, %v2026_v44  ;;  %v2798_v46 = vmul.f32 %v954_v24, %v2735_v23  ;;  %2057 = verf.f32 %v844_v12 }
 0x21b   :  { %v2028_v47 = vpop.eup %2027  ;;  %2059 = verf.f32 %v845_v55 }
 0x21c   :  { %v2767_v49 = vpop.f32.mrf.mxu0  ;;  %v2769_v63 = vpop.f32.mrf.mxu1  ;;  %v956_v53 = vadd.f32 1.0, %v2028_v47  ;;  %v2800_v28 = vmul.f32 %v957_v54, %v765_v7  ;;  %v596_v47 = vadd.f32 %v2731_v6, %v2707_v4  ;;  %v709_v7 = vadd.f32 %v2733_v20, %v2710_v30 }
 0x21d   :  { %v2030_v32 = vpop.eup %2029 }
 0x21e   :  { %v2775_v52 = vpop.f32.mrf.mxu0  ;;  %v2777_v26 = vpop.f32.mrf.mxu1  ;;  %v959_v2 = vadd.f32 1.0, %v2030_v32  ;;  %v2805_v5 = vmul.f32 %v956_v53, %v2738_v31  ;;  %v2807_v32 = vmul.f32 0.5, %v592_v25  ;;  %v2818_v53 = vmul.f32 0.5, %v705_v57 }
 0x21f   :  { %v2032_v1 = vpop.eup %2031  ;;  %v847_v31 = vmul.f32 0.70710677, %v707_v3  ;;  %v600_v25 = vadd.f32 %v2742_v42, %v2702_v62  ;;  %v1081_v34 = vpack.c.bf16 %v2800_v28, %v2782_v45 }
 0x220   :  { %v2034_v60 = vpop.eup %2033  ;;  %v2786_v16 = vpop.f32.mrf.mxu0  ;;  %v958_v8 = vadd.f32 1.0, %v2032_v1  ;;  %v2812_v23 = vmul.f32 %v959_v2, %v2740_v9  ;;  %v2824_v9 = vmul.f32 0.5, %v594_v59 }
 0x221   :  { %v2788_v44 = vpop.f32.mrf.mxu1  ;;  %v2036_v37 = vpop.eup %2035  ;;  %v960_v54 = vadd.f32 1.0, %v2034_v60  ;;  %v846_v60 = vmul.f32 0.70710677, %v596_v47  ;;  %2061 = verf.f32 %v847_v31 }
 0x222   :  { %v2038_v0 = vpop.eup %2037  ;;  %v2809_v61 = vpop.f32.mrf.mxu0  ;;  %v961_v24 = vadd.f32 1.0, %v2036_v37  ;;  %v2828_v37 = vadd.f32 %v2744_v36, %v2705_v58  ;;  %v1083_v42 = vpack.c.bf16 %v2812_v23, %v2791_v35  ;;  %v1022_v45 = vmul.f32 %v958_v8, %v2746_v50 }
 0x223   :  { %v2040_v40 = vpop.eup %2039  ;;  %v2816_v6 = vpop.f32.mrf.mxu1  ;;  %v963_v1 = vadd.f32 1.0, %v2038_v0  ;;  %v1024_v59 = vmul.f32 %v960_v54, %v2748_v15  ;;  %v848_v0 = vmul.f32 0.70710677, %v709_v7  ;;  %v849_v36 = vmul.f32 0.70710677, %v600_v25 }
 0x224   :  { %v2042_v56 = vpop.eup %2041  ;;  %v962_v12 = vadd.f32 1.0, %v2040_v40  ;;  %v2830_v20 = vpop.f32.mrf.mxu0  ;;  %v2839_v55 = vmul.f32 %v961_v24, %v2750_v10  ;;  %2063 = verf.f32 %v846_v60  ;;  %v2848_v50 = vadd.f32 %v2758_v41, %v2710_v30 }
 0x225   :  { %v2044_v2 = vpop.eup %2043  ;;  %v964_v29 = vadd.f32 1.0, %v2042_v56  ;;  %v2836_v28 = vpop.f32.mrf.mxu1  ;;  %v602_v56 = vadd.f32 %v2756_v39, %v2707_v4  ;;  %v2844_v27 = vmul.f32 %v963_v1, %v2753_v18  ;;  %v2856_v23 = vmul.f32 0.5, %v707_v3 }
 0x226   :  { %v2046_v57 = vpop.eup %2045  ;;  %v965_v35 = vadd.f32 1.0, %v2044_v2  ;;  %v2851_v8 = vmul.f32 %v962_v12, %v2760_v33  ;;  %v851_v39 = vmul.f32 0.70710677, %v2828_v37  ;;  %v2859_v54 = vpop.f32.mrf.mxu0  ;;  %2065 = verf.f32 %v848_v0 }
 0x227   :  { %v2048_v40 = vpop.eup %2047  ;;  %v2854_v10 = vmul.f32 %v964_v29, %v2762_v38  ;;  %v967_v24 = vadd.f32 1.0, %v2046_v57  ;;  %v604_v41 = vadd.f32 %v2767_v49, %v2702_v62  ;;  %v2863_v1 = vpop.f32.mrf.mxu1  ;;  %v2865_v33 = vmul.f32 0.5, %v596_v47 }
 0x228   :  { %v2050_v15 = vpop.eup %2049  ;;  %v966_v31 = vadd.f32 1.0, %v2048_v40  ;;  %2067 = verf.f32 %v849_v36  ;;  %v850_v29 = vmul.f32 0.70710677, %v602_v56  ;;  %v1082_v38 = vpack.c.bf16 %v1022_v45, %v2798_v46  ;;  %v2877_v36 = vpop.f32.mrf.mxu0 }
 0x229   :  { %v2052_v18 = vpop.eup %2051  ;;  %v2869_v60 = vmul.f32 %v965_v35, %v2764_v48  ;;  %v968_v2 = vadd.f32 1.0, %v2050_v15  ;;  %v852_v12 = vmul.f32 0.70710677, %v2848_v50  ;;  %v1084_v57 = vpack.c.bf16 %v1024_v59, %v2805_v5 }
 0x22a   :  { %v2054_v3 = vpop.eup %2053  ;;  %v969_v40 = vadd.f32 1.0, %v2052_v18  ;;  %v2873_v49 = vmul.f32 0.5, %v709_v7  ;;  %2069 = verf.f32 %v851_v39  ;;  %v717_v47 = vadd.f32 %v2769_v63, %v2705_v58  ;;  %1405 = vmatprep.mubr.bf16.mxu0 %v1082_v38  ;;  %v2885_v7 = vpop.f32.mrf.mxu1 }
 0x22b   :  { %v2056_v0 = vpop.eup %2055  ;;  %v2880_v46 = vmul.f32 %v967_v24, %v2771_v14  ;;  %v1030_v48 = vmul.f32 %v966_v31, %v2773_v22  ;;  %v853_v45 = vmul.f32 0.70710677, %v604_v41  ;;  %v606_v5 = vadd.f32 %v2775_v52, %v2707_v4  ;;  %1502 = vmatprep.mubr.bf16.mxu1 %v1084_v57  ;;  %1406 = vmatmul.mubr.bf16.vlgmr.msra.gmra.mxu0 %v1081_v34  ;;  %v2902_v24 = vpop.f32.mrf.mxu0 }
 0x22c   :  { %v2058_v59 = vpop.eup %2057  ;;  %v971_v35 = vadd.f32 1.0, %v2054_v3  ;;  %v2887_v15 = vmul.f32 0.5, %v600_v25  ;;  %2071 = verf.f32 %v850_v29  ;;  %v719_v63 = vadd.f32 %v2777_v26, %v2710_v30  ;;  %1503 = vmatmul.mubr.bf16.vlgmr.msra.gmra.mxu1 %v1083_v42 }
 0x22d   :  { %v1032_v14 = vmul.f32 %v968_v2, %v2779_v51  ;;  %v970_v22 = vadd.f32 1.0, %v2056_v0  ;;  %2073 = verf.f32 %v852_v12  ;;  %v610_v52 = vadd.f32 %v2786_v16, %v2702_v62  ;;  %v2060_v26 = vpop.eup %2059  ;;  %v2906_v16 = vpop.f32.mrf.mxu1 }
 0x22e   :  { %v2895_v34 = vmul.f32 %v969_v40, %v2784_v43  ;;  %v2898_v39 = vmul.f32 0.5, %v2828_v37  ;;  %v855_v25 = vmul.f32 0.70710677, %v717_v47  ;;  %v723_v18 = vadd.f32 %v2788_v44, %v2705_v58  ;;  %v2062_v38 = vpop.eup %2061  ;;  %v2925_v40 = vpop.f32.mrf.mxu0 }
 0x22f   :  { %v972_v42 = vadd.f32 1.0, %v2058_v59  ;;  %2075 = verf.f32 %v853_v45  ;;  %v854_v51 = vmul.f32 0.70710677, %v606_v5  ;;  %v612_v31 = vadd.f32 %v2809_v61, %v2707_v4 }
 0x230   :  { %v2909_v43 = vmul.f32 %v971_v35, %v2793_v13  ;;  %v2911_v37 = vmul.f32 0.5, %v602_v56  ;;  %v856_v29 = vmul.f32 0.70710677, %v719_v63  ;;  %v725_v44 = vadd.f32 %v2816_v6, %v2710_v30 }
 0x231   :  { %v2916_v3 = vmul.f32 %v970_v22, %v2807_v32  ;;  %v2919_v2 = vmul.f32 0.5, %v2848_v50  ;;  %v2921_v12 = vmul.f32 0.5, %v604_v41  ;;  %v857_v61 = vmul.f32 0.70710677, %v610_v52  ;;  %v2064_v57 = vpop.eup %2063  ;;  %v2932_v50 = vpop.f32.mrf.mxu1 }
 0x232   :  { %v973_v0 = vadd.f32 1.0, %v2060_v26  ;;  %v2923_v13 = vmul.f32 0.5, %v717_v47  ;;  %2077 = verf.f32 %v855_v25  ;;  %v859_v56 = vmul.f32 0.70710677, %v723_v18 }
 0x233   :  { %v2928_v6 = vmul.f32 %v972_v42, %v2818_v53  ;;  %v2930_v45 = vmul.f32 0.5, %v606_v5  ;;  %2079 = verf.f32 %v854_v51  ;;  %v858_v32 = vmul.f32 0.70710677, %v612_v31  ;;  %v2066_v41 = vpop.eup %2065 }
 0x234   :  { %v975_v59 = vadd.f32 1.0, %v2062_v38  ;;  %2081 = verf.f32 %v856_v29  ;;  %v860_v35 = vmul.f32 0.70710677, %v725_v44  ;;  %v1086_v47 = vpack.c.bf16 %v1030_v48, %v2851_v8  ;;  %v625_v29 = vpop.f32.mrf.mxu0 }
 0x235   :  { %v2068_v22 = vpop.eup %2067  ;;  %v974_v25 = vadd.f32 1.0, %v2064_v57  ;;  %2083 = verf.f32 %v857_v61  ;;  %v614_v26 = vadd.f32 %v2830_v20, %v2702_v62  ;;  %v1088_v53 = vpack.c.bf16 %v1032_v14, %v2854_v10  ;;  %v738_v10 = vpop.f32.mrf.mxu1 }
 0x236   :  { %v2939_v5 = vmul.f32 %v973_v0, %v2824_v9  ;;  %v2941_v42 = vmul.f32 0.5, %v719_v63  ;;  %2085 = verf.f32 %v859_v56  ;;  %v727_v51 = vadd.f32 %v2836_v28, %v2705_v58  ;;  %1413 = vmatprep.mubr.bf16.mxu0 %v1086_v47 }
 0x237   :  { %v2070_v8 = vpop.eup %2069  ;;  %v976_v48 = vadd.f32 1.0, %v2066_v41  ;;  %v2945_v38 = vmul.f32 0.5, %v610_v52  ;;  %2087 = verf.f32 %v858_v32  ;;  %v616_v20 = vadd.f32 %v2859_v54, %v2707_v4  ;;  %1510 = vmatprep.mubr.bf16.mxu1 %v1088_v53  ;;  %v2963_v41 = vpop.f32.mrf.mxu0 }
 0x238   :  { %v2950_v9 = vmul.f32 %v975_v59, %v2856_v23  ;;  %v977_v63 = vadd.f32 1.0, %v2068_v22  ;;  %v2952_v14 = vmul.f32 0.5, %v723_v18  ;;  %2089 = verf.f32 %v860_v35 }
 0x239   :  { %v2072_v28 = vpop.eup %2071  ;;  %v1038_v61 = vmul.f32 %v974_v25, %v2865_v33  ;;  %v2955_v57 = vmul.f32 0.5, %v612_v31  ;;  %v861_v52 = vmul.f32 0.70710677, %v614_v26  ;;  %v1085_v0 = vpack.c.bf16 %v2869_v60, %v2839_v55  ;;  %v2974_v60 = vpop.f32.mrf.mxu1 }
 0x23a   :  { %v2074_v56 = vpop.eup %2073  ;;  %v979_v54 = vadd.f32 1.0, %v2070_v8  ;;  %v863_v32 = vmul.f32 0.70710677, %v727_v51  ;;  %v729_v23 = vadd.f32 %v2863_v1, %v2710_v30  ;;  %v1087_v18 = vpack.c.bf16 %v2880_v46, %v2844_v27 }
 0x23b   :  { %v2966_v59 = vmul.f32 %v976_v48, %v2873_v49  ;;  %v2968_v33 = vmul.f32 0.5, %v725_v44  ;;  %v862_v31 = vmul.f32 0.70710677, %v616_v20  ;;  %v2972_v55 = vadd.f32 %v2877_v36, %v2702_v62  ;;  %1414 = vmatmul.mubr.bf16.gmra.mxu0 %v1085_v0  ;;  %v744_v48 = vpop.f32.mrf.mxu1 }
 0x23c   :  { %v2076_v35 = vpop.eup %2075  ;;  %v2977_v1 = vmul.f32 %v977_v63, %v2887_v15  ;;  %v978_v27 = vadd.f32 1.0, %v2072_v28  ;;  %v2979_v46 = vmul.f32 0.5, %v614_v26  ;;  %v2983_v49 = vadd.f32 %v2885_v7, %v2705_v58  ;;  %1511 = vmatmul.mubr.bf16.gmra.mxu1 %v1087_v18  ;;  %v631_v26 = vpop.f32.mrf.mxu0 }
 0x23d   :  { %v980_v44 = vadd.f32 1.0, %v2074_v56  ;;  %2091 = verf.f32 %v861_v52  ;;  %v2985_v47 = vmul.f32 0.5, %v727_v51  ;;  %v2989_v36 = vadd.f32 %v2902_v24, %v2707_v4 }
 0x23e   :  { %v2992_v22 = vmul.f32 %v979_v54, %v2898_v39  ;;  %2093 = verf.f32 %v863_v32  ;;  %v2994_v15 = vmul.f32 0.5, %v616_v20  ;;  %v864_v25 = vmul.f32 0.70710677, %v729_v23 }
 0x23f   :  { %v2078_v53 = vpop.eup %2077  ;;  %v981_v7 = vadd.f32 1.0, %v2076_v35  ;;  %2095 = verf.f32 %v862_v31  ;;  %v865_v8 = vmul.f32 0.70710677, %v2972_v55  ;;  %v2998_v51 = vadd.f32 %v625_v29, %v2707_v4  ;;  %v746_v31 = vpop.f32.mrf.mxu1 }
 0x240   :  { %v2080_v63 = vpop.eup %2079  ;;  %v867_v24 = vmul.f32 0.70710677, %v2983_v49  ;;  %v735_v39 = vadd.f32 %v2906_v16, %v2710_v30  ;;  %v3004_v20 = vadd.f32 %v738_v10, %v2710_v30  ;;  %v1090_v28 = vpack.c.bf16 %v1038_v61, %v2916_v3  ;;  %v633_v3 = vpop.f32.mrf.mxu0 }
 0x241   :  { %v2082_v52 = vpop.eup %2081  ;;  %v3008_v0 = vmul.f32 %v978_v27, %v2911_v37  ;;  %v3011_v56 = vmul.f32 %v980_v44, %v2919_v2  ;;  %v3013_v29 = vmul.f32 0.5, %v729_v23  ;;  %v866_v54 = vmul.f32 0.70710677, %v2989_v36 }
 0x242   :  { %v2084_v32 = vpop.eup %2083  ;;  %v983_v18 = vadd.f32 1.0, %v2078_v53  ;;  %2097 = verf.f32 %v864_v25  ;;  %v624_v16 = vadd.f32 %v2925_v40, %v2702_v62  ;;  %v870_v10 = vmul.f32 0.70710677, %v2998_v51  ;;  %1421 = vmatprep.mubr.bf16.mxu0 %v1090_v28 }
 0x243   :  { %v2086_v61 = vpop.eup %2085  ;;  %v3020_v37 = vmul.f32 %v981_v7, %v2921_v12  ;;  %v982_v2 = vadd.f32 1.0, %v2080_v63  ;;  %2099 = verf.f32 %v865_v8  ;;  %v872_v23 = vmul.f32 0.70710677, %v3004_v20 }
 0x244   :  { %v2088_v35 = vpop.eup %2087  ;;  %v984_v27 = vadd.f32 1.0, %v2082_v52  ;;  %2101 = verf.f32 %v867_v24  ;;  %v868_v44 = vmul.f32 0.70710677, %v735_v39  ;;  %v1092_v40 = vpack.c.bf16 %v2966_v59, %v2928_v6  ;;  %v635_v24 = vpop.f32.mrf.mxu0 }
 0x245   :  { %v2090_v25 = vpop.eup %2089  ;;  %v985_v53 = vadd.f32 1.0, %v2084_v32  ;;  %2103 = verf.f32 %v866_v54  ;;  %v737_v28 = vadd.f32 %v2932_v50, %v2705_v58  ;;  %v1089_v12 = vpack.c.bf16 %v2939_v5, %v2895_v34  ;;  %v748_v50 = vpop.f32.mrf.mxu1 }
 0x246   :  { %v3030_v7 = vmul.f32 %v983_v18, %v2923_v13  ;;  %v869_v8 = vmul.f32 0.70710677, %v624_v16  ;;  %2105 = verf.f32 %v870_v10  ;;  %1518 = vmatprep.mubr.bf16.mxu1 %v1092_v40  ;;  %v1091_v63 = vpack.c.bf16 %v2950_v9, %v2909_v43 }
 0x247   :  { %v987_v6 = vadd.f32 1.0, %v2086_v61  ;;  %v986_v59 = vadd.f32 1.0, %v2088_v35  ;;  %2107 = verf.f32 %v872_v23  ;;  %1422 = vmatmul.mubr.bf16.gmra.mxu0 %v1089_v12  ;;  %v3035_v52 = vadd.f32 %v631_v26, %v2707_v4  ;;  %v639_v61 = vpop.f32.mrf.mxu0 }
 0x248   :  { %v1046_v34 = vmul.f32 %v982_v2, %v2930_v45  ;;  %v988_v5 = vadd.f32 1.0, %v2090_v25  ;;  %2109 = verf.f32 %v868_v44  ;;  %1519 = vmatmul.mubr.bf16.gmra.mxu1 %v1091_v63  ;;  %v3039_v13 = vadd.f32 %v744_v48, %v2710_v30 }
 0x249   :  { %v1048_v54 = vmul.f32 %v984_v27, %v2941_v42  ;;  %v3043_v43 = vmul.f32 %v985_v53, %v2945_v38  ;;  %v3046_v9 = vmul.f32 0.5, %v2989_v36  ;;  %v871_v32 = vmul.f32 0.70710677, %v737_v28 }
 0x24a   :  { %v2092_v26 = vpop.eup %2091  ;;  %v3048_v18 = vmul.f32 0.5, %v735_v39  ;;  %v3050_v10 = vmul.f32 0.5, %v624_v16  ;;  %2111 = verf.f32 %v869_v8  ;;  %v874_v45 = vmul.f32 0.70710677, %v3035_v52  ;;  %v3063_v39 = vpop.f32.mrf.mxu1 }
 0x24b   :  { %v2094_v48 = vpop.eup %2093  ;;  %v3054_v2 = vmul.f32 %v987_v6, %v2952_v14  ;;  %v3057_v42 = vmul.f32 %v986_v59, %v2955_v57  ;;  %v876_v38 = vmul.f32 0.70710677, %v3039_v13  ;;  %v3061_v36 = vadd.f32 %v635_v24, %v2707_v4 }
 0x24c   :  { %v2096_v16 = vpop.eup %2095  ;;  %v3066_v23 = vmul.f32 %v988_v5, %v2968_v33  ;;  %v3069_v35 = vadd.f32 %v633_v3, %v2702_v62  ;;  %v3072_v14 = vadd.f32 %v748_v50, %v2710_v30  ;;  %v1094_v57 = vpack.c.bf16 %v1046_v34, %v3008_v0  ;;  %v641_v3 = vpop.f32.mrf.mxu0 }
 0x24d   :  { %v989_v27 = vadd.f32 1.0, %v2092_v26  ;;  %v3075_v44 = vmul.f32 0.5, %v737_v28  ;;  %2113 = verf.f32 %v871_v32  ;;  %v3078_v40 = vadd.f32 %v746_v31, %v2705_v58  ;;  %v754_v8 = vpop.f32.mrf.mxu1 }
 0x24e   :  { %v991_v25 = vadd.f32 1.0, %v2094_v48  ;;  %v3081_v53 = vmul.f32 0.5, %v2998_v51  ;;  %v3085_v33 = vadd.f32 %v2963_v41, %v2702_v62  ;;  %2115 = verf.f32 %v874_v45  ;;  %1429 = vmatprep.mubr.bf16.mxu0 %v1094_v57 }
 0x24f   :  { %v2098_v12 = vpop.eup %2097  ;;  %v990_v0 = vadd.f32 1.0, %v2096_v16  ;;  %v3089_v28 = vadd.f32 %v2974_v60, %v2705_v58  ;;  %2117 = verf.f32 %v876_v38  ;;  %v878_v31 = vmul.f32 0.70710677, %v3061_v36 }
 0x250   :  { %v2100_v63 = vpop.eup %2099  ;;  %v877_v51 = vmul.f32 0.70710677, %v3069_v35  ;;  %v880_v24 = vmul.f32 0.70710677, %v3072_v14  ;;  %v1096_v41 = vpack.c.bf16 %v1048_v54, %v3011_v56  ;;  %v3096_v6 = vadd.f32 %v639_v61, %v2702_v62  ;;  %v643_v54 = vpop.f32.mrf.mxu0 }
 0x251   :  { %v3098_v59 = vpop.eup %2101  ;;  %v808_v50 = vmul.f32 0.5, %v3004_v20  ;;  %v879_v60 = vmul.f32 0.70710677, %v3078_v40  ;;  %2119 = verf.f32 %v878_v31  ;;  %v1093_v34 = vpack.c.bf16 %v3020_v37, %v2977_v1  ;;  %v756_v37 = vpop.f32.mrf.mxu1 }
 0x252   :  { %v2104_v5 = vpop.eup %2103  ;;  %v3105_v32 = vmul.f32 %v989_v27, %v2979_v46  ;;  %v992_v26 = vadd.f32 1.0, %v2098_v12  ;;  %v873_v56 = vmul.f32 0.70710677, %v3085_v33  ;;  %2121 = verf.f32 %v880_v24  ;;  %1526 = vmatprep.mubr.bf16.mxu1 %v1096_v41 }
 0x253   :  { %v2106_v45 = vpop.eup %2105  ;;  %v3109_v61 = vmul.f32 %v991_v25, %v2985_v47  ;;  %v1054_v20 = vmul.f32 %v990_v0, %v2994_v15  ;;  %v3112_v48 = vadd.f32 1.0, %v2100_v63  ;;  %v875_v1 = vmul.f32 0.70710677, %v3089_v28  ;;  %1430 = vmatmul.mubr.bf16.gmra.mxu0 %v1093_v34 }
 0x254   :  { %v2108_v46 = vpop.eup %2107  ;;  %2123 = verf.f32 %v877_v51  ;;  %v881_v38 = vmul.f32 0.70710677, %v3096_v6  ;;  %v1095_v16 = vpack.c.bf16 %v3030_v7, %v2992_v22  ;;  %v3119_v57 = vadd.f32 %v641_v3, %v2707_v4  ;;  %v645_v7 = vpop.f32.mrf.mxu0 }
 0x255   :  { %v2110_v47 = vpop.eup %2109  ;;  %v994_v27 = vadd.f32 1.0, %v2104_v5  ;;  %2125 = verf.f32 %v879_v60  ;;  %v3122_v15 = vadd.f32 %v754_v8, %v2710_v30  ;;  %v3125_v25 = vadd.f32 %v643_v54, %v2702_v62  ;;  %v758_v51 = vpop.f32.mrf.mxu1 }
 0x256   :  { %v1056_v12 = vmul.f32 %v992_v26, %v3013_v29  ;;  %2127 = verf.f32 %v873_v56  ;;  %1527 = vmatmul.mubr.bf16.gmra.mxu1 %v1095_v16  ;;  %v882_v0 = vmul.f32 0.70710677, %v3119_v57  ;;  %v3130_v22 = vadd.f32 %v756_v37, %v2705_v58 }
 0x257   :  { %v2112_v3 = vpop.eup %2111  ;;  %v998_v31 = vadd.f32 1.0, %v2106_v45  ;;  %v1000_v63 = vadd.f32 1.0, %v2108_v46  ;;  %2129 = verf.f32 %v875_v1  ;;  %v884_v8 = vmul.f32 0.70710677, %v3122_v15 }
 0x258   :  { %v996_v24 = vadd.f32 1.0, %v2110_v47  ;;  %2131 = verf.f32 %v881_v38  ;;  %v3135_v62 = vadd.f32 %v3063_v39, %v2705_v58  ;;  %v885_v29 = vmul.f32 0.70710677, %v3125_v25 }
 0x259   :  { %v1058_v41 = vmul.f32 %v994_v27, %v3046_v9  ;;  %2133 = verf.f32 %v882_v0  ;;  %v887_v60 = vmul.f32 0.70710677, %v3130_v22  ;;  %v3141_v34 = vadd.f32 %v645_v7, %v2707_v4 }
 0x25a   :  { %v2114_v5 = vpop.eup %2113  ;;  %v997_v26 = vadd.f32 1.0, %v2112_v3  ;;  %2135 = verf.f32 %v884_v8  ;;  %v3144_v56 = vadd.f32 %v758_v51, %v2710_v30  ;;  %v1098_v54 = vpack.c.bf16 %v1054_v20, %v3057_v42 }
 0x25b   :  { %v2116_v58 = vpop.eup %2115  ;;  %v1062_v39 = vmul.f32 %v998_v31, %v3081_v53  ;;  %v1064_v45 = vmul.f32 %v1000_v63, %v808_v50  ;;  %2137 = verf.f32 %v885_v29  ;;  %v886_v9 = vmul.f32 0.70710677, %v3141_v34 }
 0x25c   :  { %v2118_v1 = vpop.eup %2117  ;;  %v814_v37 = vmul.f32 0.5, %v3061_v36  ;;  %v883_v4 = vmul.f32 0.70710677, %v3135_v62  ;;  %2139 = verf.f32 %v887_v60  ;;  %v888_v46 = vmul.f32 0.70710677, %v3144_v56  ;;  %1437 = vmatprep.mubr.bf16.mxu0 %v1098_v54 }
 0x25d   :  { %v1060_v30 = vmul.f32 %v996_v24, %v3048_v18  ;;  %v999_v38 = vadd.f32 1.0, %v2114_v5  ;;  %2141 = verf.f32 %v886_v9  ;;  %v1100_v42 = vpack.c.bf16 %v1056_v12, %v3066_v23 }
 0x25e   :  { %v2120_v53 = vpop.eup %2119  ;;  %v1002_v50 = vadd.f32 1.0, %v2116_v58  ;;  %2143 = verf.f32 %v888_v46  ;;  %v1097_v20 = vpack.c.bf16 %v3105_v32, %v3043_v43  ;;  %v1099_v36 = vpack.c.bf16 %v3109_v61, %v3054_v2 }
 0x25f   :  { %v2122_v16 = vpop.eup %2121  ;;  %v1004_v47 = vadd.f32 1.0, %v2118_v1  ;;  %v1006_v27 = vadd.f32 1.0, %v2120_v53  ;;  %1534 = vmatprep.mubr.bf16.mxu1 %v1100_v42  ;;  %v1102_v0 = vpack.c.bf16 %v1062_v39, %v1058_v41  ;;  %v1104_v7 = vpack.c.bf16 %v1064_v45, %v1060_v30 }
 0x260   :  { %v995_v18 = vadd.f32 1.0, %v3098_v59  ;;  %v816_v3 = vmul.f32 0.5, %v3072_v14  ;;  %v1008_v23 = vadd.f32 1.0, %v2122_v16  ;;  %2145 = verf.f32 %v883_v4  ;;  %1438 = vmatmul.mubr.bf16.gmra.mxu0 %v1097_v20  ;;  %1535 = vmatmul.mubr.bf16.gmra.mxu1 %v1099_v36 }
 0x261   :  { %v2124_v12 = vpop.eup %2123  ;;  %v801_v43 = vmul.f32 0.5, %v2972_v55  ;;  %v810_v32 = vmul.f32 0.5, %v3035_v52  ;;  %v812_v2 = vmul.f32 0.5, %v3039_v13  ;;  %v1070_v61 = vmul.f32 %v1006_v27, %v814_v37  ;;  %1445 = vmatprep.mubr.bf16.mxu0 %v1102_v0  ;;  %1542 = vmatprep.mubr.bf16.mxu1 %v1104_v7 }
 0x262   :  { %v2126_v31 = vpop.eup %2125  ;;  %v803_v63 = vmul.f32 0.5, %v2983_v49  ;;  %v1061_v59 = vmul.f32 %v997_v26, %v3050_v10  ;;  %v1063_v14 = vmul.f32 %v999_v38, %v3075_v44  ;;  %v1072_v8 = vmul.f32 %v1008_v23, %v816_v3 }
 0x263   :  { %v2128_v51 = vpop.eup %2127  ;;  %v1066_v24 = vmul.f32 %v1002_v50, %v810_v32  ;;  %v1068_v29 = vmul.f32 %v1004_v47, %v812_v2  ;;  %v1057_v55 = vmul.f32 %v3112_v48, %v801_v43  ;;  %v1005_v13 = vadd.f32 1.0, %v2124_v12 }
 0x264   :  { %v2130_v41 = vpop.eup %2129  ;;  %v1059_v52 = vmul.f32 %v995_v18, %v803_v63  ;;  %v1007_v5 = vadd.f32 1.0, %v2126_v31  ;;  %v1001_v10 = vadd.f32 1.0, %v2128_v51  ;;  %v813_v44 = vmul.f32 0.5, %v3069_v35 }
 0x265   :  { %v2132_v60 = vpop.eup %2131  ;;  %v1106_v54 = vpack.c.bf16 %v1070_v61, %v1066_v24  ;;  %v1108_v58 = vpack.c.bf16 %v1072_v8, %v1068_v29  ;;  %v1101_v45 = vpack.c.bf16 %v1061_v59, %v1057_v55  ;;  %v1003_v26 = vadd.f32 1.0, %v2130_v41 }
 0x266   :  { %v2134_v39 = vpop.eup %2133  ;;  %v1103_v49 = vpack.c.bf16 %v1063_v14, %v1059_v52  ;;  %v815_v1 = vmul.f32 0.5, %v3078_v40  ;;  %v809_v4 = vmul.f32 0.5, %v3085_v33  ;;  %v811_v46 = vmul.f32 0.5, %v3089_v28 }
 0x267   :  { %v2136_v9 = vpop.eup %2135  ;;  %v1069_v30 = vmul.f32 %v1005_v13, %v813_v44  ;;  %v1010_v42 = vadd.f32 1.0, %v2134_v39  ;;  %v818_v50 = vmul.f32 0.5, %v3119_v57  ;;  %v822_v16 = vmul.f32 0.5, %v3141_v34 }
 0x268   :  { %v2138_v37 = vpop.eup %2137  ;;  %1446 = vmatmul.mubr.bf16.gmra.mxu0 %v1101_v45  ;;  %1543 = vmatmul.mubr.bf16.gmra.mxu1 %v1103_v49  ;;  %v1071_v38 = vmul.f32 %v1007_v5, %v815_v1  ;;  %v1012_v20 = vadd.f32 1.0, %v2136_v9  ;;  %v1065_v36 = vmul.f32 %v1001_v10, %v809_v4  ;;  %v1067_v40 = vmul.f32 %v1003_v26, %v811_v46 }
 0x269   :  { %v2140_v48 = vpop.eup %2139  ;;  %1453 = vmatprep.mubr.bf16.mxu0 %v1106_v54  ;;  %1550 = vmatprep.mubr.bf16.mxu1 %v1108_v58  ;;  %v820_v47 = vmul.f32 0.5, %v3122_v15  ;;  %v824_v27 = vmul.f32 0.5, %v3144_v56  ;;  %v1074_v7 = vmul.f32 %v1010_v42, %v818_v50  ;;  %v1013_v43 = vadd.f32 1.0, %v2138_v37 }
 0x26a   :  { %v2142_v53 = vpop.eup %2141  ;;  %v1105_v3 = vpack.c.bf16 %v1069_v30, %v1065_v36  ;;  %v1107_v23 = vpack.c.bf16 %v1071_v38, %v1067_v40  ;;  %v1015_v57 = vadd.f32 1.0, %v2140_v48  ;;  %v821_v2 = vmul.f32 0.5, %v3125_v25 }
 0x26b   :  { %v2144_v35 = vpop.eup %2143  ;;  %v1014_v33 = vadd.f32 1.0, %v2142_v53  ;;  %v1076_v12 = vmul.f32 %v1012_v20, %v820_v47  ;;  %v1009_v31 = vadd.f32 1.0, %v2132_v60  ;;  %v823_v63 = vmul.f32 0.5, %v3130_v22  ;;  %v3182_v20 = vld [vmem:[%s3214_s2 + $0x6] ss:$0 sm:$0xff] }
 0x26c   :  { %v1016_v28 = vadd.f32 1.0, %v2144_v35  ;;  %v817_v56 = vmul.f32 0.5, %v3096_v6  ;;  %v819_v59 = vmul.f32 0.5, %v3135_v62  ;;  %v1077_v14 = vmul.f32 %v1013_v43, %v821_v2 }
 0x26d   :  { %v2146_v0 = vpop.eup %2145  ;;  %v1078_v18 = vmul.f32 %v1014_v33, %v822_v16  ;;  %v1079_v8 = vmul.f32 %v1015_v57, %v823_v63 }
 0x26e   :  { %v1080_v32 = vmul.f32 %v1016_v28, %v824_v27  ;;  %v1011_v34 = vadd.f32 1.0, %v2146_v0  ;;  %v1073_v51 = vmul.f32 %v1009_v31, %v817_v56 }
 0x26f   :  { %v1110_v61 = vpack.c.bf16 %v1078_v18, %v1074_v7 }
 0x270   :  { %1454 = vmatmul.mubr.bf16.gmra.mxu0 %v1105_v3  ;;  %1551 = vmatmul.mubr.bf16.gmra.mxu1 %v1107_v23  ;;  %v1112_v15 = vpack.c.bf16 %v1080_v32, %v1076_v12  ;;  %v1075_v24 = vmul.f32 %v1011_v34, %v819_v59  ;;  %v1109_v29 = vpack.c.bf16 %v1077_v14, %v1073_v51 }
 0x271   :  { %1461 = vmatprep.mubr.bf16.mxu0 %v1110_v61 }
 0x272   :  { %1558 = vmatprep.mubr.bf16.mxu1 %v1112_v15  ;;  %v1111_v25 = vpack.c.bf16 %v1079_v8, %v1075_v24 }
 0x278   :  { %1462 = vmatmul.mubr.bf16.gmra.mxu0 %v1109_v29  ;;  %1559 = vmatmul.mubr.bf16.gmra.mxu1 %v1111_v25 }
 0x2eb   :  { %v1794_v41 = vpop.f32.mrf.mxu0 }
 0x2ec   :  { %v1858_v55 = vpop.f32.mrf.mxu1 }
 0x2ed   :  { %v1795_v22 = vpop.f32.mrf.mxu0 }
 0x2ee   :  { %v1859_v52 = vpop.f32.mrf.mxu1  ;;  %v1796_v53 = vadd.f32 %v1795_v22, %v1794_v41 }
 0x2ef   :  { %v1797_v60 = vpop.f32.mrf.mxu0  ;;  %v1860_v18 = vadd.f32 %v1859_v52, %v1858_v55 }
 0x2f0   :  { %v1861_v13 = vpop.f32.mrf.mxu1  ;;  %v1408_v33 = vadd.f32 %v1796_v53, %v3182_v20 }
 0x2f1   :  { %v1798_v5 = vpop.f32.mrf.mxu0 }
 0x2f2   :  { %v1862_v54 = vpop.f32.mrf.mxu1  ;;  %v1799_v30 = vadd.f32 %v1798_v5, %v1797_v60  ;;  %v1505_v32 = vadd.f32 %v1860_v18, %v1408_v33 }
 0x2f3   :  { %v1863_v47 = vadd.f32 %v1862_v54, %v1861_v13 }
 0x2f4   :  { %v1411_v36 = vadd.f32 %v1799_v30, %v3182_v20  ;;  %v1567_v24 = vadd.f32 %v1505_v32, %v2213_v11  ;;  %v3237_v11 = vld [vmem:[#allocation2_spill] sm:$0xff] }
 0x2f6   :  { %v1508_v3 = vadd.f32 %v1863_v47, %v1411_v36 }
 0x2f8   :  { %v1568_v56 = vadd.f32 %v1508_v3, %v2232_v19 }
 0x2fa   :  { %v1682_v60 = vadd.f32 %v1568_v56, %v1567_v24  ;;  %v3243_v24 = vld [vmem:[#allocation8_spill] sm:$0xff] }
 0x2fb   :  { %v1800_v6 = vpop.f32.mrf.mxu0 }
 0x2fc   :  { %v1864_v58 = vpop.f32.mrf.mxu1 }
 0x2fd   :  { %v1801_v62 = vpop.f32.mrf.mxu0 }
 0x2fe   :  { %v1865_v39 = vpop.f32.mrf.mxu1  ;;  %v1802_v50 = vadd.f32 %v1801_v62, %v1800_v6 }
 0x2ff   :  { %v1803_v45 = vpop.f32.mrf.mxu0  ;;  %v1866_v23 = vadd.f32 %v1865_v39, %v1864_v58 }
 0x300   :  { %v1867_v49 = vpop.f32.mrf.mxu1  ;;  %v1416_v27 = vadd.f32 %v1802_v50, %v3182_v20  ;;  %v3239_v50 = vld [vmem:[#allocation4_spill] sm:$0xff] }
 0x301   :  { %v1804_v9 = vpop.f32.mrf.mxu0 }
 0x302   :  { %v1868_v10 = vpop.f32.mrf.mxu1  ;;  %v1805_v40 = vadd.f32 %v1804_v9, %v1803_v45  ;;  %v1513_v2 = vadd.f32 %v1866_v23, %v1416_v27 }
 0x303   :  { %v1869_v61 = vadd.f32 %v1868_v10, %v1867_v49 }
 0x304   :  { %v1419_v12 = vadd.f32 %v1805_v40, %v3182_v20  ;;  %v1569_v29 = vadd.f32 %v1513_v2, %v2225_v17 }
 0x306   :  { %v1516_v59 = vadd.f32 %v1869_v61, %v1419_v12  ;;  %v1683_v39 = vadd.f32 %v1682_v60, %v1569_v29 }
 0x307   :  { %v1806_v26 = vpop.f32.mrf.mxu0 }
 0x308   :  { %v1870_v44 = vpop.f32.mrf.mxu1  ;;  %v1570_v13 = vadd.f32 %v1516_v59, %v2236_v21  ;;  %v3238_v21 = vld [vmem:[#allocation3_spill] sm:$0xff] }
 0x309   :  { %v1807_v1 = vpop.f32.mrf.mxu0 }
 0x30a   :  { %v1871_v37 = vpop.f32.mrf.mxu1  ;;  %v1808_v28 = vadd.f32 %v1807_v1, %v1806_v26 }
 0x30b   :  { %v1809_v4 = vpop.f32.mrf.mxu0  ;;  %v1872_v14 = vadd.f32 %v1871_v37, %v1870_v44  ;;  %v1684_v44 = vadd.f32 %v1683_v39, %v1570_v13 }
 0x30c   :  { %v1873_v48 = vpop.f32.mrf.mxu1  ;;  %v1424_v31 = vadd.f32 %v1808_v28, %v3182_v20  ;;  %v3240_v28 = vld [vmem:[#allocation5_spill] sm:$0xff] }
 0x30d   :  { %v1810_v46 = vpop.f32.mrf.mxu0 }
 0x30e   :  { %v1874_v38 = vpop.f32.mrf.mxu1  ;;  %v1811_v57 = vadd.f32 %v1810_v46, %v1809_v4  ;;  %v1521_v25 = vadd.f32 %v1872_v14, %v1424_v31 }
 0x30f   :  { %v1875_v22 = vadd.f32 %v1874_v38, %v1873_v48 }
 0x310   :  { %v1427_v8 = vadd.f32 %v1811_v57, %v3182_v20  ;;  %v1571_v45 = vadd.f32 %v1521_v25, %v3237_v11 }
 0x312   :  { %v1524_v54 = vadd.f32 %v1875_v22, %v1427_v8  ;;  %v1685_v38 = vadd.f32 %v1684_v44, %v1571_v45 }
 0x313   :  { %v1812_v42 = vpop.f32.mrf.mxu0 }
 0x314   :  { %v1572_v4 = vadd.f32 %v1524_v54, %v3238_v21  ;;  %v3244_v54 = vld [vmem:[#allocation9_spill] sm:$0xff] }
 0x315   :  { %v1813_v35 = vpop.f32.mrf.mxu0 }
 0x316   :  { %v1876_v16 = vpop.f32.mrf.mxu1  ;;  %v1814_v15 = vadd.f32 %v1813_v35, %v1812_v42  ;;  %v1686_v27 = vadd.f32 %v1685_v38, %v1572_v4 }
 0x317   :  { %v1815_v7 = vpop.f32.mrf.mxu0 }
 0x318   :  { %v1877_v0 = vpop.f32.mrf.mxu1  ;;  %v1432_v52 = vadd.f32 %v1814_v15, %v3182_v20 }
 0x319   :  { %v1816_v34 = vpop.f32.mrf.mxu0  ;;  %v1878_v6 = vadd.f32 %v1877_v0, %v1876_v16 }
 0x31a   :  { %v1879_v43 = vpop.f32.mrf.mxu1  ;;  %v1817_v51 = vadd.f32 %v1816_v34, %v1815_v7 }
 0x31b   :  { %v1529_v9 = vadd.f32 %v1878_v6, %v1432_v52 }
 0x31c   :  { %v1880_v63 = vpop.f32.mrf.mxu1  ;;  %v1435_v58 = vadd.f32 %v1817_v51, %v3182_v20 }
 0x31d   :  { %v1881_v10 = vadd.f32 %v1880_v63, %v1879_v43  ;;  %v1573_v35 = vadd.f32 %v1529_v9, %v3239_v50  ;;  %v3241_v43 = vld [vmem:[#allocation6_spill] sm:$0xff]  ;;  %v3242_v63 = vld [vmem:[#allocation7_spill] sm:$0xff] }
 0x31f   :  { %v1532_v48 = vadd.f32 %v1881_v10, %v1435_v58  ;;  %v1687_v12 = vadd.f32 %v1686_v27, %v1573_v35 }
 0x320   :  { %v1818_v41 = vpop.f32.mrf.mxu0  ;;  %v1882_v55 = vpop.f32.mrf.mxu1 }
 0x321   :  { %v1574_v0 = vadd.f32 %v1532_v48, %v3240_v28  ;;  %v3245_v48 = vld [vmem:[#allocation10_spill] sm:$0xff] }
 0x322   :  { %v1819_v5 = vpop.f32.mrf.mxu0  ;;  %v1883_v19 = vpop.f32.mrf.mxu1  ;;  %vm1703_vm0 = vcmp.eq.s32.totalorder %v3245_v48, 0 }
 0x323   :  { %v1820_v62 = vadd.f32 %v1819_v5, %v1818_v41  ;;  %v1884_v46 = vadd.f32 %v1883_v19, %v1882_v55  ;;  %v1688_v34 = vadd.f32 %v1687_v12, %v1574_v0 }
 0x324   :  { %v1821_v17 = vpop.f32.mrf.mxu0  ;;  %v1885_v49 = vpop.f32.mrf.mxu1 }
 0x325   :  { %v1440_v26 = vadd.f32 %v1820_v62, %v3182_v20 }
 0x326   :  { %v1822_v1 = vpop.f32.mrf.mxu0  ;;  %v1886_v37 = vpop.f32.mrf.mxu1 }
 0x327   :  { %v1823_v30 = vadd.f32 %v1822_v1, %v1821_v17  ;;  %v1537_v36 = vadd.f32 %v1884_v46, %v1440_v26  ;;  %v1887_v16 = vadd.f32 %v1886_v37, %v1885_v49 }
 0x328   :  { %v1824_v42 = vpop.f32.mrf.mxu0  ;;  %v1888_v53 = vpop.f32.mrf.mxu1 }
 0x329   :  { %v1443_v40 = vadd.f32 %v1823_v30, %v3182_v20  ;;  %v1575_v57 = vadd.f32 %v1537_v36, %v3241_v43 }
 0x32a   :  { %v1825_v33 = vpop.f32.mrf.mxu0  ;;  %v1889_v47 = vpop.f32.mrf.mxu1 }
 0x32b   :  { %v1540_v7 = vadd.f32 %v1887_v16, %v1443_v40  ;;  %v1826_v18 = vadd.f32 %v1825_v33, %v1824_v42  ;;  %v1890_v2 = vadd.f32 %v1889_v47, %v1888_v53  ;;  %v1689_v51 = vadd.f32 %v1688_v34, %v1575_v57 }
 0x32c   :  { %v1827_v3 = vpop.f32.mrf.mxu0  ;;  %v1891_v23 = vpop.f32.mrf.mxu1 }
 0x32d   :  { %v1448_v32 = vadd.f32 %v1826_v18, %v3182_v20  ;;  %v1576_v15 = vadd.f32 %v1540_v7, %v3242_v63 }
 0x32e   :  { %v1828_v61 = vpop.f32.mrf.mxu0  ;;  %v1892_v31 = vpop.f32.mrf.mxu1 }
 0x32f   :  { %v1545_v56 = vadd.f32 %v1890_v2, %v1448_v32  ;;  %v1829_v59 = vadd.f32 %v1828_v61, %v1827_v3  ;;  %v1893_v41 = vadd.f32 %v1892_v31, %v1891_v23  ;;  %v1690_v52 = vadd.f32 %v1689_v51, %v1576_v15 }
 0x330   :  { %v1830_v14 = vpop.f32.mrf.mxu0  ;;  %v1894_v8 = vpop.f32.mrf.mxu1 }
 0x331   :  { %v1577_v29 = vadd.f32 %v1545_v56, %v3243_v24  ;;  %v1451_v25 = vadd.f32 %v1829_v59, %v3182_v20 }
 0x332   :  { %v1831_v55 = vpop.f32.mrf.mxu0  ;;  %v1895_v22 = vpop.f32.mrf.mxu1 }
 0x333   :  { %v1548_v60 = vadd.f32 %v1893_v41, %v1451_v25  ;;  %v1691_v19 = vadd.f32 %v1690_v52, %v1577_v29 }
 0x334   :  { %v1833_v13 = vpop.f32.mrf.mxu0  ;;  %v1897_v5 = vpop.f32.mrf.mxu1 }
 0x335   :  { %v1578_v6 = vadd.f32 %v1548_v60, %v3244_v54 }
 0x336   :  { %v1834_v58 = vpop.f32.mrf.mxu0  ;;  %v1898_v62 = vpop.f32.mrf.mxu1 }
 0x337   :  { %v1692_v39 = vadd.f32 %v1691_v19, %v1578_v6 }
 0x338   :  { %v1836_v11 = vpop.f32.mrf.mxu0  ;;  %v1900_v45 = vpop.f32.mrf.mxu1 }
 0x339   :  { %v1697_v17 = vrot.slane %v1692_v39, 4 }
 0x33a   :  { %v1837_v49 = vpop.f32.mrf.mxu0  ;;  %v1901_v9 = vpop.f32.mrf.mxu1 }
 0x33b   :  { %v1698_v10 = vadd.f32 %v1697_v17, %v1692_v39 }
 0x33c   :  { %v1839_v20 = vpop.f32.mrf.mxu0  ;;  %v1903_v26 = vpop.f32.mrf.mxu1 }
 0x33d   :  { %v1699_v44 = vrot.slane %v1698_v10, 2 }
 0x33e   :  { %v1840_v1 = vpop.f32.mrf.mxu0  ;;  %v1904_v37 = vpop.f32.mrf.mxu1 }
 0x33f   :  { %v1700_v21 = vadd.f32 %v1699_v44, %v1698_v10 }
 0x341   :  { %v1701_v4 = vrot.slane %v1700_v21, 1 }
 0x343   :  { %v1702_v46 = vadd.f32 %v1701_v4, %v1700_v21 }
 0x345   :  { %v1704_v30 = vsel %vm1703_vm0, %v1702_v46, 0.0 }
 0x346   :  { %1705 = vst [vmem:[%s3218_s6] sm:$0xff] %v1704_v30 }

</bundles_post_ra>
